<compile_context>
chip_gen: v5e
topology: v5e:2x2
jax: 0.10.0
libtpu: 0.0.40
codegen_flags: <defaults>
</compile_context>

<pallas_src>
import functools

import jax
import jax.numpy as jnp
from jax.experimental import pallas as pl
from jax.experimental.pallas import tpu as pltpu

_LANE = 128


# --------------------------------------------------------------------------
# Shape helpers
# --------------------------------------------------------------------------
def _conv_dims(h, w):
    oh1, ow1 = (h - 8) // 4 + 1, (w - 8) // 4 + 1   # conv1 k8 s4
    oh2, ow2 = (oh1 - 4) // 2 + 1, (ow1 - 4) // 2 + 1  # conv2 k4 s2
    oh3, ow3 = oh2 - 2, ow2 - 2                     # conv3 k3 s1
    return (oh1, ow1), (oh2, ow2), (oh3, ow3)


def _vmem_limit_bytes():
    """Per-generation scoped-VMEM budget (half of physical, 32 MiB floor)."""
    cap = 64 * 1024 * 1024
    try:
        info = pltpu.get_tpu_info()
        cap = int(getattr(info, "vmem_capacity_bytes", cap))
    except Exception:
        pass
    return max(32 * 1024 * 1024, min(cap // 2, 96 * 1024 * 1024))


# --------------------------------------------------------------------------
# Wrapper-side input layout transform (pure layout, no expansion, done on uint8)
#   NCHW uint8 -> (B, H4p, 2*wsub, 16*C) bf16 where
#     channel = (h_phase*4 + w_phase)*C + ci   (space-to-depth by stride 4)
#     width   = [even w4 positions | odd w4 positions], each padded to wsub
# --------------------------------------------------------------------------
def _prep_input(x_nchw, oh1, ow2):
    B, C, H, W = x_nchw.shape
    hp, wp = (-H) % 4, (-W) % 4
    x = jnp.pad(x_nchw, ((0, 0), (0, 0), (0, hp), (0, wp)))
    H4, W4 = (H + hp) // 4, (W + wp) // 4
    x = x.reshape(B, C, H4, 4, W4, 4)
    x = jnp.transpose(x, (0, 2, 4, 3, 5, 1)).reshape(B, H4, W4, 16 * C)
    halfpad = ow2 + 1
    wsub = max(halfpad + 1, (W4 + 1) // 2)
    xe = x[:, :, 0::2]
    xo = x[:, :, 1::2]
    xe = jnp.pad(xe, ((0, 0), (0, 0), (0, wsub - xe.shape[2]), (0, 0)))
    xo = jnp.pad(xo, ((0, 0), (0, 0), (0, wsub - xo.shape[2]), (0, 0)))
    x = jnp.concatenate([xe, xo], axis=2)           # (B, H4, 2*wsub, 16C)
    h4p = max(H4, oh1 + 1)                          # rows oy1 + jh must exist
    x = jnp.pad(x, ((0, 0), (0, h4p - H4), (0, 0), (0, 0)))
    return x.astype(jnp.bfloat16)                   # 0..255 exact in bf16


# --------------------------------------------------------------------------
# The fused kernel (one image per grid step)
# --------------------------------------------------------------------------
def _make_kernel(dims):
    (oh1, _), (oh2, ow2), (oh3, ow3) = dims
    halfpad = ow2 + 1
    rs1 = 2 * halfpad                     # conv1-output rows per oy1: (p, m)

    def kernel(x_ref, w1_ref, b1_ref, w2_ref, b2_ref, w3_ref, b3_ref,
               wh1_ref, bh1_ref, wh2_ref, bh2_ref, o_ref):
        wsub = x_ref.shape[2] // 2
        f32 = jnp.float32

        # ---- conv1: 8x8 stride 4, as 2x2 taps over the space-to-depth input
        acc = jnp.zeros((oh1 * rs1, 32), f32)
        for jh in range(2):
            for jw in range(2):
                pieces = []
                for oy in range(oh1):
                    for p in range(2):
                        pq = (p + jw) % 2
                        carry = (p + jw) // 2
                        c0 = pq * wsub + carry
                        pieces.append(x_ref[0, oy + jh, c0:c0 + halfpad, :])
                patch = jnp.concatenate(pieces, axis=0)
                acc = acc + jnp.dot(patch, w1_ref[jh, jw],
                                    preferred_element_type=f32)
        h1 = jnp.maximum(acc + b1_ref[...], 0.0).astype(jnp.bfloat16)
        # h1 rows: (oy1, p, m)  <->  conv1 output column ox1 = 2*m + p

        # ---- conv2: 4x4 stride 2
        acc = jnp.zeros((oh2 * ow2, 64), f32)
        for kh in range(4):
            for kw in range(4):
                p, d = kw % 2, kw // 2
                pieces = []
                for oy in range(oh2):
                    base = (2 * oy + kh) * rs1 + p * halfpad + d
                    pieces.append(h1[base:base + ow2, :])
                patch = jnp.concatenate(pieces, axis=0)
                acc = acc + jnp.dot(patch, w2_ref[kh, kw],
                                    preferred_element_type=f32)
        h2 = jnp.maximum(acc + b2_ref[...], 0.0).astype(jnp.bfloat16)
        # h2 rows: (oy2, ox2)

        # ---- conv3: 3x3 stride 1
        acc = jnp.zeros((oh3 * ow3, 64), f32)
        for kh in range(3):
            for kw in range(3):
                pieces = []
                for oy in range(oh3):
                    base = (oy + kh) * ow2 + kw
                    pieces.append(h2[base:base + ow3, :])
                patch = jnp.concatenate(pieces, axis=0)
                acc = acc + jnp.dot(patch, w3_ref[kh, kw],
                                    preferred_element_type=f32)
        h3 = jnp.maximum(acc + b3_ref[...], 0.0).astype(jnp.bfloat16)
        # h3 rows: (oy3, ox3); feature order is (h, w, c)

        # ---- fused policy/value heads: layer 1 as a sum of per-pixel matmuls
        hidden = jnp.zeros((1, 1024), f32)
        for s in range(oh3 * ow3):
            hidden = hidden + jnp.dot(h3[s:s + 1, :], wh1_ref[s],
                                      preferred_element_type=f32)
        hidden = jnp.maximum(hidden + bh1_ref[...], 0.0).astype(jnp.bfloat16)
        out = jnp.dot(hidden, wh2_ref[...], preferred_element_type=f32)
        o_ref[0] = out + bh2_ref[...]

    return kernel


# --------------------------------------------------------------------------
# Forward pass (mirrors AtariA2C.forward; x/255 folded into conv1 weights)
# --------------------------------------------------------------------------
def atari_a2c_forward(params, x_nchw, n_actions):
    B = x_nchw.shape[0]
    H, W = x_nchw.shape[2], x_nchw.shape[3]
    dims = _conv_dims(H, W)
    (oh1, _), (_, ow2), _ = dims
    xk = _prep_input(x_nchw, oh1, ow2)

    names = ("w1", "b1", "w2", "b2", "w3", "b3", "wh1", "bh1", "wh2", "bh2")
    weights = [params[n] for n in names]

    def full_spec(a):
        nd = a.ndim
        return pl.BlockSpec(a.shape, lambda b, _nd=nd: (0,) * _nd)

    in_specs = [pl.BlockSpec((1,) + xk.shape[1:], lambda b: (b, 0, 0, 0))]
    in_specs += [full_spec(a) for a in weights]

    out = pl.pallas_call(
        _make_kernel(dims),
        out_shape=jax.ShapeDtypeStruct((B, 1, _LANE), jnp.float32),
        grid=(B,),
        in_specs=in_specs,
        out_specs=pl.BlockSpec((1, 1, _LANE), lambda b: (b, 0, 0)),
        compiler_params=pltpu.CompilerParams(
            dimension_semantics=("parallel",),
            vmem_limit_bytes=_vmem_limit_bytes(),
        ),
    )(xk, *weights)

    out = out.reshape(B, _LANE)
    return out[:, :n_actions], out[:, n_actions:n_actions + 1]


# --------------------------------------------------------------------------
# Deterministic PyTorch-default-like init, transformed into kernel layouts.
# --------------------------------------------------------------------------
def init_params(key, input_shape, n_actions):
    C, H, W = input_shape
    (_, _), (_, _), (oh3, ow3) = _conv_dims(H, W)
    assert oh3 >= 1 and ow3 >= 1, "input too small for the conv stack"
    assert n_actions + 1 <= _LANE
    feat = 64 * oh3 * ow3
    ks = jax.random.split(key, 14)

    def u(k, shape, fan_in):
        b = float(fan_in) ** -0.5
        return jax.random.uniform(k, shape, jnp.float32, -b, b)

    # PyTorch-layout parameters
    w1 = u(ks[0], (32, C, 8, 8), C * 64)
    b1 = u(ks[1], (32,), C * 64)
    w2 = u(ks[2], (64, 32, 4, 4), 32 * 16)
    b2 = u(ks[3], (64,), 32 * 16)
    w3 = u(ks[4], (64, 64, 3, 3), 64 * 9)
    b3 = u(ks[5], (64,), 64 * 9)
    pw1 = u(ks[6], (512, feat), feat)
    pb1 = u(ks[7], (512,), feat)
    pw2 = u(ks[8], (n_actions, 512), 512)
    pb2 = u(ks[9], (n_actions,), 512)
    vw1 = u(ks[10], (512, feat), feat)
    vb1 = u(ks[11], (512,), feat)
    vw2 = u(ks[12], (1, 512), 512)
    vb2 = u(ks[13], (1,), 512)

    # conv1: fold x/255; group 8x8 taps into 2x2 tap-groups over S2D channels
    w1 = (w1 / 255.0).reshape(32, C, 2, 4, 2, 4)          # (co,ci,jh,ph_h,jw,ph_w)
    w1k = jnp.transpose(w1, (2, 4, 3, 5, 1, 0)).reshape(2, 2, 16 * C, 32)
    w2k = jnp.transpose(w2, (2, 3, 1, 0))                 # (kh,kw,ci,co)
    w3k = jnp.transpose(w3, (2, 3, 1, 0))

    # heads layer 1: PyTorch feature order (c,h,w) -> kernel order (h,w,c)
    def head1(wm):
        wm = wm.reshape(512, 64, oh3, ow3)
        return jnp.transpose(wm, (2, 3, 1, 0)).reshape(oh3 * ow3, 64, 512)

    wh1 = jnp.concatenate([head1(pw1), head1(vw1)], axis=-1)   # (P3, 64, 1024)
    bh1 = jnp.concatenate([pb1, vb1]).reshape(1, 1024)

    # heads layer 2: block-diagonal into a 128-lane-dense output
    wh2 = jnp.zeros((1024, _LANE), jnp.float32)
    wh2 = wh2.at[:512, :n_actions].set(pw2.T)
    wh2 = wh2.at[512:, n_actions].set(vw2[0])
    bh2 = jnp.zeros((1, _LANE), jnp.float32)
    bh2 = bh2.at[0, :n_actions].set(pb2)
    bh2 = bh2.at[0, n_actions].set(vb2[0])

    params = dict(
        w1=w1k.astype(jnp.bfloat16), b1=b1.reshape(1, 32).astype(jnp.float32),
        w2=w2k.astype(jnp.bfloat16), b2=b2.reshape(1, 64).astype(jnp.float32),
        w3=w3k.astype(jnp.bfloat16), b3=b3.reshape(1, 64).astype(jnp.float32),
        wh1=wh1.astype(jnp.bfloat16), bh1=bh1.astype(jnp.float32),
        wh2=wh2.astype(jnp.bfloat16), bh2=bh2.astype(jnp.float32),
    )
    return params, feat


if __name__ == "__main__":
    # Small shapes consistent with the module: batch=2, frames=4, spatial 36x36
    # (conv stack stays valid: 36 -> 8 -> 3 -> 1, feature size 64).
    input_shape = (4, 36, 36)
    n_actions = 6
    batch = 2

    key = jax.random.PRNGKey(0)
    pkey, xkey = jax.random.split(key)
    params, feat_size = init_params(pkey, input_shape, n_actions)

    # ByteTensor-like uint8 input in [0, 255]
    x = jax.random.randint(xkey, (batch,) + input_shape, 0, 256,
                           dtype=jnp.int32).astype(jnp.uint8)

    fwd = jax.jit(functools.partial(atari_a2c_forward, n_actions=n_actions))
    policy, value = fwd(params, x)
    jax.block_until_ready((policy, value))

    assert policy.shape == (batch, n_actions), policy.shape
    assert value.shape == (batch, 1), value.shape
    print("KERNEL_OK")
</pallas_src>

<mosaic_0001>
module attributes {stable_mosaic.version = 11 : i64} {
  func.func @kernel(%arg0: i32, %arg1: memref<1x9x10x64xbf16, #tpu.memory_space<vmem>>, %arg2: memref<2x2x64x32xbf16, #tpu.memory_space<vmem>>, %arg3: memref<1x32xf32, #tpu.memory_space<vmem>>, %arg4: memref<4x4x32x64xbf16, #tpu.memory_space<vmem>>, %arg5: memref<1x64xf32, #tpu.memory_space<vmem>>, %arg6: memref<3x3x64x64xbf16, #tpu.memory_space<vmem>>, %arg7: memref<1x64xf32, #tpu.memory_space<vmem>>, %arg8: memref<1x64x1024xbf16, #tpu.memory_space<vmem>>, %arg9: memref<1x1024xf32, #tpu.memory_space<vmem>>, %arg10: memref<1024x128xbf16, #tpu.memory_space<vmem>>, %arg11: memref<1x128xf32, #tpu.memory_space<vmem>>, %arg12: memref<1x1x128xf32, #tpu.memory_space<vmem>>) attributes {dimension_semantics = [#tpu.dimension_semantics<parallel>], iteration_bounds = array<i64: 2>, scalar_prefetch = 0 : i64, scratch_operands = 0 : i64, tpu.core_type = #tpu.core_type<tc>, window_params = [{transform_indices = @transform_0, window_bounds = array<i64: 1, 9, 10, 64>}, {pipeline_mode = #tpu.pipeline_mode<synchronous>, transform_indices = @transform_1, window_bounds = array<i64: 2, 2, 64, 32>}, {pipeline_mode = #tpu.pipeline_mode<synchronous>, transform_indices = @transform_2, window_bounds = array<i64: 1, 32>}, {pipeline_mode = #tpu.pipeline_mode<synchronous>, transform_indices = @transform_3, window_bounds = array<i64: 4, 4, 32, 64>}, {pipeline_mode = #tpu.pipeline_mode<synchronous>, transform_indices = @transform_4, window_bounds = array<i64: 1, 64>}, {pipeline_mode = #tpu.pipeline_mode<synchronous>, transform_indices = @transform_5, window_bounds = array<i64: 3, 3, 64, 64>}, {pipeline_mode = #tpu.pipeline_mode<synchronous>, transform_indices = @transform_6, window_bounds = array<i64: 1, 64>}, {pipeline_mode = #tpu.pipeline_mode<synchronous>, transform_indices = @transform_7, window_bounds = array<i64: 1, 64, 1024>}, {pipeline_mode = #tpu.pipeline_mode<synchronous>, transform_indices = @transform_8, window_bounds = array<i64: 1, 1024>}, {pipeline_mode = #tpu.pipeline_mode<synchronous>, transform_indices = @transform_9, window_bounds = array<i64: 1024, 128>}, {pipeline_mode = #tpu.pipeline_mode<synchronous>, transform_indices = @transform_10, window_bounds = array<i64: 1, 128>}, {transform_indices = @transform_11, window_bounds = array<i64: 1, 1, 128>}]} {
    %cst = arith.constant 0.000000e+00 : f32
    %0 = vector.broadcast %cst : f32 to vector<64x32xf32>
    %c0 = arith.constant 0 : index
    %c0_0 = arith.constant 0 : index
    %c0_1 = arith.constant 0 : index
    %c0_2 = arith.constant 0 : index
    %1 = vector.load %arg1[%c0, %c0_0, %c0_1, %c0_2] : memref<1x9x10x64xbf16, #tpu.memory_space<vmem>>, vector<1x1x4x64xbf16>
    %2 = vector.shape_cast %1 : vector<1x1x4x64xbf16> to vector<4x64xbf16>
    %c0_3 = arith.constant 0 : index
    %c0_4 = arith.constant 0 : index
    %c5 = arith.constant 5 : index
    %c0_5 = arith.constant 0 : index
    %3 = vector.load %arg1[%c0_3, %c0_4, %c5, %c0_5] : memref<1x9x10x64xbf16, #tpu.memory_space<vmem>>, vector<1x1x4x64xbf16>
    %4 = vector.shape_cast %3 : vector<1x1x4x64xbf16> to vector<4x64xbf16>
    %c0_6 = arith.constant 0 : index
    %c1 = arith.constant 1 : index
    %c0_7 = arith.constant 0 : index
    %c0_8 = arith.constant 0 : index
    %5 = vector.load %arg1[%c0_6, %c1, %c0_7, %c0_8] : memref<1x9x10x64xbf16, #tpu.memory_space<vmem>>, vector<1x1x4x64xbf16>
    %6 = vector.shape_cast %5 : vector<1x1x4x64xbf16> to vector<4x64xbf16>
    %c0_9 = arith.constant 0 : index
    %c1_10 = arith.constant 1 : index
    %c5_11 = arith.constant 5 : index
    %c0_12 = arith.constant 0 : index
    %7 = vector.load %arg1[%c0_9, %c1_10, %c5_11, %c0_12] : memref<1x9x10x64xbf16, #tpu.memory_space<vmem>>, vector<1x1x4x64xbf16>
    %8 = vector.shape_cast %7 : vector<1x1x4x64xbf16> to vector<4x64xbf16>
    %c0_13 = arith.constant 0 : index
    %c2 = arith.constant 2 : index
    %c0_14 = arith.constant 0 : index
    %c0_15 = arith.constant 0 : index
    %9 = vector.load %arg1[%c0_13, %c2, %c0_14, %c0_15] : memref<1x9x10x64xbf16, #tpu.memory_space<vmem>>, vector<1x1x4x64xbf16>
    %10 = vector.shape_cast %9 : vector<1x1x4x64xbf16> to vector<4x64xbf16>
    %c0_16 = arith.constant 0 : index
    %c2_17 = arith.constant 2 : index
    %c5_18 = arith.constant 5 : index
    %c0_19 = arith.constant 0 : index
    %11 = vector.load %arg1[%c0_16, %c2_17, %c5_18, %c0_19] : memref<1x9x10x64xbf16, #tpu.memory_space<vmem>>, vector<1x1x4x64xbf16>
    %12 = vector.shape_cast %11 : vector<1x1x4x64xbf16> to vector<4x64xbf16>
    %c0_20 = arith.constant 0 : index
    %c3 = arith.constant 3 : index
    %c0_21 = arith.constant 0 : index
    %c0_22 = arith.constant 0 : index
    %13 = vector.load %arg1[%c0_20, %c3, %c0_21, %c0_22] : memref<1x9x10x64xbf16, #tpu.memory_space<vmem>>, vector<1x1x4x64xbf16>
    %14 = vector.shape_cast %13 : vector<1x1x4x64xbf16> to vector<4x64xbf16>
    %c0_23 = arith.constant 0 : index
    %c3_24 = arith.constant 3 : index
    %c5_25 = arith.constant 5 : index
    %c0_26 = arith.constant 0 : index
    %15 = vector.load %arg1[%c0_23, %c3_24, %c5_25, %c0_26] : memref<1x9x10x64xbf16, #tpu.memory_space<vmem>>, vector<1x1x4x64xbf16>
    %16 = vector.shape_cast %15 : vector<1x1x4x64xbf16> to vector<4x64xbf16>
    %c0_27 = arith.constant 0 : index
    %c4 = arith.constant 4 : index
    %c0_28 = arith.constant 0 : index
    %c0_29 = arith.constant 0 : index
    %17 = vector.load %arg1[%c0_27, %c4, %c0_28, %c0_29] : memref<1x9x10x64xbf16, #tpu.memory_space<vmem>>, vector<1x1x4x64xbf16>
    %18 = vector.shape_cast %17 : vector<1x1x4x64xbf16> to vector<4x64xbf16>
    %c0_30 = arith.constant 0 : index
    %c4_31 = arith.constant 4 : index
    %c5_32 = arith.constant 5 : index
    %c0_33 = arith.constant 0 : index
    %19 = vector.load %arg1[%c0_30, %c4_31, %c5_32, %c0_33] : memref<1x9x10x64xbf16, #tpu.memory_space<vmem>>, vector<1x1x4x64xbf16>
    %20 = vector.shape_cast %19 : vector<1x1x4x64xbf16> to vector<4x64xbf16>
    %c0_34 = arith.constant 0 : index
    %c5_35 = arith.constant 5 : index
    %c0_36 = arith.constant 0 : index
    %c0_37 = arith.constant 0 : index
    %21 = vector.load %arg1[%c0_34, %c5_35, %c0_36, %c0_37] : memref<1x9x10x64xbf16, #tpu.memory_space<vmem>>, vector<1x1x4x64xbf16>
    %22 = vector.shape_cast %21 : vector<1x1x4x64xbf16> to vector<4x64xbf16>
    %c0_38 = arith.constant 0 : index
    %c5_39 = arith.constant 5 : index
    %c5_40 = arith.constant 5 : index
    %c0_41 = arith.constant 0 : index
    %23 = vector.load %arg1[%c0_38, %c5_39, %c5_40, %c0_41] : memref<1x9x10x64xbf16, #tpu.memory_space<vmem>>, vector<1x1x4x64xbf16>
    %24 = vector.shape_cast %23 : vector<1x1x4x64xbf16> to vector<4x64xbf16>
    %c0_42 = arith.constant 0 : index
    %c6 = arith.constant 6 : index
    %c0_43 = arith.constant 0 : index
    %c0_44 = arith.constant 0 : index
    %25 = vector.load %arg1[%c0_42, %c6, %c0_43, %c0_44] : memref<1x9x10x64xbf16, #tpu.memory_space<vmem>>, vector<1x1x4x64xbf16>
    %26 = vector.shape_cast %25 : vector<1x1x4x64xbf16> to vector<4x64xbf16>
    %c0_45 = arith.constant 0 : index
    %c6_46 = arith.constant 6 : index
    %c5_47 = arith.constant 5 : index
    %c0_48 = arith.constant 0 : index
    %27 = vector.load %arg1[%c0_45, %c6_46, %c5_47, %c0_48] : memref<1x9x10x64xbf16, #tpu.memory_space<vmem>>, vector<1x1x4x64xbf16>
    %28 = vector.shape_cast %27 : vector<1x1x4x64xbf16> to vector<4x64xbf16>
    %c0_49 = arith.constant 0 : index
    %c7 = arith.constant 7 : index
    %c0_50 = arith.constant 0 : index
    %c0_51 = arith.constant 0 : index
    %29 = vector.load %arg1[%c0_49, %c7, %c0_50, %c0_51] : memref<1x9x10x64xbf16, #tpu.memory_space<vmem>>, vector<1x1x4x64xbf16>
    %30 = vector.shape_cast %29 : vector<1x1x4x64xbf16> to vector<4x64xbf16>
    %c0_52 = arith.constant 0 : index
    %c7_53 = arith.constant 7 : index
    %c5_54 = arith.constant 5 : index
    %c0_55 = arith.constant 0 : index
    %31 = vector.load %arg1[%c0_52, %c7_53, %c5_54, %c0_55] : memref<1x9x10x64xbf16, #tpu.memory_space<vmem>>, vector<1x1x4x64xbf16>
    %32 = vector.shape_cast %31 : vector<1x1x4x64xbf16> to vector<4x64xbf16>
    %33 = tpu.concatenate %2, %4, %6, %8, %10, %12, %14, %16, %18, %20, %22, %24, %26, %28, %30, %32 in 0 : vector<4x64xbf16>, vector<4x64xbf16>, vector<4x64xbf16>, vector<4x64xbf16>, vector<4x64xbf16>, vector<4x64xbf16>, vector<4x64xbf16>, vector<4x64xbf16>, vector<4x64xbf16>, vector<4x64xbf16>, vector<4x64xbf16>, vector<4x64xbf16>, vector<4x64xbf16>, vector<4x64xbf16>, vector<4x64xbf16>, vector<4x64xbf16> -> vector<64x64xbf16>
    %c0_56 = arith.constant 0 : index
    %c0_57 = arith.constant 0 : index
    %c0_58 = arith.constant 0 : index
    %c0_59 = arith.constant 0 : index
    %34 = vector.load %arg2[%c0_56, %c0_57, %c0_58, %c0_59] : memref<2x2x64x32xbf16, #tpu.memory_space<vmem>>, vector<1x1x64x32xbf16>
    %35 = vector.shape_cast %34 : vector<1x1x64x32xbf16> to vector<64x32xbf16>
    %cst_60 = arith.constant dense<0.000000e+00> : vector<64x32xf32>
    %36 = tpu.matmul %33, %35, %cst_60 {dimension_numbers = #tpu.dot_dimension_numbers<[1], [0], [0], [1], [0, 0, 1, 1], [], []>} : vector<64x64xbf16>, vector<64x32xbf16>, vector<64x32xf32> -> vector<64x32xf32>
    %37 = arith.addf %0, %36 : vector<64x32xf32>
    %c0_61 = arith.constant 0 : index
    %c0_62 = arith.constant 0 : index
    %c5_63 = arith.constant 5 : index
    %c0_64 = arith.constant 0 : index
    %38 = vector.load %arg1[%c0_61, %c0_62, %c5_63, %c0_64] : memref<1x9x10x64xbf16, #tpu.memory_space<vmem>>, vector<1x1x4x64xbf16>
    %39 = vector.shape_cast %38 : vector<1x1x4x64xbf16> to vector<4x64xbf16>
    %c0_65 = arith.constant 0 : index
    %c0_66 = arith.constant 0 : index
    %c1_67 = arith.constant 1 : index
    %c0_68 = arith.constant 0 : index
    %40 = vector.load %arg1[%c0_65, %c0_66, %c1_67, %c0_68] : memref<1x9x10x64xbf16, #tpu.memory_space<vmem>>, vector<1x1x4x64xbf16>
    %41 = vector.shape_cast %40 : vector<1x1x4x64xbf16> to vector<4x64xbf16>
    %c0_69 = arith.constant 0 : index
    %c1_70 = arith.constant 1 : index
    %c5_71 = arith.constant 5 : index
    %c0_72 = arith.constant 0 : index
    %42 = vector.load %arg1[%c0_69, %c1_70, %c5_71, %c0_72] : memref<1x9x10x64xbf16, #tpu.memory_space<vmem>>, vector<1x1x4x64xbf16>
    %43 = vector.shape_cast %42 : vector<1x1x4x64xbf16> to vector<4x64xbf16>
    %c0_73 = arith.constant 0 : index
    %c1_74 = arith.constant 1 : index
    %c1_75 = arith.constant 1 : index
    %c0_76 = arith.constant 0 : index
    %44 = vector.load %arg1[%c0_73, %c1_74, %c1_75, %c0_76] : memref<1x9x10x64xbf16, #tpu.memory_space<vmem>>, vector<1x1x4x64xbf16>
    %45 = vector.shape_cast %44 : vector<1x1x4x64xbf16> to vector<4x64xbf16>
    %c0_77 = arith.constant 0 : index
    %c2_78 = arith.constant 2 : index
    %c5_79 = arith.constant 5 : index
    %c0_80 = arith.constant 0 : index
    %46 = vector.load %arg1[%c0_77, %c2_78, %c5_79, %c0_80] : memref<1x9x10x64xbf16, #tpu.memory_space<vmem>>, vector<1x1x4x64xbf16>
    %47 = vector.shape_cast %46 : vector<1x1x4x64xbf16> to vector<4x64xbf16>
    %c0_81 = arith.constant 0 : index
    %c2_82 = arith.constant 2 : index
    %c1_83 = arith.constant 1 : index
    %c0_84 = arith.constant 0 : index
    %48 = vector.load %arg1[%c0_81, %c2_82, %c1_83, %c0_84] : memref<1x9x10x64xbf16, #tpu.memory_space<vmem>>, vector<1x1x4x64xbf16>
    %49 = vector.shape_cast %48 : vector<1x1x4x64xbf16> to vector<4x64xbf16>
    %c0_85 = arith.constant 0 : index
    %c3_86 = arith.constant 3 : index
    %c5_87 = arith.constant 5 : index
    %c0_88 = arith.constant 0 : index
    %50 = vector.load %arg1[%c0_85, %c3_86, %c5_87, %c0_88] : memref<1x9x10x64xbf16, #tpu.memory_space<vmem>>, vector<1x1x4x64xbf16>
    %51 = vector.shape_cast %50 : vector<1x1x4x64xbf16> to vector<4x64xbf16>
    %c0_89 = arith.constant 0 : index
    %c3_90 = arith.constant 3 : index
    %c1_91 = arith.constant 1 : index
    %c0_92 = arith.constant 0 : index
    %52 = vector.load %arg1[%c0_89, %c3_90, %c1_91, %c0_92] : memref<1x9x10x64xbf16, #tpu.memory_space<vmem>>, vector<1x1x4x64xbf16>
    %53 = vector.shape_cast %52 : vector<1x1x4x64xbf16> to vector<4x64xbf16>
    %c0_93 = arith.constant 0 : index
    %c4_94 = arith.constant 4 : index
    %c5_95 = arith.constant 5 : index
    %c0_96 = arith.constant 0 : index
    %54 = vector.load %arg1[%c0_93, %c4_94, %c5_95, %c0_96] : memref<1x9x10x64xbf16, #tpu.memory_space<vmem>>, vector<1x1x4x64xbf16>
    %55 = vector.shape_cast %54 : vector<1x1x4x64xbf16> to vector<4x64xbf16>
    %c0_97 = arith.constant 0 : index
    %c4_98 = arith.constant 4 : index
    %c1_99 = arith.constant 1 : index
    %c0_100 = arith.constant 0 : index
    %56 = vector.load %arg1[%c0_97, %c4_98, %c1_99, %c0_100] : memref<1x9x10x64xbf16, #tpu.memory_space<vmem>>, vector<1x1x4x64xbf16>
    %57 = vector.shape_cast %56 : vector<1x1x4x64xbf16> to vector<4x64xbf16>
    %c0_101 = arith.constant 0 : index
    %c5_102 = arith.constant 5 : index
    %c5_103 = arith.constant 5 : index
    %c0_104 = arith.constant 0 : index
    %58 = vector.load %arg1[%c0_101, %c5_102, %c5_103, %c0_104] : memref<1x9x10x64xbf16, #tpu.memory_space<vmem>>, vector<1x1x4x64xbf16>
    %59 = vector.shape_cast %58 : vector<1x1x4x64xbf16> to vector<4x64xbf16>
    %c0_105 = arith.constant 0 : index
    %c5_106 = arith.constant 5 : index
    %c1_107 = arith.constant 1 : index
    %c0_108 = arith.constant 0 : index
    %60 = vector.load %arg1[%c0_105, %c5_106, %c1_107, %c0_108] : memref<1x9x10x64xbf16, #tpu.memory_space<vmem>>, vector<1x1x4x64xbf16>
    %61 = vector.shape_cast %60 : vector<1x1x4x64xbf16> to vector<4x64xbf16>
    %c0_109 = arith.constant 0 : index
    %c6_110 = arith.constant 6 : index
    %c5_111 = arith.constant 5 : index
    %c0_112 = arith.constant 0 : index
    %62 = vector.load %arg1[%c0_109, %c6_110, %c5_111, %c0_112] : memref<1x9x10x64xbf16, #tpu.memory_space<vmem>>, vector<1x1x4x64xbf16>
    %63 = vector.shape_cast %62 : vector<1x1x4x64xbf16> to vector<4x64xbf16>
    %c0_113 = arith.constant 0 : index
    %c6_114 = arith.constant 6 : index
    %c1_115 = arith.constant 1 : index
    %c0_116 = arith.constant 0 : index
    %64 = vector.load %arg1[%c0_113, %c6_114, %c1_115, %c0_116] : memref<1x9x10x64xbf16, #tpu.memory_space<vmem>>, vector<1x1x4x64xbf16>
    %65 = vector.shape_cast %64 : vector<1x1x4x64xbf16> to vector<4x64xbf16>
    %c0_117 = arith.constant 0 : index
    %c7_118 = arith.constant 7 : index
    %c5_119 = arith.constant 5 : index
    %c0_120 = arith.constant 0 : index
    %66 = vector.load %arg1[%c0_117, %c7_118, %c5_119, %c0_120] : memref<1x9x10x64xbf16, #tpu.memory_space<vmem>>, vector<1x1x4x64xbf16>
    %67 = vector.shape_cast %66 : vector<1x1x4x64xbf16> to vector<4x64xbf16>
    %c0_121 = arith.constant 0 : index
    %c7_122 = arith.constant 7 : index
    %c1_123 = arith.constant 1 : index
    %c0_124 = arith.constant 0 : index
    %68 = vector.load %arg1[%c0_121, %c7_122, %c1_123, %c0_124] : memref<1x9x10x64xbf16, #tpu.memory_space<vmem>>, vector<1x1x4x64xbf16>
    %69 = vector.shape_cast %68 : vector<1x1x4x64xbf16> to vector<4x64xbf16>
    %70 = tpu.concatenate %39, %41, %43, %45, %47, %49, %51, %53, %55, %57, %59, %61, %63, %65, %67, %69 in 0 : vector<4x64xbf16>, vector<4x64xbf16>, vector<4x64xbf16>, vector<4x64xbf16>, vector<4x64xbf16>, vector<4x64xbf16>, vector<4x64xbf16>, vector<4x64xbf16>, vector<4x64xbf16>, vector<4x64xbf16>, vector<4x64xbf16>, vector<4x64xbf16>, vector<4x64xbf16>, vector<4x64xbf16>, vector<4x64xbf16>, vector<4x64xbf16> -> vector<64x64xbf16>
    %c0_125 = arith.constant 0 : index
    %c1_126 = arith.constant 1 : index
    %c0_127 = arith.constant 0 : index
    %c0_128 = arith.constant 0 : index
    %71 = vector.load %arg2[%c0_125, %c1_126, %c0_127, %c0_128] : memref<2x2x64x32xbf16, #tpu.memory_space<vmem>>, vector<1x1x64x32xbf16>
    %72 = vector.shape_cast %71 : vector<1x1x64x32xbf16> to vector<64x32xbf16>
    %cst_129 = arith.constant dense<0.000000e+00> : vector<64x32xf32>
    %73 = tpu.matmul %70, %72, %cst_129 {dimension_numbers = #tpu.dot_dimension_numbers<[1], [0], [0], [1], [0, 0, 1, 1], [], []>} : vector<64x64xbf16>, vector<64x32xbf16>, vector<64x32xf32> -> vector<64x32xf32>
    %74 = arith.addf %37, %73 : vector<64x32xf32>
    %c0_130 = arith.constant 0 : index
    %c1_131 = arith.constant 1 : index
    %c0_132 = arith.constant 0 : index
    %c0_133 = arith.constant 0 : index
    %75 = vector.load %arg1[%c0_130, %c1_131, %c0_132, %c0_133] : memref<1x9x10x64xbf16, #tpu.memory_space<vmem>>, vector<1x1x4x64xbf16>
    %76 = vector.shape_cast %75 : vector<1x1x4x64xbf16> to vector<4x64xbf16>
    %c0_134 = arith.constant 0 : index
    %c1_135 = arith.constant 1 : index
    %c5_136 = arith.constant 5 : index
    %c0_137 = arith.constant 0 : index
    %77 = vector.load %arg1[%c0_134, %c1_135, %c5_136, %c0_137] : memref<1x9x10x64xbf16, #tpu.memory_space<vmem>>, vector<1x1x4x64xbf16>
    %78 = vector.shape_cast %77 : vector<1x1x4x64xbf16> to vector<4x64xbf16>
    %c0_138 = arith.constant 0 : index
    %c2_139 = arith.constant 2 : index
    %c0_140 = arith.constant 0 : index
    %c0_141 = arith.constant 0 : index
    %79 = vector.load %arg1[%c0_138, %c2_139, %c0_140, %c0_141] : memref<1x9x10x64xbf16, #tpu.memory_space<vmem>>, vector<1x1x4x64xbf16>
    %80 = vector.shape_cast %79 : vector<1x1x4x64xbf16> to vector<4x64xbf16>
    %c0_142 = arith.constant 0 : index
    %c2_143 = arith.constant 2 : index
    %c5_144 = arith.constant 5 : index
    %c0_145 = arith.constant 0 : index
    %81 = vector.load %arg1[%c0_142, %c2_143, %c5_144, %c0_145] : memref<1x9x10x64xbf16, #tpu.memory_space<vmem>>, vector<1x1x4x64xbf16>
    %82 = vector.shape_cast %81 : vector<1x1x4x64xbf16> to vector<4x64xbf16>
    %c0_146 = arith.constant 0 : index
    %c3_147 = arith.constant 3 : index
    %c0_148 = arith.constant 0 : index
    %c0_149 = arith.constant 0 : index
    %83 = vector.load %arg1[%c0_146, %c3_147, %c0_148, %c0_149] : memref<1x9x10x64xbf16, #tpu.memory_space<vmem>>, vector<1x1x4x64xbf16>
    %84 = vector.shape_cast %83 : vector<1x1x4x64xbf16> to vector<4x64xbf16>
    %c0_150 = arith.constant 0 : index
    %c3_151 = arith.constant 3 : index
    %c5_152 = arith.constant 5 : index
    %c0_153 = arith.constant 0 : index
    %85 = vector.load %arg1[%c0_150, %c3_151, %c5_152, %c0_153] : memref<1x9x10x64xbf16, #tpu.memory_space<vmem>>, vector<1x1x4x64xbf16>
    %86 = vector.shape_cast %85 : vector<1x1x4x64xbf16> to vector<4x64xbf16>
    %c0_154 = arith.constant 0 : index
    %c4_155 = arith.constant 4 : index
    %c0_156 = arith.constant 0 : index
    %c0_157 = arith.constant 0 : index
    %87 = vector.load %arg1[%c0_154, %c4_155, %c0_156, %c0_157] : memref<1x9x10x64xbf16, #tpu.memory_space<vmem>>, vector<1x1x4x64xbf16>
    %88 = vector.shape_cast %87 : vector<1x1x4x64xbf16> to vector<4x64xbf16>
    %c0_158 = arith.constant 0 : index
    %c4_159 = arith.constant 4 : index
    %c5_160 = arith.constant 5 : index
    %c0_161 = arith.constant 0 : index
    %89 = vector.load %arg1[%c0_158, %c4_159, %c5_160, %c0_161] : memref<1x9x10x64xbf16, #tpu.memory_space<vmem>>, vector<1x1x4x64xbf16>
    %90 = vector.shape_cast %89 : vector<1x1x4x64xbf16> to vector<4x64xbf16>
    %c0_162 = arith.constant 0 : index
    %c5_163 = arith.constant 5 : index
    %c0_164 = arith.constant 0 : index
    %c0_165 = arith.constant 0 : index
    %91 = vector.load %arg1[%c0_162, %c5_163, %c0_164, %c0_165] : memref<1x9x10x64xbf16, #tpu.memory_space<vmem>>, vector<1x1x4x64xbf16>
    %92 = vector.shape_cast %91 : vector<1x1x4x64xbf16> to vector<4x64xbf16>
    %c0_166 = arith.constant 0 : index
    %c5_167 = arith.constant 5 : index
    %c5_168 = arith.constant 5 : index
    %c0_169 = arith.constant 0 : index
    %93 = vector.load %arg1[%c0_166, %c5_167, %c5_168, %c0_169] : memref<1x9x10x64xbf16, #tpu.memory_space<vmem>>, vector<1x1x4x64xbf16>
    %94 = vector.shape_cast %93 : vector<1x1x4x64xbf16> to vector<4x64xbf16>
    %c0_170 = arith.constant 0 : index
    %c6_171 = arith.constant 6 : index
    %c0_172 = arith.constant 0 : index
    %c0_173 = arith.constant 0 : index
    %95 = vector.load %arg1[%c0_170, %c6_171, %c0_172, %c0_173] : memref<1x9x10x64xbf16, #tpu.memory_space<vmem>>, vector<1x1x4x64xbf16>
    %96 = vector.shape_cast %95 : vector<1x1x4x64xbf16> to vector<4x64xbf16>
    %c0_174 = arith.constant 0 : index
    %c6_175 = arith.constant 6 : index
    %c5_176 = arith.constant 5 : index
    %c0_177 = arith.constant 0 : index
    %97 = vector.load %arg1[%c0_174, %c6_175, %c5_176, %c0_177] : memref<1x9x10x64xbf16, #tpu.memory_space<vmem>>, vector<1x1x4x64xbf16>
    %98 = vector.shape_cast %97 : vector<1x1x4x64xbf16> to vector<4x64xbf16>
    %c0_178 = arith.constant 0 : index
    %c7_179 = arith.constant 7 : index
    %c0_180 = arith.constant 0 : index
    %c0_181 = arith.constant 0 : index
    %99 = vector.load %arg1[%c0_178, %c7_179, %c0_180, %c0_181] : memref<1x9x10x64xbf16, #tpu.memory_space<vmem>>, vector<1x1x4x64xbf16>
    %100 = vector.shape_cast %99 : vector<1x1x4x64xbf16> to vector<4x64xbf16>
    %c0_182 = arith.constant 0 : index
    %c7_183 = arith.constant 7 : index
    %c5_184 = arith.constant 5 : index
    %c0_185 = arith.constant 0 : index
    %101 = vector.load %arg1[%c0_182, %c7_183, %c5_184, %c0_185] : memref<1x9x10x64xbf16, #tpu.memory_space<vmem>>, vector<1x1x4x64xbf16>
    %102 = vector.shape_cast %101 : vector<1x1x4x64xbf16> to vector<4x64xbf16>
    %c0_186 = arith.constant 0 : index
    %c8 = arith.constant 8 : index
    %c0_187 = arith.constant 0 : index
    %c0_188 = arith.constant 0 : index
    %103 = vector.load %arg1[%c0_186, %c8, %c0_187, %c0_188] : memref<1x9x10x64xbf16, #tpu.memory_space<vmem>>, vector<1x1x4x64xbf16>
    %104 = vector.shape_cast %103 : vector<1x1x4x64xbf16> to vector<4x64xbf16>
    %c0_189 = arith.constant 0 : index
    %c8_190 = arith.constant 8 : index
    %c5_191 = arith.constant 5 : index
    %c0_192 = arith.constant 0 : index
    %105 = vector.load %arg1[%c0_189, %c8_190, %c5_191, %c0_192] : memref<1x9x10x64xbf16, #tpu.memory_space<vmem>>, vector<1x1x4x64xbf16>
    %106 = vector.shape_cast %105 : vector<1x1x4x64xbf16> to vector<4x64xbf16>
    %107 = tpu.concatenate %76, %78, %80, %82, %84, %86, %88, %90, %92, %94, %96, %98, %100, %102, %104, %106 in 0 : vector<4x64xbf16>, vector<4x64xbf16>, vector<4x64xbf16>, vector<4x64xbf16>, vector<4x64xbf16>, vector<4x64xbf16>, vector<4x64xbf16>, vector<4x64xbf16>, vector<4x64xbf16>, vector<4x64xbf16>, vector<4x64xbf16>, vector<4x64xbf16>, vector<4x64xbf16>, vector<4x64xbf16>, vector<4x64xbf16>, vector<4x64xbf16> -> vector<64x64xbf16>
    %c1_193 = arith.constant 1 : index
    %c0_194 = arith.constant 0 : index
    %c0_195 = arith.constant 0 : index
    %c0_196 = arith.constant 0 : index
    %108 = vector.load %arg2[%c1_193, %c0_194, %c0_195, %c0_196] : memref<2x2x64x32xbf16, #tpu.memory_space<vmem>>, vector<1x1x64x32xbf16>
    %109 = vector.shape_cast %108 : vector<1x1x64x32xbf16> to vector<64x32xbf16>
    %cst_197 = arith.constant dense<0.000000e+00> : vector<64x32xf32>
    %110 = tpu.matmul %107, %109, %cst_197 {dimension_numbers = #tpu.dot_dimension_numbers<[1], [0], [0], [1], [0, 0, 1, 1], [], []>} : vector<64x64xbf16>, vector<64x32xbf16>, vector<64x32xf32> -> vector<64x32xf32>
    %111 = arith.addf %74, %110 : vector<64x32xf32>
    %c0_198 = arith.constant 0 : index
    %c1_199 = arith.constant 1 : index
    %c5_200 = arith.constant 5 : index
    %c0_201 = arith.constant 0 : index
    %112 = vector.load %arg1[%c0_198, %c1_199, %c5_200, %c0_201] : memref<1x9x10x64xbf16, #tpu.memory_space<vmem>>, vector<1x1x4x64xbf16>
    %113 = vector.shape_cast %112 : vector<1x1x4x64xbf16> to vector<4x64xbf16>
    %c0_202 = arith.constant 0 : index
    %c1_203 = arith.constant 1 : index
    %c1_204 = arith.constant 1 : index
    %c0_205 = arith.constant 0 : index
    %114 = vector.load %arg1[%c0_202, %c1_203, %c1_204, %c0_205] : memref<1x9x10x64xbf16, #tpu.memory_space<vmem>>, vector<1x1x4x64xbf16>
    %115 = vector.shape_cast %114 : vector<1x1x4x64xbf16> to vector<4x64xbf16>
    %c0_206 = arith.constant 0 : index
    %c2_207 = arith.constant 2 : index
    %c5_208 = arith.constant 5 : index
    %c0_209 = arith.constant 0 : index
    %116 = vector.load %arg1[%c0_206, %c2_207, %c5_208, %c0_209] : memref<1x9x10x64xbf16, #tpu.memory_space<vmem>>, vector<1x1x4x64xbf16>
    %117 = vector.shape_cast %116 : vector<1x1x4x64xbf16> to vector<4x64xbf16>
    %c0_210 = arith.constant 0 : index
    %c2_211 = arith.constant 2 : index
    %c1_212 = arith.constant 1 : index
    %c0_213 = arith.constant 0 : index
    %118 = vector.load %arg1[%c0_210, %c2_211, %c1_212, %c0_213] : memref<1x9x10x64xbf16, #tpu.memory_space<vmem>>, vector<1x1x4x64xbf16>
    %119 = vector.shape_cast %118 : vector<1x1x4x64xbf16> to vector<4x64xbf16>
    %c0_214 = arith.constant 0 : index
    %c3_215 = arith.constant 3 : index
    %c5_216 = arith.constant 5 : index
    %c0_217 = arith.constant 0 : index
    %120 = vector.load %arg1[%c0_214, %c3_215, %c5_216, %c0_217] : memref<1x9x10x64xbf16, #tpu.memory_space<vmem>>, vector<1x1x4x64xbf16>
    %121 = vector.shape_cast %120 : vector<1x1x4x64xbf16> to vector<4x64xbf16>
    %c0_218 = arith.constant 0 : index
    %c3_219 = arith.constant 3 : index
    %c1_220 = arith.constant 1 : index
    %c0_221 = arith.constant 0 : index
    %122 = vector.load %arg1[%c0_218, %c3_219, %c1_220, %c0_221] : memref<1x9x10x64xbf16, #tpu.memory_space<vmem>>, vector<1x1x4x64xbf16>
    %123 = vector.shape_cast %122 : vector<1x1x4x64xbf16> to vector<4x64xbf16>
    %c0_222 = arith.constant 0 : index
    %c4_223 = arith.constant 4 : index
    %c5_224 = arith.constant 5 : index
    %c0_225 = arith.constant 0 : index
    %124 = vector.load %arg1[%c0_222, %c4_223, %c5_224, %c0_225] : memref<1x9x10x64xbf16, #tpu.memory_space<vmem>>, vector<1x1x4x64xbf16>
    %125 = vector.shape_cast %124 : vector<1x1x4x64xbf16> to vector<4x64xbf16>
    %c0_226 = arith.constant 0 : index
    %c4_227 = arith.constant 4 : index
    %c1_228 = arith.constant 1 : index
    %c0_229 = arith.constant 0 : index
    %126 = vector.load %arg1[%c0_226, %c4_227, %c1_228, %c0_229] : memref<1x9x10x64xbf16, #tpu.memory_space<vmem>>, vector<1x1x4x64xbf16>
    %127 = vector.shape_cast %126 : vector<1x1x4x64xbf16> to vector<4x64xbf16>
    %c0_230 = arith.constant 0 : index
    %c5_231 = arith.constant 5 : index
    %c5_232 = arith.constant 5 : index
    %c0_233 = arith.constant 0 : index
    %128 = vector.load %arg1[%c0_230, %c5_231, %c5_232, %c0_233] : memref<1x9x10x64xbf16, #tpu.memory_space<vmem>>, vector<1x1x4x64xbf16>
    %129 = vector.shape_cast %128 : vector<1x1x4x64xbf16> to vector<4x64xbf16>
    %c0_234 = arith.constant 0 : index
    %c5_235 = arith.constant 5 : index
    %c1_236 = arith.constant 1 : index
    %c0_237 = arith.constant 0 : index
    %130 = vector.load %arg1[%c0_234, %c5_235, %c1_236, %c0_237] : memref<1x9x10x64xbf16, #tpu.memory_space<vmem>>, vector<1x1x4x64xbf16>
    %131 = vector.shape_cast %130 : vector<1x1x4x64xbf16> to vector<4x64xbf16>
    %c0_238 = arith.constant 0 : index
    %c6_239 = arith.constant 6 : index
    %c5_240 = arith.constant 5 : index
    %c0_241 = arith.constant 0 : index
    %132 = vector.load %arg1[%c0_238, %c6_239, %c5_240, %c0_241] : memref<1x9x10x64xbf16, #tpu.memory_space<vmem>>, vector<1x1x4x64xbf16>
    %133 = vector.shape_cast %132 : vector<1x1x4x64xbf16> to vector<4x64xbf16>
    %c0_242 = arith.constant 0 : index
    %c6_243 = arith.constant 6 : index
    %c1_244 = arith.constant 1 : index
    %c0_245 = arith.constant 0 : index
    %134 = vector.load %arg1[%c0_242, %c6_243, %c1_244, %c0_245] : memref<1x9x10x64xbf16, #tpu.memory_space<vmem>>, vector<1x1x4x64xbf16>
    %135 = vector.shape_cast %134 : vector<1x1x4x64xbf16> to vector<4x64xbf16>
    %c0_246 = arith.constant 0 : index
    %c7_247 = arith.constant 7 : index
    %c5_248 = arith.constant 5 : index
    %c0_249 = arith.constant 0 : index
    %136 = vector.load %arg1[%c0_246, %c7_247, %c5_248, %c0_249] : memref<1x9x10x64xbf16, #tpu.memory_space<vmem>>, vector<1x1x4x64xbf16>
    %137 = vector.shape_cast %136 : vector<1x1x4x64xbf16> to vector<4x64xbf16>
    %c0_250 = arith.constant 0 : index
    %c7_251 = arith.constant 7 : index
    %c1_252 = arith.constant 1 : index
    %c0_253 = arith.constant 0 : index
    %138 = vector.load %arg1[%c0_250, %c7_251, %c1_252, %c0_253] : memref<1x9x10x64xbf16, #tpu.memory_space<vmem>>, vector<1x1x4x64xbf16>
    %139 = vector.shape_cast %138 : vector<1x1x4x64xbf16> to vector<4x64xbf16>
    %c0_254 = arith.constant 0 : index
    %c8_255 = arith.constant 8 : index
    %c5_256 = arith.constant 5 : index
    %c0_257 = arith.constant 0 : index
    %140 = vector.load %arg1[%c0_254, %c8_255, %c5_256, %c0_257] : memref<1x9x10x64xbf16, #tpu.memory_space<vmem>>, vector<1x1x4x64xbf16>
    %141 = vector.shape_cast %140 : vector<1x1x4x64xbf16> to vector<4x64xbf16>
    %c0_258 = arith.constant 0 : index
    %c8_259 = arith.constant 8 : index
    %c1_260 = arith.constant 1 : index
    %c0_261 = arith.constant 0 : index
    %142 = vector.load %arg1[%c0_258, %c8_259, %c1_260, %c0_261] : memref<1x9x10x64xbf16, #tpu.memory_space<vmem>>, vector<1x1x4x64xbf16>
    %143 = vector.shape_cast %142 : vector<1x1x4x64xbf16> to vector<4x64xbf16>
    %144 = tpu.concatenate %113, %115, %117, %119, %121, %123, %125, %127, %129, %131, %133, %135, %137, %139, %141, %143 in 0 : vector<4x64xbf16>, vector<4x64xbf16>, vector<4x64xbf16>, vector<4x64xbf16>, vector<4x64xbf16>, vector<4x64xbf16>, vector<4x64xbf16>, vector<4x64xbf16>, vector<4x64xbf16>, vector<4x64xbf16>, vector<4x64xbf16>, vector<4x64xbf16>, vector<4x64xbf16>, vector<4x64xbf16>, vector<4x64xbf16>, vector<4x64xbf16> -> vector<64x64xbf16>
    %c1_262 = arith.constant 1 : index
    %c1_263 = arith.constant 1 : index
    %c0_264 = arith.constant 0 : index
    %c0_265 = arith.constant 0 : index
    %145 = vector.load %arg2[%c1_262, %c1_263, %c0_264, %c0_265] : memref<2x2x64x32xbf16, #tpu.memory_space<vmem>>, vector<1x1x64x32xbf16>
    %146 = vector.shape_cast %145 : vector<1x1x64x32xbf16> to vector<64x32xbf16>
    %cst_266 = arith.constant dense<0.000000e+00> : vector<64x32xf32>
    %147 = tpu.matmul %144, %146, %cst_266 {dimension_numbers = #tpu.dot_dimension_numbers<[1], [0], [0], [1], [0, 0, 1, 1], [], []>} : vector<64x64xbf16>, vector<64x32xbf16>, vector<64x32xf32> -> vector<64x32xf32>
    %148 = arith.addf %111, %147 : vector<64x32xf32>
    %c0_267 = arith.constant 0 : index
    %c0_268 = arith.constant 0 : index
    %149 = vector.load %arg3[%c0_267, %c0_268] : memref<1x32xf32, #tpu.memory_space<vmem>>, vector<1x32xf32>
    %150 = vector.broadcast %149 : vector<1x32xf32> to vector<64x32xf32>
    %151 = arith.addf %148, %150 : vector<64x32xf32>
    %cst_269 = arith.constant 0.000000e+00 : f32
    %152 = vector.broadcast %cst_269 : f32 to vector<64x32xf32>
    %153 = arith.maximumf %151, %152 : vector<64x32xf32>
    %154 = arith.truncf %153 : vector<64x32xf32> to vector<64x32xbf16>
    %cst_270 = arith.constant 0.000000e+00 : f32
    %155 = vector.broadcast %cst_270 : f32 to vector<9x64xf32>
    %156 = vector.extract_strided_slice %154 {offsets = [0, 0], sizes = [3, 32], strides = [1, 1]} : vector<64x32xbf16> to vector<3x32xbf16>
    %157 = vector.extract_strided_slice %154 {offsets = [16, 0], sizes = [3, 32], strides = [1, 1]} : vector<64x32xbf16> to vector<3x32xbf16>
    %158 = vector.extract_strided_slice %154 {offsets = [32, 0], sizes = [3, 32], strides = [1, 1]} : vector<64x32xbf16> to vector<3x32xbf16>
    %159 = tpu.concatenate %156, %157, %158 in 0 : vector<3x32xbf16>, vector<3x32xbf16>, vector<3x32xbf16> -> vector<9x32xbf16>
    %c0_271 = arith.constant 0 : index
    %c0_272 = arith.constant 0 : index
    %c0_273 = arith.constant 0 : index
    %c0_274 = arith.constant 0 : index
    %160 = vector.load %arg4[%c0_271, %c0_272, %c0_273, %c0_274] : memref<4x4x32x64xbf16, #tpu.memory_space<vmem>>, vector<1x1x32x64xbf16>
    %161 = vector.shape_cast %160 : vector<1x1x32x64xbf16> to vector<32x64xbf16>
    %cst_275 = arith.constant dense<0.000000e+00> : vector<9x64xf32>
    %162 = tpu.matmul %159, %161, %cst_275 {dimension_numbers = #tpu.dot_dimension_numbers<[1], [0], [0], [1], [0, 0, 1, 1], [], []>} : vector<9x32xbf16>, vector<32x64xbf16>, vector<9x64xf32> -> vector<9x64xf32>
    %163 = arith.addf %155, %162 : vector<9x64xf32>
    %164 = vector.extract_strided_slice %154 {offsets = [4, 0], sizes = [3, 32], strides = [1, 1]} : vector<64x32xbf16> to vector<3x32xbf16>
    %165 = vector.extract_strided_slice %154 {offsets = [20, 0], sizes = [3, 32], strides = [1, 1]} : vector<64x32xbf16> to vector<3x32xbf16>
    %166 = vector.extract_strided_slice %154 {offsets = [36, 0], sizes = [3, 32], strides = [1, 1]} : vector<64x32xbf16> to vector<3x32xbf16>
    %167 = tpu.concatenate %164, %165, %166 in 0 : vector<3x32xbf16>, vector<3x32xbf16>, vector<3x32xbf16> -> vector<9x32xbf16>
    %c0_276 = arith.constant 0 : index
    %c1_277 = arith.constant 1 : index
    %c0_278 = arith.constant 0 : index
    %c0_279 = arith.constant 0 : index
    %168 = vector.load %arg4[%c0_276, %c1_277, %c0_278, %c0_279] : memref<4x4x32x64xbf16, #tpu.memory_space<vmem>>, vector<1x1x32x64xbf16>
    %169 = vector.shape_cast %168 : vector<1x1x32x64xbf16> to vector<32x64xbf16>
    %cst_280 = arith.constant dense<0.000000e+00> : vector<9x64xf32>
    %170 = tpu.matmul %167, %169, %cst_280 {dimension_numbers = #tpu.dot_dimension_numbers<[1], [0], [0], [1], [0, 0, 1, 1], [], []>} : vector<9x32xbf16>, vector<32x64xbf16>, vector<9x64xf32> -> vector<9x64xf32>
    %171 = arith.addf %163, %170 : vector<9x64xf32>
    %172 = vector.extract_strided_slice %154 {offsets = [1, 0], sizes = [3, 32], strides = [1, 1]} : vector<64x32xbf16> to vector<3x32xbf16>
    %173 = vector.extract_strided_slice %154 {offsets = [17, 0], sizes = [3, 32], strides = [1, 1]} : vector<64x32xbf16> to vector<3x32xbf16>
    %174 = vector.extract_strided_slice %154 {offsets = [33, 0], sizes = [3, 32], strides = [1, 1]} : vector<64x32xbf16> to vector<3x32xbf16>
    %175 = tpu.concatenate %172, %173, %174 in 0 : vector<3x32xbf16>, vector<3x32xbf16>, vector<3x32xbf16> -> vector<9x32xbf16>
    %c0_281 = arith.constant 0 : index
    %c2_282 = arith.constant 2 : index
    %c0_283 = arith.constant 0 : index
    %c0_284 = arith.constant 0 : index
    %176 = vector.load %arg4[%c0_281, %c2_282, %c0_283, %c0_284] : memref<4x4x32x64xbf16, #tpu.memory_space<vmem>>, vector<1x1x32x64xbf16>
    %177 = vector.shape_cast %176 : vector<1x1x32x64xbf16> to vector<32x64xbf16>
    %cst_285 = arith.constant dense<0.000000e+00> : vector<9x64xf32>
    %178 = tpu.matmul %175, %177, %cst_285 {dimension_numbers = #tpu.dot_dimension_numbers<[1], [0], [0], [1], [0, 0, 1, 1], [], []>} : vector<9x32xbf16>, vector<32x64xbf16>, vector<9x64xf32> -> vector<9x64xf32>
    %179 = arith.addf %171, %178 : vector<9x64xf32>
    %180 = vector.extract_strided_slice %154 {offsets = [5, 0], sizes = [3, 32], strides = [1, 1]} : vector<64x32xbf16> to vector<3x32xbf16>
    %181 = vector.extract_strided_slice %154 {offsets = [21, 0], sizes = [3, 32], strides = [1, 1]} : vector<64x32xbf16> to vector<3x32xbf16>
    %182 = vector.extract_strided_slice %154 {offsets = [37, 0], sizes = [3, 32], strides = [1, 1]} : vector<64x32xbf16> to vector<3x32xbf16>
    %183 = tpu.concatenate %180, %181, %182 in 0 : vector<3x32xbf16>, vector<3x32xbf16>, vector<3x32xbf16> -> vector<9x32xbf16>
    %c0_286 = arith.constant 0 : index
    %c3_287 = arith.constant 3 : index
    %c0_288 = arith.constant 0 : index
    %c0_289 = arith.constant 0 : index
    %184 = vector.load %arg4[%c0_286, %c3_287, %c0_288, %c0_289] : memref<4x4x32x64xbf16, #tpu.memory_space<vmem>>, vector<1x1x32x64xbf16>
    %185 = vector.shape_cast %184 : vector<1x1x32x64xbf16> to vector<32x64xbf16>
    %cst_290 = arith.constant dense<0.000000e+00> : vector<9x64xf32>
    %186 = tpu.matmul %183, %185, %cst_290 {dimension_numbers = #tpu.dot_dimension_numbers<[1], [0], [0], [1], [0, 0, 1, 1], [], []>} : vector<9x32xbf16>, vector<32x64xbf16>, vector<9x64xf32> -> vector<9x64xf32>
    %187 = arith.addf %179, %186 : vector<9x64xf32>
    %188 = vector.extract_strided_slice %154 {offsets = [8, 0], sizes = [3, 32], strides = [1, 1]} : vector<64x32xbf16> to vector<3x32xbf16>
    %189 = vector.extract_strided_slice %154 {offsets = [24, 0], sizes = [3, 32], strides = [1, 1]} : vector<64x32xbf16> to vector<3x32xbf16>
    %190 = vector.extract_strided_slice %154 {offsets = [40, 0], sizes = [3, 32], strides = [1, 1]} : vector<64x32xbf16> to vector<3x32xbf16>
    %191 = tpu.concatenate %188, %189, %190 in 0 : vector<3x32xbf16>, vector<3x32xbf16>, vector<3x32xbf16> -> vector<9x32xbf16>
    %c1_291 = arith.constant 1 : index
    %c0_292 = arith.constant 0 : index
    %c0_293 = arith.constant 0 : index
    %c0_294 = arith.constant 0 : index
    %192 = vector.load %arg4[%c1_291, %c0_292, %c0_293, %c0_294] : memref<4x4x32x64xbf16, #tpu.memory_space<vmem>>, vector<1x1x32x64xbf16>
    %193 = vector.shape_cast %192 : vector<1x1x32x64xbf16> to vector<32x64xbf16>
    %cst_295 = arith.constant dense<0.000000e+00> : vector<9x64xf32>
    %194 = tpu.matmul %191, %193, %cst_295 {dimension_numbers = #tpu.dot_dimension_numbers<[1], [0], [0], [1], [0, 0, 1, 1], [], []>} : vector<9x32xbf16>, vector<32x64xbf16>, vector<9x64xf32> -> vector<9x64xf32>
    %195 = arith.addf %187, %194 : vector<9x64xf32>
    %196 = vector.extract_strided_slice %154 {offsets = [12, 0], sizes = [3, 32], strides = [1, 1]} : vector<64x32xbf16> to vector<3x32xbf16>
    %197 = vector.extract_strided_slice %154 {offsets = [28, 0], sizes = [3, 32], strides = [1, 1]} : vector<64x32xbf16> to vector<3x32xbf16>
    %198 = vector.extract_strided_slice %154 {offsets = [44, 0], sizes = [3, 32], strides = [1, 1]} : vector<64x32xbf16> to vector<3x32xbf16>
    %199 = tpu.concatenate %196, %197, %198 in 0 : vector<3x32xbf16>, vector<3x32xbf16>, vector<3x32xbf16> -> vector<9x32xbf16>
    %c1_296 = arith.constant 1 : index
    %c1_297 = arith.constant 1 : index
    %c0_298 = arith.constant 0 : index
    %c0_299 = arith.constant 0 : index
    %200 = vector.load %arg4[%c1_296, %c1_297, %c0_298, %c0_299] : memref<4x4x32x64xbf16, #tpu.memory_space<vmem>>, vector<1x1x32x64xbf16>
    %201 = vector.shape_cast %200 : vector<1x1x32x64xbf16> to vector<32x64xbf16>
    %cst_300 = arith.constant dense<0.000000e+00> : vector<9x64xf32>
    %202 = tpu.matmul %199, %201, %cst_300 {dimension_numbers = #tpu.dot_dimension_numbers<[1], [0], [0], [1], [0, 0, 1, 1], [], []>} : vector<9x32xbf16>, vector<32x64xbf16>, vector<9x64xf32> -> vector<9x64xf32>
    %203 = arith.addf %195, %202 : vector<9x64xf32>
    %204 = vector.extract_strided_slice %154 {offsets = [9, 0], sizes = [3, 32], strides = [1, 1]} : vector<64x32xbf16> to vector<3x32xbf16>
    %205 = vector.extract_strided_slice %154 {offsets = [25, 0], sizes = [3, 32], strides = [1, 1]} : vector<64x32xbf16> to vector<3x32xbf16>
    %206 = vector.extract_strided_slice %154 {offsets = [41, 0], sizes = [3, 32], strides = [1, 1]} : vector<64x32xbf16> to vector<3x32xbf16>
    %207 = tpu.concatenate %204, %205, %206 in 0 : vector<3x32xbf16>, vector<3x32xbf16>, vector<3x32xbf16> -> vector<9x32xbf16>
    %c1_301 = arith.constant 1 : index
    %c2_302 = arith.constant 2 : index
    %c0_303 = arith.constant 0 : index
    %c0_304 = arith.constant 0 : index
    %208 = vector.load %arg4[%c1_301, %c2_302, %c0_303, %c0_304] : memref<4x4x32x64xbf16, #tpu.memory_space<vmem>>, vector<1x1x32x64xbf16>
    %209 = vector.shape_cast %208 : vector<1x1x32x64xbf16> to vector<32x64xbf16>
    %cst_305 = arith.constant dense<0.000000e+00> : vector<9x64xf32>
    %210 = tpu.matmul %207, %209, %cst_305 {dimension_numbers = #tpu.dot_dimension_numbers<[1], [0], [0], [1], [0, 0, 1, 1], [], []>} : vector<9x32xbf16>, vector<32x64xbf16>, vector<9x64xf32> -> vector<9x64xf32>
    %211 = arith.addf %203, %210 : vector<9x64xf32>
    %212 = vector.extract_strided_slice %154 {offsets = [13, 0], sizes = [3, 32], strides = [1, 1]} : vector<64x32xbf16> to vector<3x32xbf16>
    %213 = vector.extract_strided_slice %154 {offsets = [29, 0], sizes = [3, 32], strides = [1, 1]} : vector<64x32xbf16> to vector<3x32xbf16>
    %214 = vector.extract_strided_slice %154 {offsets = [45, 0], sizes = [3, 32], strides = [1, 1]} : vector<64x32xbf16> to vector<3x32xbf16>
    %215 = tpu.concatenate %212, %213, %214 in 0 : vector<3x32xbf16>, vector<3x32xbf16>, vector<3x32xbf16> -> vector<9x32xbf16>
    %c1_306 = arith.constant 1 : index
    %c3_307 = arith.constant 3 : index
    %c0_308 = arith.constant 0 : index
    %c0_309 = arith.constant 0 : index
    %216 = vector.load %arg4[%c1_306, %c3_307, %c0_308, %c0_309] : memref<4x4x32x64xbf16, #tpu.memory_space<vmem>>, vector<1x1x32x64xbf16>
    %217 = vector.shape_cast %216 : vector<1x1x32x64xbf16> to vector<32x64xbf16>
    %cst_310 = arith.constant dense<0.000000e+00> : vector<9x64xf32>
    %218 = tpu.matmul %215, %217, %cst_310 {dimension_numbers = #tpu.dot_dimension_numbers<[1], [0], [0], [1], [0, 0, 1, 1], [], []>} : vector<9x32xbf16>, vector<32x64xbf16>, vector<9x64xf32> -> vector<9x64xf32>
    %219 = arith.addf %211, %218 : vector<9x64xf32>
    %220 = vector.extract_strided_slice %154 {offsets = [16, 0], sizes = [3, 32], strides = [1, 1]} : vector<64x32xbf16> to vector<3x32xbf16>
    %221 = vector.extract_strided_slice %154 {offsets = [32, 0], sizes = [3, 32], strides = [1, 1]} : vector<64x32xbf16> to vector<3x32xbf16>
    %222 = vector.extract_strided_slice %154 {offsets = [48, 0], sizes = [3, 32], strides = [1, 1]} : vector<64x32xbf16> to vector<3x32xbf16>
    %223 = tpu.concatenate %220, %221, %222 in 0 : vector<3x32xbf16>, vector<3x32xbf16>, vector<3x32xbf16> -> vector<9x32xbf16>
    %c2_311 = arith.constant 2 : index
    %c0_312 = arith.constant 0 : index
    %c0_313 = arith.constant 0 : index
    %c0_314 = arith.constant 0 : index
    %224 = vector.load %arg4[%c2_311, %c0_312, %c0_313, %c0_314] : memref<4x4x32x64xbf16, #tpu.memory_space<vmem>>, vector<1x1x32x64xbf16>
    %225 = vector.shape_cast %224 : vector<1x1x32x64xbf16> to vector<32x64xbf16>
    %cst_315 = arith.constant dense<0.000000e+00> : vector<9x64xf32>
    %226 = tpu.matmul %223, %225, %cst_315 {dimension_numbers = #tpu.dot_dimension_numbers<[1], [0], [0], [1], [0, 0, 1, 1], [], []>} : vector<9x32xbf16>, vector<32x64xbf16>, vector<9x64xf32> -> vector<9x64xf32>
    %227 = arith.addf %219, %226 : vector<9x64xf32>
    %228 = vector.extract_strided_slice %154 {offsets = [20, 0], sizes = [3, 32], strides = [1, 1]} : vector<64x32xbf16> to vector<3x32xbf16>
    %229 = vector.extract_strided_slice %154 {offsets = [36, 0], sizes = [3, 32], strides = [1, 1]} : vector<64x32xbf16> to vector<3x32xbf16>
    %230 = vector.extract_strided_slice %154 {offsets = [52, 0], sizes = [3, 32], strides = [1, 1]} : vector<64x32xbf16> to vector<3x32xbf16>
    %231 = tpu.concatenate %228, %229, %230 in 0 : vector<3x32xbf16>, vector<3x32xbf16>, vector<3x32xbf16> -> vector<9x32xbf16>
    %c2_316 = arith.constant 2 : index
    %c1_317 = arith.constant 1 : index
    %c0_318 = arith.constant 0 : index
    %c0_319 = arith.constant 0 : index
    %232 = vector.load %arg4[%c2_316, %c1_317, %c0_318, %c0_319] : memref<4x4x32x64xbf16, #tpu.memory_space<vmem>>, vector<1x1x32x64xbf16>
    %233 = vector.shape_cast %232 : vector<1x1x32x64xbf16> to vector<32x64xbf16>
    %cst_320 = arith.constant dense<0.000000e+00> : vector<9x64xf32>
    %234 = tpu.matmul %231, %233, %cst_320 {dimension_numbers = #tpu.dot_dimension_numbers<[1], [0], [0], [1], [0, 0, 1, 1], [], []>} : vector<9x32xbf16>, vector<32x64xbf16>, vector<9x64xf32> -> vector<9x64xf32>
    %235 = arith.addf %227, %234 : vector<9x64xf32>
    %236 = vector.extract_strided_slice %154 {offsets = [17, 0], sizes = [3, 32], strides = [1, 1]} : vector<64x32xbf16> to vector<3x32xbf16>
    %237 = vector.extract_strided_slice %154 {offsets = [33, 0], sizes = [3, 32], strides = [1, 1]} : vector<64x32xbf16> to vector<3x32xbf16>
    %238 = vector.extract_strided_slice %154 {offsets = [49, 0], sizes = [3, 32], strides = [1, 1]} : vector<64x32xbf16> to vector<3x32xbf16>
    %239 = tpu.concatenate %236, %237, %238 in 0 : vector<3x32xbf16>, vector<3x32xbf16>, vector<3x32xbf16> -> vector<9x32xbf16>
    %c2_321 = arith.constant 2 : index
    %c2_322 = arith.constant 2 : index
    %c0_323 = arith.constant 0 : index
    %c0_324 = arith.constant 0 : index
    %240 = vector.load %arg4[%c2_321, %c2_322, %c0_323, %c0_324] : memref<4x4x32x64xbf16, #tpu.memory_space<vmem>>, vector<1x1x32x64xbf16>
    %241 = vector.shape_cast %240 : vector<1x1x32x64xbf16> to vector<32x64xbf16>
    %cst_325 = arith.constant dense<0.000000e+00> : vector<9x64xf32>
    %242 = tpu.matmul %239, %241, %cst_325 {dimension_numbers = #tpu.dot_dimension_numbers<[1], [0], [0], [1], [0, 0, 1, 1], [], []>} : vector<9x32xbf16>, vector<32x64xbf16>, vector<9x64xf32> -> vector<9x64xf32>
    %243 = arith.addf %235, %242 : vector<9x64xf32>
    %244 = vector.extract_strided_slice %154 {offsets = [21, 0], sizes = [3, 32], strides = [1, 1]} : vector<64x32xbf16> to vector<3x32xbf16>
    %245 = vector.extract_strided_slice %154 {offsets = [37, 0], sizes = [3, 32], strides = [1, 1]} : vector<64x32xbf16> to vector<3x32xbf16>
    %246 = vector.extract_strided_slice %154 {offsets = [53, 0], sizes = [3, 32], strides = [1, 1]} : vector<64x32xbf16> to vector<3x32xbf16>
    %247 = tpu.concatenate %244, %245, %246 in 0 : vector<3x32xbf16>, vector<3x32xbf16>, vector<3x32xbf16> -> vector<9x32xbf16>
    %c2_326 = arith.constant 2 : index
    %c3_327 = arith.constant 3 : index
    %c0_328 = arith.constant 0 : index
    %c0_329 = arith.constant 0 : index
    %248 = vector.load %arg4[%c2_326, %c3_327, %c0_328, %c0_329] : memref<4x4x32x64xbf16, #tpu.memory_space<vmem>>, vector<1x1x32x64xbf16>
    %249 = vector.shape_cast %248 : vector<1x1x32x64xbf16> to vector<32x64xbf16>
    %cst_330 = arith.constant dense<0.000000e+00> : vector<9x64xf32>
    %250 = tpu.matmul %247, %249, %cst_330 {dimension_numbers = #tpu.dot_dimension_numbers<[1], [0], [0], [1], [0, 0, 1, 1], [], []>} : vector<9x32xbf16>, vector<32x64xbf16>, vector<9x64xf32> -> vector<9x64xf32>
    %251 = arith.addf %243, %250 : vector<9x64xf32>
    %252 = vector.extract_strided_slice %154 {offsets = [24, 0], sizes = [3, 32], strides = [1, 1]} : vector<64x32xbf16> to vector<3x32xbf16>
    %253 = vector.extract_strided_slice %154 {offsets = [40, 0], sizes = [3, 32], strides = [1, 1]} : vector<64x32xbf16> to vector<3x32xbf16>
    %254 = vector.extract_strided_slice %154 {offsets = [56, 0], sizes = [3, 32], strides = [1, 1]} : vector<64x32xbf16> to vector<3x32xbf16>
    %255 = tpu.concatenate %252, %253, %254 in 0 : vector<3x32xbf16>, vector<3x32xbf16>, vector<3x32xbf16> -> vector<9x32xbf16>
    %c3_331 = arith.constant 3 : index
    %c0_332 = arith.constant 0 : index
    %c0_333 = arith.constant 0 : index
    %c0_334 = arith.constant 0 : index
    %256 = vector.load %arg4[%c3_331, %c0_332, %c0_333, %c0_334] : memref<4x4x32x64xbf16, #tpu.memory_space<vmem>>, vector<1x1x32x64xbf16>
    %257 = vector.shape_cast %256 : vector<1x1x32x64xbf16> to vector<32x64xbf16>
    %cst_335 = arith.constant dense<0.000000e+00> : vector<9x64xf32>
    %258 = tpu.matmul %255, %257, %cst_335 {dimension_numbers = #tpu.dot_dimension_numbers<[1], [0], [0], [1], [0, 0, 1, 1], [], []>} : vector<9x32xbf16>, vector<32x64xbf16>, vector<9x64xf32> -> vector<9x64xf32>
    %259 = arith.addf %251, %258 : vector<9x64xf32>
    %260 = vector.extract_strided_slice %154 {offsets = [28, 0], sizes = [3, 32], strides = [1, 1]} : vector<64x32xbf16> to vector<3x32xbf16>
    %261 = vector.extract_strided_slice %154 {offsets = [44, 0], sizes = [3, 32], strides = [1, 1]} : vector<64x32xbf16> to vector<3x32xbf16>
    %262 = vector.extract_strided_slice %154 {offsets = [60, 0], sizes = [3, 32], strides = [1, 1]} : vector<64x32xbf16> to vector<3x32xbf16>
    %263 = tpu.concatenate %260, %261, %262 in 0 : vector<3x32xbf16>, vector<3x32xbf16>, vector<3x32xbf16> -> vector<9x32xbf16>
    %c3_336 = arith.constant 3 : index
    %c1_337 = arith.constant 1 : index
    %c0_338 = arith.constant 0 : index
    %c0_339 = arith.constant 0 : index
    %264 = vector.load %arg4[%c3_336, %c1_337, %c0_338, %c0_339] : memref<4x4x32x64xbf16, #tpu.memory_space<vmem>>, vector<1x1x32x64xbf16>
    %265 = vector.shape_cast %264 : vector<1x1x32x64xbf16> to vector<32x64xbf16>
    %cst_340 = arith.constant dense<0.000000e+00> : vector<9x64xf32>
    %266 = tpu.matmul %263, %265, %cst_340 {dimension_numbers = #tpu.dot_dimension_numbers<[1], [0], [0], [1], [0, 0, 1, 1], [], []>} : vector<9x32xbf16>, vector<32x64xbf16>, vector<9x64xf32> -> vector<9x64xf32>
    %267 = arith.addf %259, %266 : vector<9x64xf32>
    %268 = vector.extract_strided_slice %154 {offsets = [25, 0], sizes = [3, 32], strides = [1, 1]} : vector<64x32xbf16> to vector<3x32xbf16>
    %269 = vector.extract_strided_slice %154 {offsets = [41, 0], sizes = [3, 32], strides = [1, 1]} : vector<64x32xbf16> to vector<3x32xbf16>
    %270 = vector.extract_strided_slice %154 {offsets = [57, 0], sizes = [3, 32], strides = [1, 1]} : vector<64x32xbf16> to vector<3x32xbf16>
    %271 = tpu.concatenate %268, %269, %270 in 0 : vector<3x32xbf16>, vector<3x32xbf16>, vector<3x32xbf16> -> vector<9x32xbf16>
    %c3_341 = arith.constant 3 : index
    %c2_342 = arith.constant 2 : index
    %c0_343 = arith.constant 0 : index
    %c0_344 = arith.constant 0 : index
    %272 = vector.load %arg4[%c3_341, %c2_342, %c0_343, %c0_344] : memref<4x4x32x64xbf16, #tpu.memory_space<vmem>>, vector<1x1x32x64xbf16>
    %273 = vector.shape_cast %272 : vector<1x1x32x64xbf16> to vector<32x64xbf16>
    %cst_345 = arith.constant dense<0.000000e+00> : vector<9x64xf32>
    %274 = tpu.matmul %271, %273, %cst_345 {dimension_numbers = #tpu.dot_dimension_numbers<[1], [0], [0], [1], [0, 0, 1, 1], [], []>} : vector<9x32xbf16>, vector<32x64xbf16>, vector<9x64xf32> -> vector<9x64xf32>
    %275 = arith.addf %267, %274 : vector<9x64xf32>
    %276 = vector.extract_strided_slice %154 {offsets = [29, 0], sizes = [3, 32], strides = [1, 1]} : vector<64x32xbf16> to vector<3x32xbf16>
    %277 = vector.extract_strided_slice %154 {offsets = [45, 0], sizes = [3, 32], strides = [1, 1]} : vector<64x32xbf16> to vector<3x32xbf16>
    %278 = vector.extract_strided_slice %154 {offsets = [61, 0], sizes = [3, 32], strides = [1, 1]} : vector<64x32xbf16> to vector<3x32xbf16>
    %279 = tpu.concatenate %276, %277, %278 in 0 : vector<3x32xbf16>, vector<3x32xbf16>, vector<3x32xbf16> -> vector<9x32xbf16>
    %c3_346 = arith.constant 3 : index
    %c3_347 = arith.constant 3 : index
    %c0_348 = arith.constant 0 : index
    %c0_349 = arith.constant 0 : index
    %280 = vector.load %arg4[%c3_346, %c3_347, %c0_348, %c0_349] : memref<4x4x32x64xbf16, #tpu.memory_space<vmem>>, vector<1x1x32x64xbf16>
    %281 = vector.shape_cast %280 : vector<1x1x32x64xbf16> to vector<32x64xbf16>
    %cst_350 = arith.constant dense<0.000000e+00> : vector<9x64xf32>
    %282 = tpu.matmul %279, %281, %cst_350 {dimension_numbers = #tpu.dot_dimension_numbers<[1], [0], [0], [1], [0, 0, 1, 1], [], []>} : vector<9x32xbf16>, vector<32x64xbf16>, vector<9x64xf32> -> vector<9x64xf32>
    %283 = arith.addf %275, %282 : vector<9x64xf32>
    %c0_351 = arith.constant 0 : index
    %c0_352 = arith.constant 0 : index
    %284 = vector.load %arg5[%c0_351, %c0_352] : memref<1x64xf32, #tpu.memory_space<vmem>>, vector<1x64xf32>
    %285 = vector.broadcast %284 : vector<1x64xf32> to vector<9x64xf32>
    %286 = arith.addf %283, %285 : vector<9x64xf32>
    %cst_353 = arith.constant 0.000000e+00 : f32
    %287 = vector.broadcast %cst_353 : f32 to vector<9x64xf32>
    %288 = arith.maximumf %286, %287 : vector<9x64xf32>
    %289 = arith.truncf %288 : vector<9x64xf32> to vector<9x64xbf16>
    %cst_354 = arith.constant 0.000000e+00 : f32
    %290 = vector.broadcast %cst_354 : f32 to vector<1x64xf32>
    %291 = vector.extract_strided_slice %289 {offsets = [0, 0], sizes = [1, 64], strides = [1, 1]} : vector<9x64xbf16> to vector<1x64xbf16>
    %c0_355 = arith.constant 0 : index
    %c0_356 = arith.constant 0 : index
    %c0_357 = arith.constant 0 : index
    %c0_358 = arith.constant 0 : index
    %292 = vector.load %arg6[%c0_355, %c0_356, %c0_357, %c0_358] : memref<3x3x64x64xbf16, #tpu.memory_space<vmem>>, vector<1x1x64x64xbf16>
    %293 = vector.shape_cast %292 : vector<1x1x64x64xbf16> to vector<64x64xbf16>
    %cst_359 = arith.constant dense<0.000000e+00> : vector<1x64xf32>
    %294 = tpu.matmul %291, %293, %cst_359 {dimension_numbers = #tpu.dot_dimension_numbers<[1], [0], [0], [1], [0, 0, 1, 1], [], []>} : vector<1x64xbf16>, vector<64x64xbf16>, vector<1x64xf32> -> vector<1x64xf32>
    %295 = arith.addf %290, %294 : vector<1x64xf32>
    %296 = vector.extract_strided_slice %289 {offsets = [1, 0], sizes = [1, 64], strides = [1, 1]} : vector<9x64xbf16> to vector<1x64xbf16>
    %c0_360 = arith.constant 0 : index
    %c1_361 = arith.constant 1 : index
    %c0_362 = arith.constant 0 : index
    %c0_363 = arith.constant 0 : index
    %297 = vector.load %arg6[%c0_360, %c1_361, %c0_362, %c0_363] : memref<3x3x64x64xbf16, #tpu.memory_space<vmem>>, vector<1x1x64x64xbf16>
    %298 = vector.shape_cast %297 : vector<1x1x64x64xbf16> to vector<64x64xbf16>
    %cst_364 = arith.constant dense<0.000000e+00> : vector<1x64xf32>
    %299 = tpu.matmul %296, %298, %cst_364 {dimension_numbers = #tpu.dot_dimension_numbers<[1], [0], [0], [1], [0, 0, 1, 1], [], []>} : vector<1x64xbf16>, vector<64x64xbf16>, vector<1x64xf32> -> vector<1x64xf32>
    %300 = arith.addf %295, %299 : vector<1x64xf32>
    %301 = vector.extract_strided_slice %289 {offsets = [2, 0], sizes = [1, 64], strides = [1, 1]} : vector<9x64xbf16> to vector<1x64xbf16>
    %c0_365 = arith.constant 0 : index
    %c2_366 = arith.constant 2 : index
    %c0_367 = arith.constant 0 : index
    %c0_368 = arith.constant 0 : index
    %302 = vector.load %arg6[%c0_365, %c2_366, %c0_367, %c0_368] : memref<3x3x64x64xbf16, #tpu.memory_space<vmem>>, vector<1x1x64x64xbf16>
    %303 = vector.shape_cast %302 : vector<1x1x64x64xbf16> to vector<64x64xbf16>
    %cst_369 = arith.constant dense<0.000000e+00> : vector<1x64xf32>
    %304 = tpu.matmul %301, %303, %cst_369 {dimension_numbers = #tpu.dot_dimension_numbers<[1], [0], [0], [1], [0, 0, 1, 1], [], []>} : vector<1x64xbf16>, vector<64x64xbf16>, vector<1x64xf32> -> vector<1x64xf32>
    %305 = arith.addf %300, %304 : vector<1x64xf32>
    %306 = vector.extract_strided_slice %289 {offsets = [3, 0], sizes = [1, 64], strides = [1, 1]} : vector<9x64xbf16> to vector<1x64xbf16>
    %c1_370 = arith.constant 1 : index
    %c0_371 = arith.constant 0 : index
    %c0_372 = arith.constant 0 : index
    %c0_373 = arith.constant 0 : index
    %307 = vector.load %arg6[%c1_370, %c0_371, %c0_372, %c0_373] : memref<3x3x64x64xbf16, #tpu.memory_space<vmem>>, vector<1x1x64x64xbf16>
    %308 = vector.shape_cast %307 : vector<1x1x64x64xbf16> to vector<64x64xbf16>
    %cst_374 = arith.constant dense<0.000000e+00> : vector<1x64xf32>
    %309 = tpu.matmul %306, %308, %cst_374 {dimension_numbers = #tpu.dot_dimension_numbers<[1], [0], [0], [1], [0, 0, 1, 1], [], []>} : vector<1x64xbf16>, vector<64x64xbf16>, vector<1x64xf32> -> vector<1x64xf32>
    %310 = arith.addf %305, %309 : vector<1x64xf32>
    %311 = vector.extract_strided_slice %289 {offsets = [4, 0], sizes = [1, 64], strides = [1, 1]} : vector<9x64xbf16> to vector<1x64xbf16>
    %c1_375 = arith.constant 1 : index
    %c1_376 = arith.constant 1 : index
    %c0_377 = arith.constant 0 : index
    %c0_378 = arith.constant 0 : index
    %312 = vector.load %arg6[%c1_375, %c1_376, %c0_377, %c0_378] : memref<3x3x64x64xbf16, #tpu.memory_space<vmem>>, vector<1x1x64x64xbf16>
    %313 = vector.shape_cast %312 : vector<1x1x64x64xbf16> to vector<64x64xbf16>
    %cst_379 = arith.constant dense<0.000000e+00> : vector<1x64xf32>
    %314 = tpu.matmul %311, %313, %cst_379 {dimension_numbers = #tpu.dot_dimension_numbers<[1], [0], [0], [1], [0, 0, 1, 1], [], []>} : vector<1x64xbf16>, vector<64x64xbf16>, vector<1x64xf32> -> vector<1x64xf32>
    %315 = arith.addf %310, %314 : vector<1x64xf32>
    %316 = vector.extract_strided_slice %289 {offsets = [5, 0], sizes = [1, 64], strides = [1, 1]} : vector<9x64xbf16> to vector<1x64xbf16>
    %c1_380 = arith.constant 1 : index
    %c2_381 = arith.constant 2 : index
    %c0_382 = arith.constant 0 : index
    %c0_383 = arith.constant 0 : index
    %317 = vector.load %arg6[%c1_380, %c2_381, %c0_382, %c0_383] : memref<3x3x64x64xbf16, #tpu.memory_space<vmem>>, vector<1x1x64x64xbf16>
    %318 = vector.shape_cast %317 : vector<1x1x64x64xbf16> to vector<64x64xbf16>
    %cst_384 = arith.constant dense<0.000000e+00> : vector<1x64xf32>
    %319 = tpu.matmul %316, %318, %cst_384 {dimension_numbers = #tpu.dot_dimension_numbers<[1], [0], [0], [1], [0, 0, 1, 1], [], []>} : vector<1x64xbf16>, vector<64x64xbf16>, vector<1x64xf32> -> vector<1x64xf32>
    %320 = arith.addf %315, %319 : vector<1x64xf32>
    %321 = vector.extract_strided_slice %289 {offsets = [6, 0], sizes = [1, 64], strides = [1, 1]} : vector<9x64xbf16> to vector<1x64xbf16>
    %c2_385 = arith.constant 2 : index
    %c0_386 = arith.constant 0 : index
    %c0_387 = arith.constant 0 : index
    %c0_388 = arith.constant 0 : index
    %322 = vector.load %arg6[%c2_385, %c0_386, %c0_387, %c0_388] : memref<3x3x64x64xbf16, #tpu.memory_space<vmem>>, vector<1x1x64x64xbf16>
    %323 = vector.shape_cast %322 : vector<1x1x64x64xbf16> to vector<64x64xbf16>
    %cst_389 = arith.constant dense<0.000000e+00> : vector<1x64xf32>
    %324 = tpu.matmul %321, %323, %cst_389 {dimension_numbers = #tpu.dot_dimension_numbers<[1], [0], [0], [1], [0, 0, 1, 1], [], []>} : vector<1x64xbf16>, vector<64x64xbf16>, vector<1x64xf32> -> vector<1x64xf32>
    %325 = arith.addf %320, %324 : vector<1x64xf32>
    %326 = vector.extract_strided_slice %289 {offsets = [7, 0], sizes = [1, 64], strides = [1, 1]} : vector<9x64xbf16> to vector<1x64xbf16>
    %c2_390 = arith.constant 2 : index
    %c1_391 = arith.constant 1 : index
    %c0_392 = arith.constant 0 : index
    %c0_393 = arith.constant 0 : index
    %327 = vector.load %arg6[%c2_390, %c1_391, %c0_392, %c0_393] : memref<3x3x64x64xbf16, #tpu.memory_space<vmem>>, vector<1x1x64x64xbf16>
    %328 = vector.shape_cast %327 : vector<1x1x64x64xbf16> to vector<64x64xbf16>
    %cst_394 = arith.constant dense<0.000000e+00> : vector<1x64xf32>
    %329 = tpu.matmul %326, %328, %cst_394 {dimension_numbers = #tpu.dot_dimension_numbers<[1], [0], [0], [1], [0, 0, 1, 1], [], []>} : vector<1x64xbf16>, vector<64x64xbf16>, vector<1x64xf32> -> vector<1x64xf32>
    %330 = arith.addf %325, %329 : vector<1x64xf32>
    %331 = vector.extract_strided_slice %289 {offsets = [8, 0], sizes = [1, 64], strides = [1, 1]} : vector<9x64xbf16> to vector<1x64xbf16>
    %c2_395 = arith.constant 2 : index
    %c2_396 = arith.constant 2 : index
    %c0_397 = arith.constant 0 : index
    %c0_398 = arith.constant 0 : index
    %332 = vector.load %arg6[%c2_395, %c2_396, %c0_397, %c0_398] : memref<3x3x64x64xbf16, #tpu.memory_space<vmem>>, vector<1x1x64x64xbf16>
    %333 = vector.shape_cast %332 : vector<1x1x64x64xbf16> to vector<64x64xbf16>
    %cst_399 = arith.constant dense<0.000000e+00> : vector<1x64xf32>
    %334 = tpu.matmul %331, %333, %cst_399 {dimension_numbers = #tpu.dot_dimension_numbers<[1], [0], [0], [1], [0, 0, 1, 1], [], []>} : vector<1x64xbf16>, vector<64x64xbf16>, vector<1x64xf32> -> vector<1x64xf32>
    %335 = arith.addf %330, %334 : vector<1x64xf32>
    %c0_400 = arith.constant 0 : index
    %c0_401 = arith.constant 0 : index
    %336 = vector.load %arg7[%c0_400, %c0_401] : memref<1x64xf32, #tpu.memory_space<vmem>>, vector<1x64xf32>
    %337 = arith.addf %335, %336 : vector<1x64xf32>
    %cst_402 = arith.constant 0.000000e+00 : f32
    %338 = vector.broadcast %cst_402 : f32 to vector<1x64xf32>
    %339 = arith.maximumf %337, %338 : vector<1x64xf32>
    %340 = arith.truncf %339 : vector<1x64xf32> to vector<1x64xbf16>
    %cst_403 = arith.constant 0.000000e+00 : f32
    %341 = vector.broadcast %cst_403 : f32 to vector<1x1024xf32>
    %c0_404 = arith.constant 0 : index
    %c0_405 = arith.constant 0 : index
    %c0_406 = arith.constant 0 : index
    %342 = vector.load %arg8[%c0_404, %c0_405, %c0_406] : memref<1x64x1024xbf16, #tpu.memory_space<vmem>>, vector<1x64x1024xbf16>
    %343 = vector.shape_cast %342 : vector<1x64x1024xbf16> to vector<64x1024xbf16>
    %cst_407 = arith.constant dense<0.000000e+00> : vector<1x1024xf32>
    %344 = tpu.matmul %340, %343, %cst_407 {dimension_numbers = #tpu.dot_dimension_numbers<[1], [0], [0], [1], [0, 0, 1, 1], [], []>} : vector<1x64xbf16>, vector<64x1024xbf16>, vector<1x1024xf32> -> vector<1x1024xf32>
    %345 = arith.addf %341, %344 : vector<1x1024xf32>
    %c0_408 = arith.constant 0 : index
    %c0_409 = arith.constant 0 : index
    %346 = vector.load %arg9[%c0_408, %c0_409] : memref<1x1024xf32, #tpu.memory_space<vmem>>, vector<1x1024xf32>
    %347 = arith.addf %345, %346 : vector<1x1024xf32>
    %cst_410 = arith.constant 0.000000e+00 : f32
    %348 = vector.broadcast %cst_410 : f32 to vector<1x1024xf32>
    %349 = arith.maximumf %347, %348 : vector<1x1024xf32>
    %350 = arith.truncf %349 : vector<1x1024xf32> to vector<1x1024xbf16>
    %c0_411 = arith.constant 0 : index
    %c0_412 = arith.constant 0 : index
    %351 = vector.load %arg10[%c0_411, %c0_412] : memref<1024x128xbf16, #tpu.memory_space<vmem>>, vector<1024x128xbf16>
    %cst_413 = arith.constant dense<0.000000e+00> : vector<1x128xf32>
    %352 = tpu.matmul %350, %351, %cst_413 {dimension_numbers = #tpu.dot_dimension_numbers<[1], [0], [0], [1], [0, 0, 1, 1], [], []>} : vector<1x1024xbf16>, vector<1024x128xbf16>, vector<1x128xf32> -> vector<1x128xf32>
    %c0_414 = arith.constant 0 : index
    %c0_415 = arith.constant 0 : index
    %353 = vector.load %arg11[%c0_414, %c0_415] : memref<1x128xf32, #tpu.memory_space<vmem>>, vector<1x128xf32>
    %354 = arith.addf %352, %353 : vector<1x128xf32>
    %c0_416 = arith.constant 0 : index
    %c0_417 = arith.constant 0 : index
    %c0_418 = arith.constant 0 : index
    %355 = vector.load %arg12[%c0_416, %c0_417, %c0_418] : memref<1x1x128xf32, #tpu.memory_space<vmem>>, vector<1x1x128xf32>
    %356 = vector.shape_cast %355 : vector<1x1x128xf32> to vector<1x128xf32>
    %357 = vector.shape_cast %354 : vector<1x128xf32> to vector<1x1x128xf32>
    tpu.vector_store %arg12[%c0_416, %c0_417, %c0_418], %357 {strides = array<i32>} : memref<1x1x128xf32, #tpu.memory_space<vmem>>, vector<1x1x128xf32>,
    return
  }
  func.func @transform_0(%arg0: i32) -> (i32, i32, i32, i32) {
    %c0_i32 = arith.constant 0 : i32
    %c0_i32_0 = arith.constant 0 : i32
    %c0_i32_1 = arith.constant 0 : i32
    %c0_i32_2 = arith.constant 0 : i32
    return %arg0, %c0_i32, %c0_i32_0, %c0_i32_1 : i32, i32, i32, i32
  }
  func.func @transform_1(%arg0: i32) -> (i32, i32, i32, i32) {
    %c0_i32 = arith.constant 0 : i32
    %c0_i32_0 = arith.constant 0 : i32
    %c0_i32_1 = arith.constant 0 : i32
    %c0_i32_2 = arith.constant 0 : i32
    %c0_i32_3 = arith.constant 0 : i32
    return %c0_i32, %c0_i32_0, %c0_i32_1, %c0_i32_2 : i32, i32, i32, i32
  }
  func.func @transform_2(%arg0: i32) -> (i32, i32) {
    %c0_i32 = arith.constant 0 : i32
    %c0_i32_0 = arith.constant 0 : i32
    %c0_i32_1 = arith.constant 0 : i32
    return %c0_i32, %c0_i32_0 : i32, i32
  }
  func.func @transform_3(%arg0: i32) -> (i32, i32, i32, i32) {
    %c0_i32 = arith.constant 0 : i32
    %c0_i32_0 = arith.constant 0 : i32
    %c0_i32_1 = arith.constant 0 : i32
    %c0_i32_2 = arith.constant 0 : i32
    %c0_i32_3 = arith.constant 0 : i32
    return %c0_i32, %c0_i32_0, %c0_i32_1, %c0_i32_2 : i32, i32, i32, i32
  }
  func.func @transform_4(%arg0: i32) -> (i32, i32) {
    %c0_i32 = arith.constant 0 : i32
    %c0_i32_0 = arith.constant 0 : i32
    %c0_i32_1 = arith.constant 0 : i32
    return %c0_i32, %c0_i32_0 : i32, i32
  }
  func.func @transform_5(%arg0: i32) -> (i32, i32, i32, i32) {
    %c0_i32 = arith.constant 0 : i32
    %c0_i32_0 = arith.constant 0 : i32
    %c0_i32_1 = arith.constant 0 : i32
    %c0_i32_2 = arith.constant 0 : i32
    %c0_i32_3 = arith.constant 0 : i32
    return %c0_i32, %c0_i32_0, %c0_i32_1, %c0_i32_2 : i32, i32, i32, i32
  }
  func.func @transform_6(%arg0: i32) -> (i32, i32) {
    %c0_i32 = arith.constant 0 : i32
    %c0_i32_0 = arith.constant 0 : i32
    %c0_i32_1 = arith.constant 0 : i32
    return %c0_i32, %c0_i32_0 : i32, i32
  }
  func.func @transform_7(%arg0: i32) -> (i32, i32, i32) {
    %c0_i32 = arith.constant 0 : i32
    %c0_i32_0 = arith.constant 0 : i32
    %c0_i32_1 = arith.constant 0 : i32
    %c0_i32_2 = arith.constant 0 : i32
    return %c0_i32, %c0_i32_0, %c0_i32_1 : i32, i32, i32
  }
  func.func @transform_8(%arg0: i32) -> (i32, i32) {
    %c0_i32 = arith.constant 0 : i32
    %c0_i32_0 = arith.constant 0 : i32
    %c0_i32_1 = arith.constant 0 : i32
    return %c0_i32, %c0_i32_0 : i32, i32
  }
  func.func @transform_9(%arg0: i32) -> (i32, i32) {
    %c0_i32 = arith.constant 0 : i32
    %c0_i32_0 = arith.constant 0 : i32
    %c0_i32_1 = arith.constant 0 : i32
    return %c0_i32, %c0_i32_0 : i32, i32
  }
  func.func @transform_10(%arg0: i32) -> (i32, i32) {
    %c0_i32 = arith.constant 0 : i32
    %c0_i32_0 = arith.constant 0 : i32
    %c0_i32_1 = arith.constant 0 : i32
    return %c0_i32, %c0_i32_0 : i32, i32
  }
  func.func @transform_11(%arg0: i32) -> (i32, i32, i32) {
    %c0_i32 = arith.constant 0 : i32
    %c0_i32_0 = arith.constant 0 : i32
    %c0_i32_1 = arith.constant 0 : i32
    return %arg0, %c0_i32, %c0_i32_0 : i32, i32, i32
  }
}

</mosaic_0001>

<bundles_post_ra>
// kernel: atari_a2c_forward.1
= control target key start
LH: loop header
LB: loop body
LE: loop exit
PB: predicated region body
PF: predicated region fallthrough
CT: control target
= control target key end

     0   :  { %s4709_s17 = smov 0   ;;  %s5797_s0 = inlined_call_operand.vmem [shape: bf16[2,9,10,64], index: 0, kind: input, shape index: {}]   ;;  %s5798_s1 = inlined_call_operand.vmem [shape: bf16[2,2,64,32], index: 1, kind: input, shape index: {}]   ;;  %s5799_s2 = inlined_call_operand.vmem [shape: f32[1,32], index: 2, kind: input, shape index: {}]   ;;  %s5800_s3 = inlined_call_operand.vmem [shape: bf16[4,4,32,64], index: 3, kind: input, shape index: {}]   ;;  %s5801_s4 = inlined_call_operand.vmem [shape: f32[1,64], index: 4, kind: input, shape index: {}]   ;;  %s5802_s5 = inlined_call_operand.vmem [shape: bf16[3,3,64,64], index: 5, kind: input, shape index: {}]   ;;  %s5803_s6 = inlined_call_operand.vmem [shape: f32[1,64], index: 6, kind: input, shape index: {}]   ;;  %s5804_s7 = inlined_call_operand.vmem [shape: bf16[1,64,1024], index: 7, kind: input, shape index: {}]   ;;  %s5805_s8 = inlined_call_operand.vmem [shape: f32[1,1024], index: 8, kind: input, shape index: {}]   ;;  %s5806_s9 = inlined_call_operand.vmem [shape: bf16[1024,128], index: 9, kind: input, shape index: {}]   ;;  %s5807_s10 = inlined_call_operand.vmem [shape: f32[1,128], index: 10, kind: input, shape index: {}]   ;;  %s5808_s11 = inlined_call_operand.vmem [shape: f32[2,1,128], index: 11, kind: output, shape index: {}]  }
   0x1 LB: > { %s3448_s18 = sadd.s32 4294967295, %s4647_s17   ;;  %p3452_p0 = scmp.ge.s32.totalorder %s4647_s17, 1  ;;  %s4647_s17 = sphi %s4709_s17, %s21_s17  }
   0x2   : > { %p337_p1 = scmp.lt.s32.totalorder %s4647_s17, 3 }
   0x4   : > { %p338_p2 = pnand %p3452_p0, %p337_p1 }
   0x5   : > { %p375_p3 = scmp.lt.s32.totalorder (!%p338_p2), %s3448_s18, 1 }
   0x6   : > { %341 = sbr.rel (%p338_p2) target bundleno = 879 (0x36f), region = 64 }
   0xb   : > { %v4452_v0 = vld [vmem:[%s5798_s1 + $0x18] sm:$0xff]  ;;  %v4451_v4 = vld [vmem:[%s5798_s1 + $0x10] sm:$0xff]  ;;  %s5812_s18 = smov (!%p375_p3, %s3448_s18), 1  ;;  %v4450_v8 = vld [vmem:[%s5798_s1 + $0x8] sm:$0xff]  ;;  %vm527_vm0 = vcmask 1041408   ;;  %vm531_vm1 = vcmask 1043456  }
   0xc   : > { %v4461_v1 = vld [vmem:[%s5798_s1 + $0x58] sm:$0xff]  ;;  %821 = vmatpush.bf16.msra.mxu1 %v4452_v0  ;;  %v4460_v5 = vld [vmem:[%s5798_s1 + $0x50] sm:$0xff]  ;;  %s4630_s16 = smul.u32 72, %s5812_s18  ;;  %v4459_v9 = vld [vmem:[%s5798_s1 + $0x48] sm:$0xff]  ;;  %vm534_vm2 = vcmask 1045504   ;;  %vm747_vm3 = vcmask 523264   ;;  %s382_s15 = scalar_lea.vmem %s5808_s11, %s5812_s18 }
   0xd   : > { %v4456_v2 = vld [vmem:[%s5798_s1 + $0x38] sm:$0xff]  ;;  %965 = vmatpush.bf16.msra.mxu2 %v4461_v1  ;;  %v4455_v6 = vld [vmem:[%s5798_s1 + $0x30] sm:$0xff]  ;;  %v4454_v10 = vld [vmem:[%s5798_s1 + $0x28] sm:$0xff]  ;;  %vm1206_vm4 = vsmask.f32 1280  ;;  %vm1209_vm5 = vcmask 1042432  }
   0xe   : > { %v4465_v3 = vld [vmem:[%s5798_s1 + $0x78] sm:$0xff]  ;;  %760 = vmatpush.bf16.msra.mxu0 %v4456_v2  ;;  %v4464_v7 = vld [vmem:[%s5798_s1 + $0x70] sm:$0xff]  ;;  %s4756_s27 = scalar_lea.vmem %s5797_s0, %s4630_s16  ;;  %v4463_v11 = vld [vmem:[%s5798_s1 + $0x68] sm:$0xff]  ;;  %vm1247_vm6 = vcmask 261120  }
   0xf   : > { %1128 = vmatpush.bf16.msra.mxu3 %v4465_v3  ;;  %v3477_v12 = vld [vmem:[%s4756_s27] sm:$0xc]  ;;  %v4441_v13 = vld [vmem:[%s4756_s27] sm:$0x10]  ;;  %v3454_v14 = vld [vmem:[%s4756_s27 + $0x8] sm:$0x3] }
  0x10   : > { %822 = vmatpush.bf16.msra.mxu1 %v4451_v4  ;;  %v3481_v15 = vld [vmem:[%s4756_s27 + $0x8] sm:$0xc]  ;;  %v4442_v16 = vld [vmem:[%s4756_s27 + $0x8] sm:$0x10]  ;;  %v3478_v17 = vor.u32 %v4441_v13, %v3477_v12  ;;  %v428_v18 = vunpack.c.l.b16 %v3454_v14  ;;  %v4767_v20 = vld [vmem:[%s4756_s27 + $0x10] sm:$0x3] }
  0x11   : > { %966 = vmatpush.bf16.msra.mxu2 %v4460_v5  ;;  %v3482_v19 = vor.u32 %v4442_v16, %v3481_v15  ;;  %v3485_v21 = vld [vmem:[%s4756_s27 + $0x10] sm:$0xc]  ;;  %v4443_v22 = vld [vmem:[%s4756_s27 + $0x10] sm:$0x10]  ;;  %v4449_v23 = vld [vmem:[%s5798_s1] sm:$0xff]  ;;  %v853_v28 = vunpack.c.l.b16 %v4767_v20 }
  0x12   : > { %761 = vmatpush.bf16.msra.mxu0 %v4455_v6  ;;  %v4458_v24 = vld [vmem:[%s5798_s1 + $0x40] sm:$0xff]  ;;  %v421_v25 = vshrl.u32 %v3478_v17, 16  ;;  %v423_v26 = vshll.u32 %v3478_v17, 16  ;;  %v3486_v27 = vor.u32 %v4443_v22, %v3485_v21  ;;  %v429_v32 = vpack.c.b16 %v428_v18, %v428_v18  ;;  %v3507_v51 = vld [vmem:[%s4756_s27 + $0x8] sm:$0x7]  ;;  %vm5046_vm7 = vmand %vm527_vm0, %vm1206_vm4 }
  0x13   : > { %1129 = vmatpush.bf16.msra.mxu3 %v4464_v7  ;;  %v566_v29 = vld [vmem:[%s4756_s27] sm:$0x7]  ;;  %v436_v33 = vshrl.u32 %v3482_v19, 16  ;;  %v439_v34 = vshll.u32 %v3482_v19, 16  ;;  %v854_v39 = vpack.c.b16 %v853_v28, %v853_v28  ;;  %v3508_v58 = vld [vmem:[%s4756_s27 + $0x10] sm:$0x7]  ;;  %v592_v2 = vunpack.c.l.b16 %v3507_v51 }
  0x14   : > { %823 = vmatpush.bf16.msra.mxu1 %v4450_v8  ;;  %v4453_v30 = vld [vmem:[%s5798_s1 + $0x20] sm:$0xff]  ;;  %v578_v35 = vunpack.c.l.b16 %v566_v29  ;;  %v425_v36 = vrot.slane %v423_v26, 1  ;;  %v4785_v37 = vshrl.u32 %v3486_v27, 16  ;;  %v4787_v38 = vshll.u32 %v3486_v27, 16  ;;  %v4802_v7 = vld [vmem:[%s4756_s27 + $0x18] sm:$0x3] }
  0x15   : > { %967 = vmatpush.bf16.msra.mxu2 %v4459_v9  ;;  %v4462_v31 = vld [vmem:[%s5798_s1 + $0x60] sm:$0xff]  ;;  %v438_v41 = vrot.slane %v436_v33, 4  ;;  %v441_v42 = vrot.slane %v439_v34, 5  ;;  %v850_v43 = vrot.slane %v439_v34, 1  ;;  %v574_v44 = vrot.slane %v421_v25, 2 }
  0x16   : > { %762 = vmatpush.bf16.msra.mxu0 %v4454_v10  ;;  %v384_v40 = vld [vmem:[%s4756_s27] sm:$0x3]  ;;  %v426_v45 = vor.u32 %v425_v36, %v421_v25  ;;  %v855_v46 = vrot.slane %v4785_v37, 4  ;;  %v856_v47 = vrot.slane %v4787_v38, 5  ;;  %v575_v48 = vrot.slane %v423_v26, 3 }
  0x17   : > { %1130 = vmatpush.bf16.msra.mxu3 %v4463_v11  ;;  %v442_v49 = vor.u32 %v441_v42, %v438_v41  ;;  %v851_v50 = vor.u32 %v850_v43, %v436_v33  ;;  %v579_v52 = vpack.c.b16 %v578_v35, %v578_v35  ;;  %v588_v53 = vrot.slane %v436_v33, 6  ;;  %v3489_v19 = vld [vmem:[%s4756_s27 + $0x18] sm:$0xc]  ;;  %v4444_v21 = vld [vmem:[%s4756_s27 + $0x18] sm:$0x10] }
  0x18   : > { %824 = vmatpush.bf16.msra.mxu1 %v4449_v23  ;;  %v530_v54 = vsel %vm527_vm0, %v384_v40, %v426_v45  ;;  %v857_v55 = vor.u32 %v856_v47, %v855_v46  ;;  %v576_v56 = vor.u32 %v575_v48, %v574_v44  ;;  %v589_v57 = vrot.slane %v439_v34, 7  ;;  %v4813_v27 = vld [vmem:[%s4756_s27 + $0x20] sm:$0x3]  ;;  %v3493_v28 = vld [vmem:[%s4756_s27 + $0x20] sm:$0xc] }
  0x19   : > { %968 = vmatpush.bf16.msra.mxu2 %v4458_v24  ;;  %v533_v59 = vsel %vm531_vm1, %v530_v54, %v429_v32  ;;  %v894_v60 = vsel %vm527_vm0, %v3454_v14, %v851_v50  ;;  %v581_v61 = vshrl.u32 %v579_v52, 16  ;;  %v584_v62 = vshll.u32 %v579_v52, 16 }
  0x1a   : > { %763 = vmatpush.bf16.msra.mxu0 %v4453_v30  ;;  %v536_v63 = vsel %vm534_vm2, %v533_v59, %v442_v49  ;;  %v896_v0 = vsel %vm531_vm1, %v894_v60, %v854_v39  ;;  %v590_v1 = vor.u32 %v589_v57, %v588_v53  ;;  %v606_v6 = vunpack.c.l.b16 %v3508_v58  ;;  %v3509_v60 = vld [vmem:[%s4756_s27 + $0x18] sm:$0x7] }
  0x1b   : > { %1131 = vmatpush.bf16.msra.mxu3 %v4462_v31  ;;  %3558 = vmatmul.msk.bf16.vlgmr.msra.gmra.mxu1 %vm747_vm3, %v536_v63  ;;  %v898_v3 = vsel %vm534_vm2, %v896_v0, %v857_v55  ;;  %v583_v4 = vrot.slane %v581_v61, 6  ;;  %v586_v5 = vrot.slane %v584_v62, 7  ;;  %v593_v8 = vpack.c.b16 %v592_v2, %v592_v2  ;;  %v3510_v63 = vld [vmem:[%s4756_s27 + $0x20] sm:$0x7] }
  0x1c   : > { %3593 = vmatmul.msk.bf16.vlgmr.msra.gmra.mxu2 %vm747_vm3, %v898_v3  ;;  %v999_v9 = vrot.slane %v436_v33, 2  ;;  %v1000_v10 = vrot.slane %v439_v34, 3  ;;  %v1005_v11 = vrot.slane %v4785_v37, 6  ;;  %v607_v13 = vpack.c.b16 %v606_v6, %v606_v6  ;;  %v4445_v33 = vld [vmem:[%s4756_s27 + $0x20] sm:$0x10] }
  0x1d   : > { %v587_v12 = vor.u32 %v586_v5, %v583_v4  ;;  %v1006_v14 = vrot.slane %v4787_v38, 7  ;;  %v453_v15 = vrot.slane %v4787_v38, 1  ;;  %v595_v16 = vshrl.u32 %v593_v8, 16 }
  0x1e   : > { %v598_v17 = vshll.u32 %v593_v8, 16  ;;  %v1001_v18 = vor.u32 %v1000_v10, %v999_v9  ;;  %v456_v22 = vunpack.c.l.b16 %v4802_v7  ;;  %v609_v24 = vshrl.u32 %v607_v13, 16 }
  0x1f   : > { %v688_v23 = vsel %vm527_vm0, %v576_v56, %v587_v12  ;;  %v612_v25 = vshll.u32 %v607_v13, 16  ;;  %v1007_v26 = vor.u32 %v1006_v14, %v1005_v11  ;;  %v597_v29 = vrot.slane %v595_v16, 2 }
  0x20   : > { %v600_v30 = vrot.slane %v598_v17, 3  ;;  %v690_v31 = vsel %vm531_vm1, %v688_v23, %v590_v1  ;;  %v1002_v32 = vrot.slane %v595_v16, 6  ;;  %v1003_v34 = vrot.slane %v598_v17, 7 }
  0x21   : > { %v611_v35 = vrot.slane %v609_v24, 6  ;;  %v614_v36 = vrot.slane %v612_v25, 7  ;;  %v1008_v39 = vrot.slane %v609_v24, 2  ;;  %v1009_v41 = vrot.slane %v612_v25, 3 }
  0x22   : > { %v601_v40 = vor.u32 %v600_v30, %v597_v29  ;;  %v454_v42 = vor.u32 %v453_v15, %v4785_v37  ;;  %v457_v43 = vpack.c.b16 %v456_v22, %v456_v22  ;;  %v1004_v44 = vor.u32 %v1003_v34, %v1002_v32  ;;  %v3497_v30 = vld [vmem:[%s4756_s27 + $0x28] sm:$0xc] }
  0x23   : > { %v3490_v45 = vor.u32 %v4444_v21, %v3489_v19  ;;  %v3494_v46 = vor.u32 %v4445_v33, %v3493_v28  ;;  %v861_v47 = vunpack.c.l.b16 %v4813_v27  ;;  %v1010_v49 = vor.u32 %v1009_v41, %v1008_v39  ;;  %v4846_v21 = vld [vmem:[%s4756_s27 + $0x28] sm:$0x3]  ;;  %v3501_v39 = vld [vmem:[%s4756_s27 + $0x30] sm:$0xc] }
  0x24   : > { %v692_v48 = vsel %vm534_vm2, %v690_v31, %v601_v40  ;;  %v539_v50 = vsel %vm527_vm0, %v4767_v20, %v454_v42  ;;  %v602_v51 = vrot.slane %v4785_v37, 2  ;;  %v1057_v52 = vsel %vm527_vm0, %v1001_v18, %v1004_v44  ;;  %v4446_v31 = vld [vmem:[%s4756_s27 + $0x28] sm:$0x10]  ;;  %v4447_v44 = vld [vmem:[%s4756_s27 + $0x30] sm:$0x10] }
  0x25   : > { %3538 = vmatmul.msk.bf16.vlgmr.msra.gmra.mxu0 %vm747_vm3, %v692_v48  ;;  %v464_v53 = vshrl.u32 %v3490_v45, 16  ;;  %v467_v54 = vshll.u32 %v3490_v45, 16  ;;  %v541_v55 = vsel %vm531_vm1, %v539_v50, %v457_v43  ;;  %v1059_v56 = vsel %vm531_vm1, %v1057_v52, %v1007_v26 }
  0x26   : > { %v4828_v57 = vshrl.u32 %v3494_v46, 16  ;;  %v4830_v58 = vshll.u32 %v3494_v46, 16  ;;  %v862_v59 = vpack.c.b16 %v861_v47, %v861_v47  ;;  %v1061_v20 = vsel %vm534_vm2, %v1059_v56, %v1010_v49 }
  0x27   : > { %v466_v61 = vrot.slane %v464_v53, 4  ;;  %v469_v37 = vrot.slane %v467_v54, 5  ;;  %v858_v62 = vrot.slane %v467_v54, 1  ;;  %3622 = vmatmul.msk.bf16.vlgmr.msra.gmra.mxu3 %vm747_vm3, %v1061_v20  ;;  %v603_v2 = vrot.slane %v4787_v38, 3 }
  0x28   : > { %v863_v0 = vrot.slane %v4828_v57, 4  ;;  %v864_v1 = vrot.slane %v4830_v58, 5  ;;  %v615_v3 = vor.u32 %v614_v36, %v611_v35  ;;  %v616_v6 = vrot.slane %v464_v53, 6  ;;  %v4858_v36 = vld [vmem:[%s4756_s27 + $0x30] sm:$0x3] }
  0x29   : > { %v470_v4 = vor.u32 %v469_v37, %v466_v61  ;;  %v859_v5 = vor.u32 %v858_v62, %v464_v53  ;;  %v617_v8 = vrot.slane %v467_v54, 7  ;;  %v604_v10 = vor.u32 %v603_v2, %v602_v51 }
  0x2a   : > { %v865_v9 = vor.u32 %v864_v1, %v863_v0  ;;  %v620_v11 = vunpack.c.l.b16 %v3509_v60  ;;  %v634_v12 = vunpack.c.l.b16 %v3510_v63  ;;  %v1011_v16 = vrot.slane %v464_v53, 2 }
  0x2b   : > { %v543_v13 = vsel %vm534_vm2, %v541_v55, %v470_v4  ;;  %v901_v14 = vsel %vm527_vm0, %v4802_v7, %v859_v5  ;;  %v618_v15 = vor.u32 %v617_v8, %v616_v6  ;;  %v695_v18 = vsel %vm527_vm0, %v604_v10, %v615_v3  ;;  %v3511_v5 = vld [vmem:[%s4756_s27 + $0x28] sm:$0x7]  ;;  %v3512_v10 = vld [vmem:[%s4756_s27 + $0x30] sm:$0x7] }
  0x2c   : > { %3559 = vmatmul.msk.bf16.gmra.mxu1 %vm747_vm3, %v543_v13  ;;  %v903_v38 = vsel %vm531_vm1, %v901_v14, %v862_v59  ;;  %v621_v17 = vpack.c.b16 %v620_v11, %v620_v11  ;;  %v635_v19 = vpack.c.b16 %v634_v12, %v634_v12  ;;  %v1012_v23 = vrot.slane %v467_v54, 3 }
  0x2d   : > { %v905_v22 = vsel %vm534_vm2, %v903_v38, %v865_v9  ;;  %v697_v7 = vsel %vm531_vm1, %v695_v18, %v618_v15  ;;  %v1017_v24 = vrot.slane %v4828_v57, 6  ;;  %v1018_v33 = vrot.slane %v4830_v58, 7  ;;  %v4471_v15 = vld [vmem:[%s5800_s3 + $0x28] sm:$0xff] }
  0x2e   : > { %3594 = vmatmul.msk.bf16.gmra.mxu2 %vm747_vm3, %v905_v22  ;;  %v623_v25 = vshrl.u32 %v621_v17, 16  ;;  %v626_v26 = vshll.u32 %v621_v17, 16  ;;  %v637_v28 = vshrl.u32 %v635_v19, 16  ;;  %v640_v29 = vshll.u32 %v635_v19, 16 }
  0x2f   : > { %v1013_v32 = vor.u32 %v1012_v23, %v1011_v16  ;;  %v481_v34 = vrot.slane %v4830_v58, 1  ;;  %v484_v35 = vunpack.c.l.b16 %v4846_v21  ;;  %v1019_v47 = vor.u32 %v1018_v33, %v1017_v24  ;;  %v4473_v16 = vld [vmem:[%s5800_s3 + $0x38] sm:$0xff]  ;;  %1339 = vmatpush.bf16.msrb.mxu2 %v4471_v15 }
  0x30   : > { %v625_v40 = vrot.slane %v623_v25, 2  ;;  %v628_v41 = vrot.slane %v626_v26, 3  ;;  %v1014_v42 = vrot.slane %v623_v25, 6  ;;  %v1015_v43 = vrot.slane %v626_v26, 7  ;;  %1386 = vmatpush.bf16.msrb.mxu3 %v4473_v16  ;;  %v4448_v33 = vld [vmem:[%s4756_s27 + $0x38] sm:$0x10] }
  0x31   : > { %v4862_v45 = vrot.slane %v637_v28, 6  ;;  %v4864_v46 = vrot.slane %v640_v29, 7  ;;  %v1020_v48 = vrot.slane %v637_v28, 2  ;;  %v1021_v51 = vrot.slane %v640_v29, 3 }
  0x32   : > { %v629_v49 = vor.u32 %v628_v41, %v625_v40  ;;  %v1016_v50 = vor.u32 %v1015_v43, %v1014_v42  ;;  %v482_v52 = vor.u32 %v481_v34, %v4828_v57  ;;  %v485_v53 = vpack.c.b16 %v484_v35, %v484_v35  ;;  %v3562_v34 = vld [vmem:[%s4756_s27 + $0x40] sm:$0x3] }
  0x33   : > { %v3498_v54 = vor.u32 %v4446_v31, %v3497_v30  ;;  %v3502_v55 = vor.u32 %v4447_v44, %v3501_v39  ;;  %v869_v56 = vunpack.c.l.b16 %v4858_v36  ;;  %v1022_v60 = vor.u32 %v1021_v51, %v1020_v48  ;;  %v3567_v48 = vld [vmem:[%s4756_s27 + $0x40] sm:$0xc] }
  0x34   : > { %v699_v59 = vsel %vm534_vm2, %v697_v7, %v629_v49  ;;  %v1064_v20 = vsel %vm527_vm0, %v1013_v32, %v1016_v50  ;;  %v546_v61 = vsel %vm527_vm0, %v4813_v27, %v482_v52  ;;  %v630_v27 = vrot.slane %v4828_v57, 2  ;;  %v4469_v57 = vld [vmem:[%s5800_s3 + $0x18] sm:$0xff]  ;;  %v4457_v49 = vld [vmem:[%s4756_s27 + $0x40] sm:$0x10] }
  0x35   : > { %3539 = vmatmul.msk.bf16.gmra.mxu0 %vm747_vm3, %v699_v59  ;;  %v1066_v37 = vsel %vm531_vm1, %v1064_v20, %v1019_v47  ;;  %v492_v62 = vshrl.u32 %v3498_v54, 16  ;;  %v495_v63 = vshll.u32 %v3498_v54, 16  ;;  %v548_v0 = vsel %vm531_vm1, %v546_v61, %v485_v53  ;;  %v3505_v32 = vld [vmem:[%s4756_s27 + $0x38] sm:$0xc] }
  0x36   : > { %v1068_v1 = vsel %vm534_vm2, %v1066_v37, %v1022_v60  ;;  %v4876_v2 = vshrl.u32 %v3502_v55, 16  ;;  %v4878_v3 = vshll.u32 %v3502_v55, 16  ;;  %v870_v4 = vpack.c.b16 %v869_v56, %v869_v56  ;;  %1256 = vmatpush.bf16.msrb.mxu0 %v4469_v57  ;;  %v3513_v55 = vld [vmem:[%s4756_s27 + $0x38] sm:$0x7] }
  0x37   : > { %v494_v6 = vrot.slane %v492_v62, 4  ;;  %v497_v8 = vrot.slane %v495_v63, 5  ;;  %v866_v9 = vrot.slane %v495_v63, 1  ;;  %3623 = vmatmul.msk.bf16.gmra.mxu3 %vm747_vm3, %v1068_v1  ;;  %v631_v13 = vrot.slane %v4830_v58, 3  ;;  %v3472_v57 = vld [vmem:[%s4756_s27 + $0x38] sm:$0x3] }
  0x38   : > { %v871_v11 = vrot.slane %v4876_v2, 4  ;;  %v872_v12 = vrot.slane %v4878_v3, 5  ;;  %v643_v14 = vor.u32 %v4864_v46, %v4862_v45  ;;  %v644_v18 = vrot.slane %v492_v62, 6 }
  0x39   : > { %v498_v38 = vor.u32 %v497_v8, %v494_v6  ;;  %v867_v17 = vor.u32 %v866_v9, %v492_v62  ;;  %v645_v19 = vrot.slane %v495_v63, 7  ;;  %v632_v22 = vor.u32 %v631_v13, %v630_v27  ;;  %v3597_v6 = vld [vmem:[%s4756_s27 + $0x40] sm:$0x7] }
  0x3a   : > { %v873_v58 = vor.u32 %v872_v12, %v871_v11  ;;  %v648_v7 = vunpack.c.l.b16 %v3511_v5  ;;  %v662_v23 = vunpack.c.l.b16 %v3512_v10  ;;  %v1023_v26 = vrot.slane %v492_v62, 2 }
  0x3b   : > { %v550_v24 = vsel %vm534_vm2, %v548_v0, %v498_v38  ;;  %v908_v25 = vsel %vm527_vm0, %v4846_v21, %v867_v17  ;;  %v646_v29 = vor.u32 %v645_v19, %v644_v18  ;;  %v702_v39 = vsel %vm527_vm0, %v632_v22, %v643_v14 }
  0x3c   : > { %3560 = vmatmul.msk.bf16.gmra.mxu1 %vm747_vm3, %v550_v24  ;;  %v910_v28 = vsel %vm531_vm1, %v908_v25, %v870_v4  ;;  %v649_v30 = vpack.c.b16 %v648_v7, %v648_v7  ;;  %v663_v31 = vpack.c.b16 %v662_v23, %v662_v23  ;;  %v1024_v40 = vrot.slane %v495_v63, 3 }
  0x3d   : > { %v912_v35 = vsel %vm534_vm2, %v910_v28, %v873_v58  ;;  %v1029_v21 = vrot.slane %v4876_v2, 6  ;;  %v1030_v46 = vrot.slane %v4878_v3, 7  ;;  %v3506_v47 = vor.u32 %v4448_v33, %v3505_v32 }
  0x3e   : > { %3595 = vmatmul.msk.bf16.gmra.mxu2 %vm747_vm3, %v912_v35  ;;  %v651_v41 = vshrl.u32 %v649_v30, 16  ;;  %v654_v42 = vshll.u32 %v649_v30, 16  ;;  %v665_v43 = vshrl.u32 %v663_v31, 16  ;;  %v668_v44 = vshll.u32 %v663_v31, 16 }
  0x3f   : > { %v1025_v45 = vor.u32 %v1024_v40, %v1023_v26  ;;  %v877_v50 = vunpack.c.l.b16 %v3562_v34  ;;  %v704_v56 = vsel %vm531_vm1, %v702_v39, %v646_v29  ;;  %v1031_v60 = vor.u32 %v1030_v46, %v1029_v21 }
  0x40   : > { %v653_v51 = vrot.slane %v651_v41, 2  ;;  %v656_v52 = vrot.slane %v654_v42, 3  ;;  %v1026_v53 = vrot.slane %v651_v41, 6  ;;  %v1027_v54 = vrot.slane %v654_v42, 7 }
  0x41   : > { %v4915_v59 = vrot.slane %v665_v43, 6  ;;  %v1032_v20 = vrot.slane %v665_v43, 2  ;;  %v1033_v62 = vrot.slane %v668_v44, 3  ;;  %v4917_v63 = vshrl.u32 %v3506_v47, 16 }
  0x42   : > { %v657_v61 = vor.u32 %v656_v52, %v653_v51  ;;  %v1028_v37 = vor.u32 %v1027_v54, %v1026_v53  ;;  %v4919_v0 = vshll.u32 %v3506_v47, 16  ;;  %v878_v1 = vpack.c.b16 %v877_v50, %v877_v50 }
  0x43   : > { %v3568_v4 = vor.u32 %v4457_v49, %v3567_v48  ;;  %v676_v5 = vunpack.c.l.b16 %v3513_v55  ;;  %v1034_v9 = vor.u32 %v1033_v62, %v1032_v20  ;;  %v1035_v10 = vrot.slane %v4917_v63, 2 }
  0x44   : > { %v706_v8 = vsel %vm534_vm2, %v704_v56, %v657_v61  ;;  %v1071_v27 = vsel %vm527_vm0, %v1025_v45, %v1028_v37  ;;  %v874_v12 = vrot.slane %v4919_v0, 1  ;;  %v1036_v38 = vrot.slane %v4919_v0, 3 }
  0x45   : > { %3540 = vmatmul.msk.bf16.gmra.mxu0 %vm747_vm3, %v706_v8  ;;  %v1073_v11 = vsel %vm531_vm1, %v1071_v27, %v1031_v60  ;;  %v885_v13 = vshrl.u32 %v3568_v4, 16  ;;  %v888_v14 = vshll.u32 %v3568_v4, 16  ;;  %v677_v16 = vpack.c.b16 %v676_v5, %v676_v5 }
  0x46   : > { %v1075_v15 = vsel %vm534_vm2, %v1073_v11, %v1034_v9  ;;  %v1045_v17 = vunpack.c.l.b16 %v3597_v6  ;;  %v670_v18 = vrot.slane %v668_v44, 7  ;;  %v875_v19 = vor.u32 %v874_v12, %v4917_v63  ;;  %v4468_v11 = vld [vmem:[%s5800_s3 + $0x10] sm:$0xff] }
  0x47   : > { %v887_v58 = vrot.slane %v885_v13, 4  ;;  %v890_v22 = vrot.slane %v888_v14, 5  ;;  %3624 = vmatmul.msk.bf16.gmra.mxu3 %vm747_vm3, %v1075_v15  ;;  %v679_v7 = vshrl.u32 %v677_v16, 16  ;;  %v682_v23 = vshll.u32 %v677_v16, 16  ;;  %v4472_v12 = vld [vmem:[%s5800_s3 + $0x30] sm:$0xff]  ;;  %1257 = vmatpush.bf16.msrb.mxu0 %v4468_v11  ;;  %v4466_v16 = vld [vmem:[%s5800_s3] sm:$0xff] }
  0x48   : > { %v1037_v24 = vor.u32 %v1036_v38, %v1035_v10  ;;  %v1041_v25 = vrot.slane %v885_v13, 6  ;;  %v915_v28 = vsel %vm527_vm0, %v3472_v57, %v875_v19  ;;  %v1046_v29 = vpack.c.b16 %v1045_v17, %v1045_v17  ;;  %v4470_v10 = vld [vmem:[%s5800_s3 + $0x20] sm:$0xff]  ;;  %1387 = vmatpush.bf16.msrb.mxu3 %v4472_v12 }
  0x49   : > { %v891_v26 = vor.u32 %v890_v22, %v887_v58  ;;  %v658_v30 = vrot.slane %v4876_v2, 2  ;;  %v917_v31 = vsel %vm531_vm1, %v915_v28, %v878_v1  ;;  %v1038_v32 = vrot.slane %v679_v7, 6  ;;  %1340 = vmatpush.bf16.msrb.mxu2 %v4470_v10 }
  0x4a   : > { %v1039_v33 = vrot.slane %v682_v23, 7  ;;  %v1042_v34 = vrot.slane %v888_v14, 7  ;;  %v1048_v39 = vshrl.u32 %v1046_v29, 16  ;;  %v1051_v40 = vshll.u32 %v1046_v29, 16 }
  0x4b   : > { %v919_v35 = vsel %vm534_vm2, %v917_v31, %v891_v26  ;;  %v659_v21 = vrot.slane %v4878_v3, 3  ;;  %v671_v42 = vor.u32 %v670_v18, %v4915_v59  ;;  %v672_v43 = vrot.slane %v4917_v63, 6  ;;  %v4977_v26 = vld [vmem:[%s5799_s2] ss:$0 sm:$0xff] }
  0x4c   : > { %v1040_v41 = vor.u32 %v1039_v33, %v1038_v32  ;;  %v673_v44 = vrot.slane %v4919_v0, 7  ;;  %v1050_v45 = vrot.slane %v1048_v39, 2  ;;  %v1053_v46 = vrot.slane %v1051_v40, 3 }
  0x4d   : > { %v660_v47 = vor.u32 %v659_v21, %v658_v30  ;;  %v681_v48 = vrot.slane %v679_v7, 2  ;;  %v1043_v49 = vor.u32 %v1042_v34, %v1041_v25  ;;  %v684_v51 = vrot.slane %v682_v23, 3 }
  0x4e   : > { %3596 = vmatmul.msk.bf16.gmra.mxu2 %vm747_vm3, %v919_v35  ;;  %v674_v50 = vor.u32 %v673_v44, %v672_v43  ;;  %v509_v52 = vrot.slane %v4878_v3, 1  ;;  %v1078_v53 = vsel %vm527_vm0, %v1037_v24, %v1040_v41  ;;  %v512_v55 = vunpack.c.l.b16 %v3472_v57 }
  0x4f   : > { %v709_v54 = vsel %vm527_vm0, %v660_v47, %v671_v42  ;;  %v685_v56 = vor.u32 %v684_v51, %v681_v48  ;;  %v522_v20 = vrot.slane %v4917_v63, 4  ;;  %v1054_v61 = vor.u32 %v1053_v46, %v1050_v45  ;;  %v4467_v63 = vld [vmem:[%s5800_s3 + $0x8] sm:$0xff]  ;;  %v4477_v46 = vld [vmem:[%s5800_s3 + $0x58] sm:$0xff] }
  0x50   : > { %v711_v59 = vsel %vm531_vm1, %v709_v54, %v674_v50  ;;  %v510_v60 = vor.u32 %v509_v52, %v4876_v2  ;;  %v513_v37 = vpack.c.b16 %v512_v55, %v512_v55  ;;  %v525_v62 = vrot.slane %v4919_v0, 5  ;;  %1284 = vmatpush.bf16.msrb.mxu1 %v4467_v63  ;;  %v4475_v45 = vld [vmem:[%s5800_s3 + $0x48] sm:$0xff]  ;;  %v4474_v54 = vld [vmem:[%s5800_s3 + $0x40] sm:$0xff] }
  0x51   : > { %v1080_v1 = vsel %vm531_vm1, %v1078_v53, %v1043_v49  ;;  %v713_v3 = vsel %vm534_vm2, %v711_v59, %v685_v56  ;;  %1441 = vmatpush.bf16.msra.mxu0 %v4475_v45  ;;  %v4479_v52 = vld [vmem:[%s5800_s3 + $0x68] sm:$0xff]  ;;  %v4481_v53 = vld [vmem:[%s5800_s3 + $0x78] sm:$0xff]  ;;  %v4476_v59 = vld [vmem:[%s5800_s3 + $0x50] sm:$0xff] }
  0x52   : > { %v553_v4 = vsel %vm527_vm0, %v4858_v36, %v510_v60  ;;  %v526_v5 = vor.u32 %v525_v62, %v522_v20  ;;  %v1082_v8 = vsel %vm534_vm2, %v1080_v1, %v1054_v61  ;;  %1546 = vmatpush.bf16.msra.mxu2 %v4479_v52  ;;  %1593 = vmatpush.bf16.msra.mxu3 %v4481_v53 }
  0x53   : > { %v555_v6 = vsel %vm531_vm1, %v553_v4, %v513_v37  ;;  %v4478_v4 = vld [vmem:[%s5800_s3 + $0x60] sm:$0xff] }
  0x54   : > { %v557_v2 = vsel %vm534_vm2, %v555_v6, %v526_v5  ;;  %1285 = vmatpush.bf16.msrb.mxu1 %v4466_v16  ;;  %v4480_v5 = vld [vmem:[%s5800_s3 + $0x70] sm:$0xff] }
  0x55   : > { %3541 = vmatmul.msk.bf16.gmra.mxu0 %vm747_vm3, %v713_v3  ;;  %3561 = vmatmul.msk.bf16.gmra.mxu1 %vm747_vm3, %v557_v2 }
  0x56   : > { %1442 = vmatpush.bf16.msra.mxu0 %v4474_v54  ;;  %1547 = vmatpush.bf16.msra.mxu2 %v4478_v4  ;;  %v4485_v54 = vld [vmem:[%s5800_s3 + $0x98] sm:$0xff] }
  0x57   : > { %3625 = vmatmul.msk.bf16.gmra.mxu3 %vm747_vm3, %v1082_v8 }
  0x58   : > { %1489 = vmatpush.bf16.msra.mxu1 %v4477_v46  ;;  %1594 = vmatpush.bf16.msra.mxu3 %v4480_v5 }
  0x5c   : > { %1490 = vmatpush.bf16.msra.mxu1 %v4476_v59 }
  0x98   : > { %v826_v0 = vpop.f32.mrf.mxu1 }
  0x9f   : > { %v970_v36 = vpop.f32.mrf.mxu2 }
  0xa0   : > { %v828_v27 = vpop.f32.mrf.mxu1 }
  0xa2   : > { %v765_v9 = vpop.f32.mrf.mxu0 }
  0xa3   : > { %v827_v17 = vadd.f32 %v826_v0, %v765_v9 }
  0xa5   : > { %v990_v22 = vadd.f32 %v970_v36, %v827_v17 }
  0xa7   : > { %v972_v13 = vpop.f32.mrf.mxu2 }
  0xa9   : > { %v831_v57 = vpop.f32.mrf.mxu1 }
  0xaa   : > { %v767_v14 = vpop.f32.mrf.mxu0  ;;  %v1133_v15 = vpop.f32.mrf.mxu3 }
  0xab   : > { %v1153_v25 = vadd.f32 %v1133_v15, %v990_v22  ;;  %v829_v41 = vadd.f32 %v828_v27, %v767_v14 }
  0xad   : > { %v1165_v31 = vadd.f32 %v4977_v26, %v1153_v25  ;;  %v991_v47 = vadd.f32 %v972_v13, %v829_v41 }
  0xaf   : > { %v1173_v21 = vmax.f32 %v1165_v31, 0.0 }
  0xb1   : > { %v975_v38 = vpop.f32.mrf.mxu2  ;;  %v833_v7 = vpop.f32.mrf.mxu1  ;;  %v4990_v51 = vpack.c.bf16 %v1173_v21, %v1173_v21 }
  0xb2   : > { %v770_v18 = vpop.f32.mrf.mxu0  ;;  %v1135_v19 = vpop.f32.mrf.mxu3 }
  0xb3   : > { %v832_v58 = vadd.f32 %v831_v57, %v770_v18  ;;  %v1154_v55 = vadd.f32 %v1135_v19, %v991_v47  ;;  %v1218_v61 = vunpack.c.l.b16 %v4990_v51 }
  0xb5   : > { %v992_v23 = vadd.f32 %v975_v38, %v832_v58  ;;  %v1166_v6 = vadd.f32 %v4977_v26, %v1154_v55  ;;  %v1219_v36 = vpack.c.b16 %v1218_v61, %v1218_v61 }
  0xb7   : > { %v1174_v10 = vmax.f32 %v1166_v6, 0.0  ;;  %v1293_v16 = vshrl.u32 %v1219_v36, 16  ;;  %v1295_v38 = vshll.u32 %v1219_v36, 16  ;;  %v1220_v22 = vrot.slane %v1219_v36, 2 }
  0xb9   : > { %v977_v24 = vpop.f32.mrf.mxu2  ;;  %v836_v39 = vpop.f32.mrf.mxu1  ;;  %v1350_v21 = vrot.slane %v1295_v38, 3 }
  0xba   : > { %v772_v28 = vpop.f32.mrf.mxu0  ;;  %v1138_v29 = vpop.f32.mrf.mxu3 }
  0xbb   : > { %v1155_v30 = vadd.f32 %v1138_v29, %v992_v23  ;;  %v834_v33 = vadd.f32 %v833_v7, %v772_v28  ;;  %v5027_v7 = vpack.c.bf16 %v1174_v10, %v1174_v10  ;;  %v4489_v10 = vld [vmem:[%s5800_s3 + $0xb8] sm:$0xff] }
  0xbd   : > { %v1167_v32 = vadd.f32 %v4977_v26, %v1155_v30  ;;  %v993_v35 = vadd.f32 %v977_v24, %v834_v33  ;;  %v1452_v61 = vunpack.c.l.b16 %v5027_v7 }
  0xbf   : > { %v1175_v34 = vmax.f32 %v1167_v32, 0.0 }
  0xc1   : > { %v980_v40 = vpop.f32.mrf.mxu2  ;;  %v4981_v42 = vpack.c.bf16 %v1175_v34, %v1175_v34  ;;  %v838_v1 = vpop.f32.mrf.mxu1  ;;  %v1297_v34 = vrot.slane %v1295_v38, 1 }
  0xc2   : > { %v775_v43 = vpop.f32.mrf.mxu0  ;;  %v1140_v44 = vpop.f32.mrf.mxu3 }
  0xc3   : > { %v837_v48 = vadd.f32 %v836_v39, %v775_v43  ;;  %v1190_v49 = vunpack.c.l.b16 %v4981_v42  ;;  %v1156_v50 = vadd.f32 %v1140_v44, %v993_v35  ;;  %v1349_v35 = vrot.slane %v1293_v16, 2 }
  0xc5   : > { %v994_v56 = vadd.f32 %v980_v40, %v837_v48  ;;  %v5004_v60 = vpack.c.b16 %v1190_v49, %v1190_v49  ;;  %v1168_v20 = vadd.f32 %v4977_v26, %v1156_v50  ;;  %v4483_v48 = vld [vmem:[%s5800_s3 + $0x88] sm:$0xff]  ;;  %v1351_v6 = vor.u32 %v1350_v21, %v1349_v35 }
  0xc7   : > { %v1176_v2 = vmax.f32 %v1168_v20, 0.0  ;;  %v5016_v63 = vshrl.u32 %v5004_v60, 16  ;;  %v5019_v0 = vshll.u32 %v5004_v60, 16  ;;  %v1300_v40 = vrot.slane %v5004_v60, 7 }
  0xc8   : > { %v1353_v41 = vrot.slane %v5004_v60, 1 }
  0xc9   : > { %v982_v62 = vpop.f32.mrf.mxu2  ;;  %v5022_v13 = vpack.c.bf16 %v1176_v2, %v1176_v2  ;;  %v1222_v14 = vrot.slane %v5019_v0, 1  ;;  %v1195_v15 = vrot.slane %v5016_v63, 6  ;;  %v1198_v57 = vrot.slane %v5019_v0, 7 }
  0xca   : > { %v777_v37 = vpop.f32.mrf.mxu0  ;;  %v1143_v3 = vpop.f32.mrf.mxu3  ;;  %v1357_v38 = vsel %vm5046_vm7, %v1351_v6, %v1353_v41 }
  0xcb   : > { %v1157_v8 = vadd.f32 %v1143_v3, %v994_v56  ;;  %v839_v27 = vadd.f32 %v838_v1, %v777_v37  ;;  %v1397_v29 = vunpack.c.l.b16 %v5022_v13  ;;  %v5031_v30 = vor.u32 %v1222_v14, %v5016_v63 }
  0xcc   : > { %v1199_v31 = vor.u32 %v1198_v57, %v1195_v15 }
  0xcd   : > { %v1169_v9 = vadd.f32 %v4977_v26, %v1157_v8  ;;  %v995_v12 = vadd.f32 %v982_v62, %v839_v27  ;;  %v5054_v49 = vpack.c.b16 %v1397_v29, %v1397_v29  ;;  %v1226_v50 = vsel %vm5046_vm7, %v1220_v22, %v5031_v30  ;;  %v4487_v8 = vld [vmem:[%s5800_s3 + $0xa8] sm:$0xff] }
  0xce   : > { %v1208_v53 = vsel %vm5046_vm7, %v4990_v51, %v1199_v31  ;;  %v1298_v62 = vor.u32 %v1297_v34, %v1293_v16 }
  0xcf   : > { %v1177_v11 = vmax.f32 %v1169_v9, 0.0  ;;  %v5083_v9 = vshrl.u32 %v5054_v49, 16  ;;  %v5086_v27 = vshll.u32 %v5054_v49, 16 }
  0xd0   : > { %v1310_v2 = vsel %vm5046_vm7, %v1298_v62, %v1300_v40 }
  0xd1   : > { %v1185_v17 = vpack.c.bf16 %v1177_v11, %v1177_v11  ;;  %v985_v28 = vpop.f32.mrf.mxu2  ;;  %v4482_v11 = vld [vmem:[%s5800_s3 + $0x80] sm:$0xff] }
  0xd2   : > { %v780_v18 = vpop.f32.mrf.mxu0  ;;  %v1145_v19 = vpop.f32.mrf.mxu3 }
  0xd3   : > { %v841_v58 = vpop.f32.mrf.mxu1  ;;  %v1202_v23 = vunpack.c.l.b16 %v1185_v17  ;;  %v1158_v24 = vadd.f32 %v1145_v19, %v995_v12  ;;  %v4484_v17 = vld [vmem:[%s5800_s3 + $0x90] sm:$0xff] }
  0xd4   : > { %v842_v25 = vadd.f32 %v841_v58, %v780_v18  ;;  %v1453_v18 = vpack.c.b16 %v1452_v61, %v1452_v61  ;;  %v4486_v58 = vld [vmem:[%s5800_s3 + $0xa0] sm:$0xff] }
  0xd5   : > { %v5033_v32 = vpack.c.b16 %v1202_v23, %v1202_v23  ;;  %v1170_v33 = vadd.f32 %v4977_v26, %v1158_v24  ;;  %v1402_v23 = vrot.slane %v5083_v9, 6  ;;  %v1405_v24 = vrot.slane %v5086_v27, 7 }
  0xd6   : > { %v996_v39 = vadd.f32 %v985_v28, %v842_v25  ;;  %v1456_v25 = vrot.slane %v5086_v27, 1  ;;  %v4488_v28 = vld [vmem:[%s5800_s3 + $0xb0] sm:$0xff]  ;;  %v1502_v35 = vshll.u32 %v1453_v18, 16 }
  0xd7   : > { %v5039_v43 = vshrl.u32 %v5033_v32, 16  ;;  %v5042_v44 = vshll.u32 %v5033_v32, 16  ;;  %v1178_v45 = vmax.f32 %v1170_v33, 0.0  ;;  %v1225_v47 = vrot.slane %v5033_v32, 7 }
  0xd8   : > { %v1204_v52 = vrot.slane %v5033_v32, 5  ;;  %v1406_v21 = vor.u32 %v1405_v24, %v1402_v23  ;;  %v5122_v41 = vor.u32 %v1456_v25, %v5083_v9  ;;  %v1557_v61 = vrot.slane %v1502_v35, 3 }
  0xd9   : > { %v1186_v55 = vpack.c.bf16 %v1178_v45, %v1178_v45  ;;  %v1229_v56 = vsel %vm1209_vm5, %v1226_v50, %v1225_v47  ;;  %v1305_v59 = vrot.slane %v5039_v43, 5  ;;  %v1308_v20 = vrot.slane %v5042_v44, 6  ;;  %v987_v34 = vpop.f32.mrf.mxu2 }
  0xda   : > { %v1148_v37 = vpop.f32.mrf.mxu3  ;;  %3638 = vmatmul.msk.bf16.vlgmr.msrb.gmra.mxu0 %vm1247_vm6, %v1229_v56  ;;  %v1212_v51 = vsel %vm1209_vm5, %v1208_v53, %v1204_v52  ;;  %v1355_v1 = vrot.slane %v5039_v43, 7  ;;  %v782_v15 = vpop.f32.mrf.mxu0  ;;  %v1454_v53 = vrot.slane %v1453_v18, 2  ;;  %v1603_v23 = vrot.slane %v5039_v43, 6 }
  0xdb   : > { %v1409_v3 = vunpack.c.l.b16 %v1186_v55  ;;  %v1159_v4 = vadd.f32 %v1148_v37, %v996_v39  ;;  %3647 = vmatmul.msk.bf16.vlgmr.msrb.gmra.mxu1 %vm1247_vm6, %v1212_v51  ;;  %v1309_v5 = vor.u32 %v1308_v20, %v1305_v59  ;;  %1640 = vmatpush.bf16.msrb.mxu0 %v4483_v48  ;;  %v843_v57 = vpop.f32.mrf.mxu1  ;;  %v1500_v39 = vshrl.u32 %v1453_v18, 16  ;;  %v4491_v37 = vld [vmem:[%s5800_s3 + $0xc8] sm:$0xff] }
  0xdc   : > { %v1356_v36 = vor.u32 %v1355_v1, %v5042_v44  ;;  %1685 = vmatpush.bf16.msrb.mxu1 %v4485_v54  ;;  %v844_v22 = vadd.f32 %v843_v57, %v782_v15  ;;  %v1504_v54 = vrot.slane %v1502_v35, 1  ;;  %v1412_v51 = vsel %vm5046_vm7, %v5027_v7, %v1406_v21  ;;  %v4497_v57 = vld [vmem:[%s5800_s3 + $0xf8] sm:$0xff] }
  0xdd   : > { %v5094_v12 = vpack.c.b16 %v1409_v3, %v1409_v3  ;;  %v1171_v14 = vadd.f32 %v4977_v26, %v1159_v4  ;;  %v1313_v16 = vsel %vm1209_vm5, %v1310_v2, %v1309_v5  ;;  %v1556_v20 = vrot.slane %v1500_v39, 2  ;;  %v4493_v4 = vld [vmem:[%s5800_s3 + $0xd8] sm:$0xff] }
  0xde   : > { %3660 = vmatmul.msk.bf16.vlgmr.msrb.gmra.mxu2 %vm1247_vm6, %v1313_v16  ;;  %v1360_v19 = vsel %vm1209_vm5, %v1357_v38, %v1356_v36  ;;  %v997_v40 = vadd.f32 %v987_v34, %v844_v22  ;;  %v1460_v62 = vsel %vm5046_vm7, %v1454_v53, %v5122_v41  ;;  %v1507_v1 = vrot.slane %v5054_v49, 7  ;;  %v4490_v16 = vld [vmem:[%s5800_s3 + $0xc0] sm:$0xff] }
  0xdf   : > { %3673 = vmatmul.msk.bf16.vlgmr.msrb.gmra.mxu3 %vm1247_vm6, %v1360_v19  ;;  %1733 = vmatpush.bf16.msrb.mxu2 %v4487_v8  ;;  %v5116_v29 = vshrl.u32 %v5094_v12, 16  ;;  %v5119_v31 = vshll.u32 %v5094_v12, 16  ;;  %v1179_v33 = vmax.f32 %v1171_v14, 0.0  ;;  %v1411_v48 = vrot.slane %v5094_v12, 5  ;;  %v4495_v14 = vld [vmem:[%s5800_s3 + $0xe8] sm:$0xff] }
  0xe0   : > { %1780 = vmatpush.bf16.msrb.mxu3 %v4489_v10  ;;  %1641 = vmatpush.bf16.msrb.mxu0 %v4482_v11  ;;  %v1459_v56 = vrot.slane %v5094_v12, 7  ;;  %v1560_v3 = vrot.slane %v5054_v49, 1  ;;  %v1505_v36 = vor.u32 %v1504_v54, %v1500_v39  ;;  %v1558_v11 = vor.u32 %v1557_v61, %v1556_v20 }
  0xe1   : > { %1686 = vmatpush.bf16.msrb.mxu1 %v4484_v17  ;;  %v1187_v45 = vpack.c.bf16 %v1179_v33, %v1179_v33  ;;  %v1512_v50 = vrot.slane %v5116_v29, 5  ;;  %v1515_v52 = vrot.slane %v5119_v31, 6  ;;  %v1562_v59 = vrot.slane %v5116_v29, 7 }
  0xe2   : > { %v1150_v55 = vpop.f32.mrf.mxu3  ;;  %v1415_v8 = vsel %vm1209_vm5, %v1412_v51, %v1411_v48  ;;  %v1463_v7 = vsel %vm1209_vm5, %v1460_v62, %v1459_v56  ;;  %v1517_v15 = vsel %vm5046_vm7, %v1505_v36, %v1507_v1  ;;  %v1564_v19 = vsel %vm5046_vm7, %v1558_v11, %v1560_v3 }
  0xe3   : > { %1734 = vmatpush.bf16.msrb.mxu2 %v4486_v58  ;;  %v1608_v5 = vunpack.c.l.b16 %v1187_v45  ;;  %v1160_v6 = vadd.f32 %v1150_v55, %v997_v40  ;;  %v1516_v2 = vor.u32 %v1515_v52, %v1512_v50  ;;  %v1563_v10 = vor.u32 %v1562_v59, %v5119_v31  ;;  %v4492_v58 = vld [vmem:[%s5800_s3 + $0xd0] sm:$0xff] }
  0xe4   : > { %1781 = vmatpush.bf16.msrb.mxu3 %v4488_v28  ;;  %v1604_v24 = vrot.slane %v5042_v44, 7  ;;  %v1652_v25 = vrot.slane %v5042_v44, 1  ;;  %v4496_v28 = vld [vmem:[%s5800_s3 + $0xf0] sm:$0xff]  ;;  %v1650_v53 = vrot.slane %v5004_v60, 2  ;;  %v1743_v54 = vrot.slane %v5016_v63, 2 }
  0xe5   : > { %v1609_v38 = vpack.c.b16 %v1608_v5, %v1608_v5  ;;  %v1172_v17 = vadd.f32 %v4977_v26, %v1160_v6  ;;  %v1520_v18 = vsel %vm1209_vm5, %v1517_v15, %v1516_v2  ;;  %v1567_v22 = vsel %vm1209_vm5, %v1564_v19, %v1563_v10  ;;  %v4494_v26 = vld [vmem:[%s5800_s3 + $0xe0] sm:$0xff] }
  0xe6   : > { %v1605_v39 = vor.u32 %v1604_v24, %v1603_v23  ;;  %v1653_v40 = vor.u32 %v1652_v25, %v5039_v43  ;;  %v1744_v55 = vrot.slane %v5019_v0, 3  ;;  %v1747_v20 = vrot.slane %v5033_v32, 1 }
  0xe7   : > { %v1697_v33 = vshrl.u32 %v1609_v38, 16  ;;  %v1700_v34 = vshll.u32 %v1609_v38, 16  ;;  %v1180_v35 = vmax.f32 %v1172_v17, 0.0  ;;  %v1610_v45 = vrot.slane %v1609_v38, 5 }
  0xe8   : > { %v1655_v44 = vrot.slane %v1609_v38, 7  ;;  %v1611_v59 = vsel %vm5046_vm7, %v4981_v42, %v1605_v39  ;;  %v1745_v0 = vor.u32 %v1744_v55, %v1743_v54  ;;  %v1704_v42 = vsel %vm5046_vm7, %v5031_v30, %v1225_v47  ;;  %v4509_v54 = vld [vmem:[%s5802_s5 + $0x58] sm:$0xff] }
  0xe9   : > { %v1188_v21 = vpack.c.bf16 %v1180_v35, %v1180_v35  ;;  %v1699_v48 = vrot.slane %v1697_v33, 5  ;;  %v1702_v50 = vrot.slane %v1700_v34, 6  ;;  %v1749_v52 = vrot.slane %v1697_v33, 7  ;;  %v4501_v35 = vld [vmem:[%s5802_s5 + $0x18] sm:$0xff] }
  0xea   : > { %3686 = vmatmul.msk.bf16.vlgmr.msra.gmra.mxu0 %vm1247_vm6, %v1415_v8  ;;  %v1614_v61 = vsel %vm1209_vm5, %v1611_v59, %v1610_v45  ;;  %v1751_v3 = vsel %vm5046_vm7, %v1745_v0, %v1747_v20  ;;  %v1790_v5 = vrot.slane %v5116_v29, 6  ;;  %v1791_v32 = vrot.slane %v5119_v31, 7  ;;  %v4499_v20 = vld [vmem:[%s5802_s5 + $0x8] sm:$0xff] }
  0xeb   : > { %3699 = vmatmul.msk.bf16.vlgmr.msra.gmra.mxu1 %vm1247_vm6, %v1463_v7  ;;  %1827 = vmatpush.bf16.msra.mxu0 %v4491_v37  ;;  %v1795_v43 = vunpack.c.l.b16 %v1188_v21  ;;  %v1656_v37 = vsel %vm5046_vm7, %v1650_v53, %v1653_v40  ;;  %v1703_v51 = vor.u32 %v1702_v50, %v1699_v48  ;;  %v1750_v63 = vor.u32 %v1749_v52, %v1700_v34  ;;  %v4500_v52 = vld [vmem:[%s5802_s5 + $0x10] sm:$0xff]  ;;  %v4505_v53 = vld [vmem:[%s5802_s5 + $0x38] sm:$0xff] }
  0xec   : > { %1872 = vmatpush.bf16.msra.mxu1 %v4493_v4  ;;  %v1659_v60 = vsel %vm1209_vm5, %v1656_v37, %v1655_v44  ;;  %v1839_v30 = vrot.slane %v5119_v31, 1  ;;  %v1792_v47 = vor.u32 %v1791_v32, %v1790_v5  ;;  %v1837_v15 = vrot.slane %v5054_v49, 2 }
  0xed   : > { %v1796_v62 = vpack.c.b16 %v1795_v43, %v1795_v43  ;;  %v1707_v1 = vsel %vm1209_vm5, %v1704_v42, %v1703_v51  ;;  %v1754_v4 = vsel %vm1209_vm5, %v1751_v3, %v1750_v63  ;;  %v4513_v43 = vld [vmem:[%s5802_s5 + $0x78] sm:$0xff]  ;;  %v4508_v63 = vld [vmem:[%s5802_s5 + $0x50] sm:$0xff]  ;;  %v4498_v42 = vld [vmem:[%s5802_s5] sm:$0xff] }
  0xee   : > { %3712 = vmatmul.msk.bf16.vlgmr.msra.gmra.mxu2 %vm1247_vm6, %v1520_v18  ;;  %v1840_v7 = vor.u32 %v1839_v30, %v5116_v29  ;;  %v1798_v38 = vsel %vm5046_vm7, %v5022_v13, %v1792_v47  ;;  %v1934_v18 = vrot.slane %v5094_v12, 1  ;;  %v1891_v13 = vsel %vm5046_vm7, %v5122_v41, %v1459_v56  ;;  %v4503_v3 = vld [vmem:[%s5802_s5 + $0x28] sm:$0xff] }
  0xef   : > { %3725 = vmatmul.msk.bf16.vlgmr.msra.gmra.mxu3 %vm1247_vm6, %v1567_v22  ;;  %1920 = vmatpush.bf16.msra.mxu2 %v4495_v14  ;;  %v1884_v6 = vshrl.u32 %v1796_v62, 16  ;;  %v1887_v8 = vshll.u32 %v1796_v62, 16  ;;  %v1797_v2 = vrot.slane %v1796_v62, 5  ;;  %v1842_v11 = vrot.slane %v1796_v62, 7  ;;  %v4512_v62 = vld [vmem:[%s5802_s5 + $0x70] sm:$0xff] }
  0xf0   : > { %1967 = vmatpush.bf16.msra.mxu3 %v4497_v57  ;;  %1828 = vmatpush.bf16.msra.mxu0 %v4490_v16  ;;  %v1930_v57 = vrot.slane %v5083_v9, 2  ;;  %v1931_v16 = vrot.slane %v5086_v27, 3  ;;  %v1843_v17 = vsel %vm5046_vm7, %v1837_v15, %v1840_v7  ;;  %v4506_v7 = vld [vmem:[%s5802_s5 + $0x40] sm:$0xff] }
  0xf1   : > { %1873 = vmatpush.bf16.msra.mxu1 %v4492_v58  ;;  %v1886_v36 = vrot.slane %v1884_v6, 5  ;;  %v1889_v10 = vrot.slane %v1887_v8, 6  ;;  %v1936_v14 = vrot.slane %v1884_v6, 7  ;;  %v1801_v31 = vsel %vm1209_vm5, %v1798_v38, %v1797_v2  ;;  %v4511_v6 = vld [vmem:[%s5802_s5 + $0x68] sm:$0xff]  ;;  %v4502_v2 = vld [vmem:[%s5802_s5 + $0x20] sm:$0xff]  ;;  %v4516_v38 = vld [vmem:[%s5802_s5 + $0x90] sm:$0xff] }
  0xf2   : > { %v1846_v49 = vsel %vm1209_vm5, %v1843_v17, %v1842_v11  ;;  %v1932_v9 = vor.u32 %v1931_v16, %v1930_v57  ;;  %v4517_v11 = vld [vmem:[%s5802_s5 + $0x98] sm:$0xff] }
  0xf3   : > { %1921 = vmatpush.bf16.msra.mxu2 %v4494_v26  ;;  %v1890_v29 = vor.u32 %v1889_v10, %v1886_v36  ;;  %v1937_v19 = vor.u32 %v1936_v14, %v1887_v8  ;;  %v4521_v8 = vld [vmem:[%s5802_s5 + $0xb8] sm:$0xff]  ;;  %v4510_v36 = vld [vmem:[%s5802_s5 + $0x60] sm:$0xff]  ;;  %v4520_v10 = vld [vmem:[%s5802_s5 + $0xb0] sm:$0xff] }
  0xf4   : > { %1968 = vmatpush.bf16.msra.mxu3 %v4496_v28  ;;  %v1938_v58 = vsel %vm5046_vm7, %v1932_v9, %v1934_v18  ;;  %v4525_v14 = vld [vmem:[%s5802_s5 + $0xd8] sm:$0xff]  ;;  %v4528_v18 = vld [vmem:[%s5802_s5 + $0xf0] sm:$0xff]  ;;  %v4515_v9 = vld [vmem:[%s5802_s5 + $0x88] sm:$0xff] }
  0xf5   : > { %v1894_v27 = vsel %vm1209_vm5, %v1891_v13, %v1890_v29  ;;  %v1941_v22 = vsel %vm1209_vm5, %v1938_v58, %v1937_v19  ;;  %v4529_v57 = vld [vmem:[%s5802_s5 + $0xf8] sm:$0xff]  ;;  %v4519_v29 = vld [vmem:[%s5802_s5 + $0xa8] sm:$0xff] }
  0xf6   : > { %v4523_v13 = vld [vmem:[%s5802_s5 + $0xc8] sm:$0xff] }
  0xfa   : > { %3738 = vmatmul.msk.bf16.vlgmr.msrb.gmra.mxu0 %vm1247_vm6, %v1614_v61 }
  0xfb   : > { %3751 = vmatmul.msk.bf16.vlgmr.msrb.gmra.mxu1 %vm1247_vm6, %v1659_v60  ;;  %2041 = vmatpush.bf16.msrb.mxu0 %v4505_v53  ;;  %v4504_v60 = vld [vmem:[%s5802_s5 + $0x30] sm:$0xff] }
  0xfc   : > { %2081 = vmatpush.bf16.msrb.mxu1 %v4501_v35 }
  0xfe   : > { %3764 = vmatmul.msk.bf16.vlgmr.msrb.gmra.mxu2 %vm1247_vm6, %v1707_v1 }
  0xff   : > { %3777 = vmatmul.msk.bf16.vlgmr.msrb.gmra.mxu3 %vm1247_vm6, %v1754_v4  ;;  %2131 = vmatpush.bf16.msrb.mxu2 %v4509_v54  ;;  %v4507_v4 = vld [vmem:[%s5802_s5 + $0x48] sm:$0xff] }
 0x100   : > { %2082 = vmatpush.bf16.msrb.mxu1 %v4500_v52  ;;  %2182 = vmatpush.bf16.msrb.mxu3 %v4513_v43 }
 0x101   : > { %2042 = vmatpush.bf16.msrb.mxu0 %v4504_v60 }
 0x103   : > { %2132 = vmatpush.bf16.msrb.mxu2 %v4508_v63 }
 0x104   : > { %2083 = vmatpush.bf16.msrb.mxu1 %v4499_v20  ;;  %2183 = vmatpush.bf16.msrb.mxu3 %v4512_v62  ;;  %v4531_v62 = vld [vmem:[%s5802_s5 + $0x108] sm:$0xff] }
 0x105   : > { %2043 = vmatpush.bf16.msrb.mxu0 %v4503_v3 }
 0x107   : > { %2133 = vmatpush.bf16.msrb.mxu2 %v4507_v4 }
 0x108   : > { %2084 = vmatpush.bf16.msrb.mxu1 %v4498_v42  ;;  %2184 = vmatpush.bf16.msrb.mxu3 %v4511_v6 }
 0x109   : > { %2044 = vmatpush.bf16.msrb.mxu0 %v4502_v2 }
 0x10a   : > { %3790 = vmatmul.msk.bf16.vlgmr.msra.gmra.mxu0 %vm1247_vm6, %v1801_v31  ;;  %v4524_v31 = vld [vmem:[%s5802_s5 + $0xd0] sm:$0xff] }
 0x10b   : > { %3803 = vmatmul.msk.bf16.vlgmr.msra.gmra.mxu1 %vm1247_vm6, %v1846_v49  ;;  %2134 = vmatpush.bf16.msrb.mxu2 %v4506_v7 }
 0x10c   : > { %2284 = vmatpush.bf16.msra.mxu1 %v4521_v8  ;;  %2185 = vmatpush.bf16.msrb.mxu3 %v4510_v36 }
 0x10d   : > { %2233 = vmatpush.bf16.msra.mxu0 %v4517_v11 }
 0x10e   : > { %3816 = vmatmul.msk.bf16.vlgmr.msra.gmra.mxu2 %vm1247_vm6, %v1894_v27 }
 0x10f   : > { %3829 = vmatmul.msk.bf16.vlgmr.msra.gmra.mxu3 %vm1247_vm6, %v1941_v22  ;;  %2335 = vmatpush.bf16.msra.mxu2 %v4525_v14 }
 0x110   : > { %2285 = vmatpush.bf16.msra.mxu1 %v4520_v10  ;;  %2386 = vmatpush.bf16.msra.mxu3 %v4529_v57  ;;  %v4558_v57 = vld [vmem:[%s5804_s7 + $0xc4] sm:$0xf] }
 0x111   : > { %2234 = vmatpush.bf16.msra.mxu0 %v4516_v38  ;;  %v4153_v38 = vld [vmem:[%s5804_s7 + $0xc8] sm:$0xf] }
 0x113   : > { %2336 = vmatpush.bf16.msra.mxu2 %v4524_v31 }
 0x114   : > { %2286 = vmatpush.bf16.msra.mxu1 %v4519_v29  ;;  %2387 = vmatpush.bf16.msra.mxu3 %v4528_v18  ;;  %v4563_v29 = vld [vmem:[%s5804_s7 + $0xe4] sm:$0xf0]  ;;  %v4145_v18 = vld [vmem:[%s5804_s7 + $0xc0] sm:$0xf] }
 0x115   : > { %2235 = vmatpush.bf16.msra.mxu0 %v4515_v9 }
 0x117   : > { %2337 = vmatpush.bf16.msra.mxu2 %v4523_v13  ;;  %v4559_v13 = vld [vmem:[%s5804_s7 + $0xcc] sm:$0xf] }
 0x157   : > { %v1259_v26 = vpop.f32.mrf.mxu0 }
 0x158   : > { %v1287_v23 = vpop.f32.mrf.mxu1 }
 0x159   : > { %v1288_v34 = vadd.f32 %v1287_v23, %v1259_v26  ;;  %v4518_v26 = vld [vmem:[%s5802_s5 + $0xa0] sm:$0xff] }
 0x15a   : > { %2287 = vmatpush.bf16.msra.mxu1 %v4518_v26  ;;  %v4115_v26 = vld [vmem:[%s5804_s7 + $0xa0] sm:$0xf0] }
 0x15f   : > { %v5233_v24 = vpop.f32.mrf.mxu0 }
 0x160   : > { %v5235_v12 = vpop.f32.mrf.mxu1 }
 0x161   : > { %v1342_v25 = vpop.f32.mrf.mxu2  ;;  %v1290_v27 = vadd.f32 %v5235_v12, %v5233_v24  ;;  %v4514_v24 = vld [vmem:[%s5802_s5 + $0x80] sm:$0xff] }
 0x162   : > { %v1389_v28 = vpop.f32.mrf.mxu3  ;;  %v1347_v39 = vadd.f32 %v1342_v25, %v1288_v34  ;;  %v4522_v12 = vld [vmem:[%s5802_s5 + $0xc0] sm:$0xff]  ;;  %2236 = vmatpush.bf16.msra.mxu0 %v4514_v24 }
 0x163   : > { %2338 = vmatpush.bf16.msra.mxu2 %v4522_v12  ;;  %v4113_v12 = vld [vmem:[%s5804_s7 + $0x80] sm:$0xf] }
 0x164   : > { %v1394_v48 = vadd.f32 %v1389_v28, %v1347_v39  ;;  %v4527_v28 = vld [vmem:[%s5802_s5 + $0xe8] sm:$0xff] }
 0x165   : > { %2388 = vmatpush.bf16.msra.mxu3 %v4527_v28 }
 0x167   : > { %v1444_v41 = vpop.f32.mrf.mxu0 }
 0x168   : > { %v1492_v56 = vpop.f32.mrf.mxu1  ;;  %v1449_v44 = vadd.f32 %v1444_v41, %v1394_v48  ;;  %v4640_v48 = vld [vmem:[%s5801_s4] ss:$0 sm:$0xff] }
 0x169   : > { %v5237_v33 = vpop.f32.mrf.mxu2 }
 0x16a   : > { %v5239_v46 = vpop.f32.mrf.mxu3  ;;  %v1497_v59 = vadd.f32 %v1492_v56, %v1449_v44  ;;  %v1348_v23 = vadd.f32 %v5237_v33, %v1290_v27  ;;  %v4526_v56 = vld [vmem:[%s5802_s5 + $0xe0] sm:$0xff]  ;;  %v4155_v27 = vld [vmem:[%s5804_s7 + $0xe8] sm:$0xf0] }
 0x16b   : > { %2389 = vmatpush.bf16.msra.mxu3 %v4526_v56  ;;  %v4551_v56 = vld [vmem:[%s5804_s7 + $0x8c] sm:$0xf] }
 0x16c   : > { %v1395_v33 = vadd.f32 %v5239_v46, %v1348_v23  ;;  %v4121_v23 = vld [vmem:[%s5804_s7 + $0x88] sm:$0xf] }
 0x16f   : > { %v5244_v40 = vpop.f32.mrf.mxu0 }
 0x170   : > { %v5246_v21 = vpop.f32.mrf.mxu1  ;;  %v1450_v39 = vadd.f32 %v5244_v40, %v1395_v33 }
 0x171   : > { %v1549_v45 = vpop.f32.mrf.mxu2 }
 0x172   : > { %v1596_v50 = vpop.f32.mrf.mxu3  ;;  %v1554_v37 = vadd.f32 %v1549_v45, %v1497_v59  ;;  %v1498_v52 = vadd.f32 %v5246_v21, %v1450_v39 }
 0x174   : > { %v1601_v1 = vadd.f32 %v1596_v50, %v1554_v37  ;;  %v4533_v37 = vld [vmem:[%s5802_s5 + $0x118] sm:$0xff] }
 0x177   : > { %v1643_v55 = vpop.f32.mrf.mxu0 }
 0x178   : > { %v1688_v0 = vpop.f32.mrf.mxu1  ;;  %v1648_v32 = vadd.f32 %v1643_v55, %v1601_v1 }
 0x179   : > { %v5263_v61 = vpop.f32.mrf.mxu2 }
 0x17a   : > { %v5265_v51 = vpop.f32.mrf.mxu3  ;;  %v1693_v15 = vadd.f32 %v1688_v0, %v1648_v32  ;;  %v1555_v54 = vadd.f32 %v5263_v61, %v1498_v52 }
 0x17c   : > { %v1602_v59 = vadd.f32 %v5265_v51, %v1555_v54  ;;  %v4532_v51 = vld [vmem:[%s5802_s5 + $0x110] sm:$0xff]  ;;  %v4081_v54 = vld [vmem:[%s5804_s7 + $0x40] sm:$0xf] }
 0x17f   : > { %v5285_v5 = vpop.f32.mrf.mxu0 }
 0x180   : > { %v1690_v16 = vpop.f32.mrf.mxu1  ;;  %v1649_v40 = vadd.f32 %v5285_v5, %v1602_v59  ;;  %v4530_v5 = vld [vmem:[%s5802_s5 + $0x100] sm:$0xff] }
 0x181   : > { %v1736_v30 = vpop.f32.mrf.mxu2 }
 0x182   : > { %v1783_v47 = vpop.f32.mrf.mxu3  ;;  %v1741_v17 = vadd.f32 %v1736_v30, %v1693_v15  ;;  %v1694_v21 = vadd.f32 %v1690_v16, %v1649_v40  ;;  %v4147_v16 = vld [vmem:[%s5804_s7 + $0xe0] sm:$0xf0]  ;;  %v4543_v40 = vld [vmem:[%s5804_s7 + $0x4c] sm:$0xf] }
 0x184   : > { %v1788_v58 = vadd.f32 %v1783_v47, %v1741_v17  ;;  %v4150_v17 = vor.u32 %v4558_v57, %v4147_v16  ;;  %v4561_v57 = vld [vmem:[%s5804_s7 + $0xdc] sm:$0xf] }
 0x185   : > { %v4171_v16 = vld [vmem:[%s5804_s7 + $0xf8] sm:$0xf0] }
 0x187   : > { %v1830_v49 = vpop.f32.mrf.mxu0 }
 0x188   : > { %v1835_v25 = vadd.f32 %v1830_v49, %v1788_v58  ;;  %v1875_v41 = vpop.f32.mrf.mxu1  ;;  %v4562_v49 = vld [vmem:[%s5804_s7 + $0xdc] sm:$0xf0]  ;;  %v4550_v58 = vld [vmem:[%s5804_s7 + $0x84] sm:$0xf] }
 0x189   : > { %v1738_v19 = vpop.f32.mrf.mxu2  ;;  %v4146_v9 = vor.u32 %v4562_v49, %v4145_v18  ;;  %v4118_v28 = vor.u32 %v4550_v58, %v4115_v26  ;;  %v4131_v18 = vld [vmem:[%s5804_s7 + $0xb0] sm:$0xf0]  ;;  %v4137_v49 = vld [vmem:[%s5804_s7 + $0x98] sm:$0xf]  ;;  %v4556_v58 = vld [vmem:[%s5804_s7 + $0xac] sm:$0xf0] }
 0x18a   : > { %v1785_v22 = vpop.f32.mrf.mxu3  ;;  %v1880_v34 = vadd.f32 %v1875_v41, %v1835_v25  ;;  %v1742_v0 = vadd.f32 %v1738_v19, %v1694_v21  ;;  %v4154_v19 = vor.u32 %v4563_v29, %v4153_v38  ;;  %v4555_v25 = vld [vmem:[%s5804_s7 + $0xa4] sm:$0xf0]  ;;  %v4554_v41 = vld [vmem:[%s5804_s7 + $0x9c] sm:$0xf0]  ;;  %v4552_v38 = vld [vmem:[%s5804_s7 + $0x94] sm:$0xf]  ;;  %v4174_v29 = vor.u32 %v4561_v57, %v4171_v16 }
 0x18b   : > { %v4122_v24 = vor.u32 %v4555_v25, %v4121_v23  ;;  %v4114_v33 = vor.u32 %v4554_v41, %v4113_v12  ;;  %v4057_v21 = vld [vmem:[%s5804_s7 + $0x8] sm:$0xf]  ;;  %v4139_v25 = vld [vmem:[%s5804_s7 + $0xb8] sm:$0xf0] }
 0x18c   : > { %v1789_v1 = vadd.f32 %v1785_v22, %v1742_v0  ;;  %v4158_v22 = vor.u32 %v4559_v13, %v4155_v27  ;;  %v4134_v13 = vor.u32 %v4552_v38, %v4131_v18  ;;  %v4129_v27 = vld [vmem:[%s5804_s7 + $0x90] sm:$0xf]  ;;  %v4581_v57 = vld [vmem:[%s5806_s9 + $0x78] sm:$0xff] }
 0x18d   : > { %v4130_v23 = vor.u32 %v4556_v58, %v4129_v27  ;;  %v4589_v16 = vld [vmem:[%s5806_s9 + $0xb8] sm:$0xff]  ;;  %v4572_v38 = vld [vmem:[%s5806_s9 + $0x30] sm:$0xff]  ;;  %v4594_v27 = vld [vmem:[%s5806_s9 + $0xe0] sm:$0xff] }
 0x18e   : > { %v4588_v18 = vld [vmem:[%s5806_s9 + $0xb0] sm:$0xff]  ;;  %v4578_v58 = vld [vmem:[%s5806_s9 + $0x60] sm:$0xff] }
 0x18f   : > { %v1832_v42 = vpop.f32.mrf.mxu0 }
 0x190   : > { %v1836_v3 = vadd.f32 %v1832_v42, %v1789_v1  ;;  %v1877_v32 = vpop.f32.mrf.mxu1  ;;  %v4539_v42 = vld [vmem:[%s5804_s7 + $0x24] sm:$0xf0]  ;;  %v4538_v1 = vld [vmem:[%s5804_s7 + $0x1c] sm:$0xf0] }
 0x191   : > { %v1923_v35 = vpop.f32.mrf.mxu2 }
 0x192   : > { %v1928_v45 = vadd.f32 %v1923_v35, %v1880_v34  ;;  %v1970_v50 = vpop.f32.mrf.mxu3  ;;  %v1881_v8 = vadd.f32 %v1877_v32, %v1836_v3  ;;  %v4123_v34 = vld [vmem:[%s5804_s7 + $0xa8] sm:$0xf0]  ;;  %v4058_v3 = vor.u32 %v4539_v42, %v4057_v21 }
 0x193   : > { %v4126_v39 = vor.u32 %v4551_v56, %v4123_v34  ;;  %v4059_v32 = vld [vmem:[%s5804_s7 + $0x28] sm:$0xf0]  ;;  %v4549_v34 = vld [vmem:[%s5804_s7 + $0x74] sm:$0xf0] }
 0x194   : > { %v1975_v44 = vadd.f32 %v1970_v50, %v1928_v45  ;;  %v4083_v50 = vld [vmem:[%s5804_s7 + $0x60] sm:$0xf0] }
 0x196   : > { %v1981_v53 = vadd.f32 %v4640_v48, %v1975_v44  ;;  %v4089_v44 = vld [vmem:[%s5804_s7 + $0x48] sm:$0xf] }
 0x198   : > { %v1983_v46 = vmax.f32 %v1981_v53, 0.0  ;;  %v4547_v53 = vld [vmem:[%s5804_s7 + $0x64] sm:$0xf0] }
 0x199   : > { %v1925_v6 = vpop.f32.mrf.mxu2  ;;  %v4090_v59 = vor.u32 %v4547_v53, %v4089_v44 }
 0x19a   : > { %v1985_v55 = vpack.c.bf16 %v1983_v46, %v1983_v46  ;;  %v1929_v30 = vadd.f32 %v1925_v6, %v1881_v8  ;;  %v1972_v36 = vpop.f32.mrf.mxu3  ;;  %v4546_v46 = vld [vmem:[%s5804_s7 + $0x5c] sm:$0xf0] }
 0x19c   : > { %v2005_v20 = vunpack.c.l.b16 %v1985_v55  ;;  %3871 = vmatmul.msk.bf16.vlgmr.msrb.gmra.mxu1 %vm747_vm3, %v1985_v55  ;;  %v1976_v10 = vadd.f32 %v1972_v36, %v1929_v30  ;;  %v4560_v30 = vld [vmem:[%s5804_s7 + $0xd4] sm:$0xf]  ;;  %v4565_v36 = vld [vmem:[%s5804_s7 + $0xf4] sm:$0xf0] }
 0x19d   : > { %2667 = vmatpush.bf16.msrb.mxu1 %v4146_v9 }
 0x19e   : > { %v2006_v43 = vpack.c.b16 %v2005_v20, %v2005_v20  ;;  %v1982_v11 = vadd.f32 %v4640_v48, %v1976_v10  ;;  %v4542_v48 = vld [vmem:[%s5804_s7 + $0x44] sm:$0xf]  ;;  %v4082_v20 = vor.u32 %v4546_v46, %v4081_v54  ;;  %v4161_v10 = vld [vmem:[%s5804_s7 + $0xd0] sm:$0xf]  ;;  %v4536_v54 = vld [vmem:[%s5804_s7 + $0x14] sm:$0xf] }
 0x19f   : > { %v4086_v52 = vor.u32 %v4542_v48, %v4083_v50  ;;  %v4545_v48 = vld [vmem:[%s5804_s7 + $0x5c] sm:$0xf]  ;;  %v4067_v46 = vld [vmem:[%s5804_s7 + $0x30] sm:$0xf0] }
 0x1a0   : > { %v2008_v60 = vshrl.u32 %v2006_v43, 16  ;;  %v2099_v63 = vrot.slane %v2006_v43, 1  ;;  %v2201_v47 = vrot.slane %v2006_v43, 2  ;;  %v2303_v2 = vrot.slane %v2006_v43, 3  ;;  %v4091_v43 = vld [vmem:[%s5804_s7 + $0x68] sm:$0xf0] }
 0x1a1   : > { %v1984_v14 = vmax.f32 %v1982_v11, 0.0  ;;  %2668 = vmatpush.bf16.msrb.mxu1 %v4114_v33  ;;  %v4564_v11 = vld [vmem:[%s5804_s7 + $0xec] sm:$0xf0]  ;;  %v4105_v33 = vld [vmem:[%s5804_s7 + $0x58] sm:$0xf] }
 0x1a2   : > { %3854 = vmatmul.msk.bf16.vlgmr.msrb.gmra.mxu0 %vm747_vm3, %v2008_v60  ;;  %3896 = vmatmul.msk.bf16.vlgmr.msrb.gmra.mxu2 %vm747_vm3, %v2099_v63  ;;  %v2150_v61 = vrot.slane %v2008_v60, 1  ;;  %v2252_v4 = vrot.slane %v2008_v60, 2  ;;  %v2354_v7 = vrot.slane %v2008_v60, 3  ;;  %v4534_v60 = vld [vmem:[%s5804_s7 + $0x4] sm:$0xf] }
 0x1a3   : > { %2436 = vmatpush.bf16.msrb.mxu0 %v4533_v37  ;;  %v1986_v15 = vpack.c.bf16 %v1984_v14, %v1984_v14  ;;  %2680 = vmatpush.bf16.msrb.mxu2 %v4150_v17  ;;  %v4094_v37 = vor.u32 %v4543_v40, %v4091_v43  ;;  %v4051_v63 = vld [vmem:[%s5804_s7 + $0x20] sm:$0xf0]  ;;  %v4107_v50 = vld [vmem:[%s5804_s7 + $0x78] sm:$0xf0]  ;;  %v4541_v40 = vld [vmem:[%s5804_s7 + $0x34] sm:$0xf0] }
 0x1a4   : > { %3921 = vmatmul.msk.bf16.vlgmr.msrb.gmra.mxu3 %vm747_vm3, %v2150_v61  ;;  %v4054_v0 = vor.u32 %v4534_v60, %v4051_v63  ;;  %v4065_v43 = vld [vmem:[%s5804_s7 + $0x10] sm:$0xf]  ;;  %v4537_v60 = vld [vmem:[%s5804_s7 + $0x1c] sm:$0xf] }
 0x1a5   : > { %2693 = vmatpush.bf16.msrb.mxu3 %v4154_v19  ;;  %2669 = vmatpush.bf16.msrb.mxu1 %v4082_v20  ;;  %v4557_v19 = vld [vmem:[%s5804_s7 + $0xb4] sm:$0xf0]  ;;  %v4110_v20 = vor.u32 %v4545_v48, %v4107_v50  ;;  %v4075_v63 = vld [vmem:[%s5804_s7 + $0x38] sm:$0xf0]  ;;  %v4590_v48 = vld [vmem:[%s5806_s9 + $0xc0] sm:$0xff] }
 0x1a6   : > { %v4605_v50 = vld [vmem:[%s5806_s9 + $0x138] sm:$0xff] }
 0x1a7   : > { %2437 = vmatpush.bf16.msrb.mxu0 %v4532_v51  ;;  %2681 = vmatpush.bf16.msrb.mxu2 %v4118_v28  ;;  %v4544_v28 = vld [vmem:[%s5804_s7 + $0x54] sm:$0xf] }
 0x1a9   : > { %2694 = vmatpush.bf16.msrb.mxu3 %v4122_v24  ;;  %v4099_v24 = vld [vmem:[%s5804_s7 + $0x70] sm:$0xf0] }
 0x1ab   : > { %2438 = vmatpush.bf16.msrb.mxu0 %v4531_v62  ;;  %2682 = vmatpush.bf16.msrb.mxu2 %v4086_v52  ;;  %v4049_v62 = vld [vmem:[%s5804_s7] sm:$0xf]  ;;  %v4106_v52 = vor.u32 %v4549_v34, %v4105_v33  ;;  %v4567_v33 = vld [vmem:[%s5806_s9 + $0x8] sm:$0xff] }
 0x1ac   : > { %3971 = vmatmul.msk.bf16.vlgmr.msra.gmra.mxu1 %vm747_vm3, %v2252_v4  ;;  %v4050_v4 = vor.u32 %v4538_v1, %v4049_v62  ;;  %v4078_v62 = vor.u32 %v4537_v60, %v4075_v63  ;;  %v4591_v34 = vld [vmem:[%s5806_s9 + $0xc8] sm:$0xff]  ;;  %v4602_v60 = vld [vmem:[%s5806_s9 + $0x120] sm:$0xff] }
 0x1ad   : > { %2695 = vmatpush.bf16.msrb.mxu3 %v4090_v59  ;;  %v4626_v63 = vld [vmem:[%s5806_s9 + $0x1e0] sm:$0xff] }
 0x1ae   : > { %2670 = vmatpush.bf16.msrb.mxu1 %v4050_v4 }
 0x1af   : > { %2439 = vmatpush.bf16.msrb.mxu0 %v4530_v5  ;;  %v4535_v5 = vld [vmem:[%s5804_s7 + $0xc] sm:$0xf]  ;;  %2683 = vmatpush.bf16.msrb.mxu2 %v4054_v0 }
 0x1b0   : > { %v4062_v8 = vor.u32 %v4535_v5, %v4059_v32 }
 0x1b1   : > { %2696 = vmatpush.bf16.msrb.mxu3 %v4058_v3 }
 0x1b2   : > { %3946 = vmatmul.msk.bf16.vlgmr.msra.gmra.mxu0 %vm747_vm3, %v2201_v47  ;;  %3996 = vmatmul.msk.bf16.vlgmr.msra.gmra.mxu2 %vm747_vm3, %v2303_v2  ;;  %v4163_v47 = vld [vmem:[%s5804_s7 + $0xf0] sm:$0xf0]  ;;  %v4169_v2 = vld [vmem:[%s5804_s7 + $0xd8] sm:$0xf] }
 0x1b3   : > { %2706 = vmatpush.bf16.msra.mxu0 %v4158_v22  ;;  %v4170_v14 = vor.u32 %v4565_v36, %v4169_v2  ;;  %v4553_v22 = vld [vmem:[%s5804_s7 + $0x9c] sm:$0xf]  ;;  %v2446_v2 = vld [vmem:[%s5803_s6] sm:$0x1] }
 0x1b4   : > { %4021 = vmatmul.msk.bf16.vlgmr.msra.gmra.mxu3 %vm747_vm3, %v2354_v7  ;;  %v4166_v7 = vor.u32 %v4560_v30, %v4163_v47  ;;  %v4142_v56 = vor.u32 %v4553_v22, %v4139_v25  ;;  %v4586_v22 = vld [vmem:[%s5806_s9 + $0xa0] sm:$0xff]  ;;  %v4577_v25 = vld [vmem:[%s5806_s9 + $0x58] sm:$0xff] }
 0x1b5   : > { %2745 = vmatpush.bf16.msra.mxu3 %v4170_v14  ;;  %v4597_v14 = vld [vmem:[%s5806_s9 + $0xf8] sm:$0xff] }
 0x1b6   : > { %2732 = vmatpush.bf16.msra.mxu2 %v4166_v7 }
 0x1b7   : > { %2707 = vmatpush.bf16.msra.mxu0 %v4126_v39  ;;  %v4102_v39 = vor.u32 %v4544_v28, %v4099_v24  ;;  %v4585_v28 = vld [vmem:[%s5806_s9 + $0x98] sm:$0xff]  ;;  %v4568_v24 = vld [vmem:[%s5806_s9 + $0x10] sm:$0xff] }
 0x1ba   : > { %2733 = vmatpush.bf16.msra.mxu2 %v4134_v13  ;;  %v4587_v13 = vld [vmem:[%s5806_s9 + $0xa8] sm:$0xff] }
 0x1bb   : > { %2708 = vmatpush.bf16.msra.mxu0 %v4094_v37  ;;  %v4540_v37 = vld [vmem:[%s5804_s7 + $0x2c] sm:$0xf0] }
 0x1bc   : > { %v4066_v42 = vor.u32 %v4540_v37, %v4065_v43  ;;  %v4612_v43 = vld [vmem:[%s5806_s9 + $0x170] sm:$0xff] }
 0x1bd   : > { %v4620_v37 = vld [vmem:[%s5806_s9 + $0x1b0] sm:$0xff] }
 0x1be   : > { %2734 = vmatpush.bf16.msra.mxu2 %v4102_v39  ;;  %v4583_v39 = vld [vmem:[%s5806_s9 + $0x88] sm:$0xff] }
 0x1bf   : > { %2709 = vmatpush.bf16.msra.mxu0 %v4062_v8 }
 0x1c2   : > { %4046 = vmatmul.msk.bf16.vlgmr.msrb.gmra.mxu0 %vm747_vm3, %v1986_v15  ;;  %v4162_v15 = vor.u32 %v4564_v11, %v4161_v10 }
 0x1c3   : > { %2758 = vmatpush.bf16.msrb.mxu0 %v4174_v29  ;;  %v4580_v29 = vld [vmem:[%s5806_s9 + $0x70] sm:$0xff] }
 0x1c4   : > { %2719 = vmatpush.bf16.msra.mxu1 %v4162_v15 }
 0x1c7   : > { %2759 = vmatpush.bf16.msrb.mxu0 %v4142_v56  ;;  %v4584_v56 = vld [vmem:[%s5806_s9 + $0x90] sm:$0xff] }
 0x1c8   : > { %2720 = vmatpush.bf16.msra.mxu1 %v4130_v23  ;;  %v4593_v23 = vld [vmem:[%s5806_s9 + $0xd8] sm:$0xff] }
 0x1cb   : > { %2760 = vmatpush.bf16.msrb.mxu0 %v4110_v20  ;;  %v4603_v20 = vld [vmem:[%s5806_s9 + $0x128] sm:$0xff] }
 0x1cf   : > { %2761 = vmatpush.bf16.msrb.mxu0 %v4078_v62  ;;  %v4618_v62 = vld [vmem:[%s5806_s9 + $0x1a0] sm:$0xff] }
 0x219   : > { %v5389_v31 = vpop.f32.mrf.mxu1 }
 0x21f   : > { %v2046_v35 = vpop.f32.mrf.mxu0 }
 0x220   : > { %v2087_v17 = vadd.f32 %v5389_v31, %v2046_v35  ;;  %v4138_v31 = vor.u32 %v4557_v19, %v4137_v49  ;;  %v4097_v35 = vld [vmem:[%s5804_s7 + $0x50] sm:$0xf]  ;;  %v4571_v49 = vld [vmem:[%s5806_s9 + $0x28] sm:$0xff] }
 0x221   : > { %v2088_v45 = vpop.f32.mrf.mxu1  ;;  %v4595_v19 = vld [vmem:[%s5806_s9 + $0xe8] sm:$0xff] }
 0x222   : > { %v4548_v45 = vld [vmem:[%s5804_s7 + $0x6c] sm:$0xf0]  ;;  %2746 = vmatpush.bf16.msra.mxu3 %v4138_v31  ;;  %v4570_v31 = vld [vmem:[%s5806_s9 + $0x20] sm:$0xff] }
 0x223   : > { %v4098_v53 = vor.u32 %v4548_v45, %v4097_v35  ;;  %v4575_v35 = vld [vmem:[%s5806_s9 + $0x48] sm:$0xff]  ;;  %v4566_v45 = vld [vmem:[%s5806_s9] sm:$0xff] }
 0x225   : > { %v2136_v55 = vpop.f32.mrf.mxu2  ;;  %2721 = vmatpush.bf16.msra.mxu1 %v4098_v53  ;;  %v4582_v53 = vld [vmem:[%s5806_s9 + $0x80] sm:$0xff] }
 0x226   : > { %v2140_v26 = vadd.f32 %v2136_v55, %v2087_v17  ;;  %v4073_v55 = vld [vmem:[%s5804_s7 + $0x18] sm:$0xf]  ;;  %2747 = vmatpush.bf16.msra.mxu3 %v4106_v52  ;;  %v4596_v17 = vld [vmem:[%s5806_s9 + $0xf0] sm:$0xff]  ;;  %v4574_v52 = vld [vmem:[%s5806_s9 + $0x40] sm:$0xff] }
 0x227   : > { %v2048_v61 = vpop.f32.mrf.mxu0  ;;  %v5463_v51 = vpop.f32.mrf.mxu3  ;;  %v4074_v0 = vor.u32 %v4541_v40, %v4073_v55  ;;  %v4604_v55 = vld [vmem:[%s5806_s9 + $0x130] sm:$0xff]  ;;  %v4627_v40 = vld [vmem:[%s5806_s9 + $0x1e8] sm:$0xff] }
 0x228   : > { %v2191_v59 = vadd.f32 %v5463_v51, %v2140_v26  ;;  %v4070_v61 = vor.u32 %v4536_v54, %v4067_v46  ;;  %v4569_v26 = vld [vmem:[%s5806_s9 + $0x18] sm:$0xff] }
 0x229   : > { %v5480_v6 = vpop.f32.mrf.mxu1  ;;  %2722 = vmatpush.bf16.msra.mxu1 %v4066_v42  ;;  %v4613_v54 = vld [vmem:[%s5806_s9 + $0x178] sm:$0xff]  ;;  %v4610_v42 = vld [vmem:[%s5806_s9 + $0x160] sm:$0xff] }
 0x22a   : > { %2735 = vmatpush.bf16.msra.mxu2 %v4070_v61  ;;  %2748 = vmatpush.bf16.msra.mxu3 %v4074_v0  ;;  %v4621_v46 = vld [vmem:[%s5806_s9 + $0x1b8] sm:$0xff]  ;;  %v4619_v61 = vld [vmem:[%s5806_s9 + $0x1a8] sm:$0xff] }
 0x22b   : > { %v4625_v0 = vld [vmem:[%s5806_s9 + $0x1d8] sm:$0xff] }
 0x22d   : > { %v2138_v9 = vpop.f32.mrf.mxu2 }
 0x22e   : > { %v4579_v9 = vld [vmem:[%s5806_s9 + $0x68] sm:$0xff] }
 0x22f   : > { %v2189_v12 = vpop.f32.mrf.mxu3  ;;  %v2238_v41 = vpop.f32.mrf.mxu0 }
 0x230   : > { %v2242_v21 = vadd.f32 %v2238_v41, %v2191_v59  ;;  %v4592_v12 = vld [vmem:[%s5806_s9 + $0xd0] sm:$0xff] }
 0x231   : > { %v2291_v44 = vpop.f32.mrf.mxu1  ;;  %v4576_v41 = vld [vmem:[%s5806_s9 + $0x50] sm:$0xff] }
 0x232   : > { %v2293_v4 = vadd.f32 %v5480_v6, %v2242_v21  ;;  %v4573_v6 = vld [vmem:[%s5806_s9 + $0x38] sm:$0xff]  ;;  %v4628_v59 = vld [vmem:[%s5806_s9 + $0x1f0] sm:$0xff]  ;;  %v4611_v21 = vld [vmem:[%s5806_s9 + $0x168] sm:$0xff] }
 0x233   : > { %v4629_v44 = vld [vmem:[%s5806_s9 + $0x1f8] sm:$0xff] }
 0x235   : > { %v2340_v51 = vpop.f32.mrf.mxu2 }
 0x236   : > { %v2344_v5 = vadd.f32 %v2340_v51, %v2293_v4  ;;  %v4601_v51 = vld [vmem:[%s5806_s9 + $0x118] sm:$0xff] }
 0x237   : > { %v2240_v1 = vpop.f32.mrf.mxu0  ;;  %v2391_v3 = vpop.f32.mrf.mxu3  ;;  %v4609_v4 = vld [vmem:[%s5806_s9 + $0x158] sm:$0xff] }
 0x238   : > { %v2395_v8 = vadd.f32 %v2391_v3, %v2344_v5  ;;  %v4600_v1 = vld [vmem:[%s5806_s9 + $0x110] sm:$0xff]  ;;  %v4617_v5 = vld [vmem:[%s5806_s9 + $0x198] sm:$0xff] }
 0x239   : > { %v4624_v3 = vld [vmem:[%s5806_s9 + $0x1d0] sm:$0xff] }
 0x23d   : > { %v2342_v32 = vpop.f32.mrf.mxu2 }
 0x23e   : > { %v4599_v32 = vld [vmem:[%s5806_s9 + $0x108] sm:$0xff] }
 0x23f   : > { %v2393_v30 = vpop.f32.mrf.mxu3  ;;  %v2441_v47 = vpop.f32.mrf.mxu0 }
 0x240   : > { %v2445_v7 = vadd.f32 %v2441_v47, %v2395_v8  ;;  %v4623_v8 = vld [vmem:[%s5806_s9 + $0x1c8] sm:$0xff]  ;;  %v4608_v30 = vld [vmem:[%s5806_s9 + $0x150] sm:$0xff] }
 0x241   : > { %v4616_v47 = vld [vmem:[%s5806_s9 + $0x190] sm:$0xff] }
 0x242   : > { %v2447_v36 = vadd.f32 %v2446_v2, %v2445_v7  ;;  %v4598_v2 = vld [vmem:[%s5806_s9 + $0x100] sm:$0xff] }
 0x243   : > { %v4622_v7 = vld [vmem:[%s5806_s9 + $0x1c0] sm:$0xff] }
 0x244   : > { %v2448_v10 = vmax.f32 %v2447_v36, 0.0  ;;  %v4607_v36 = vld [vmem:[%s5806_s9 + $0x148] sm:$0xff] }
 0x246   : > { %v2449_v11 = vpack.c.bf16 %v2448_v10, %v2448_v10  ;;  %v4615_v10 = vld [vmem:[%s5806_s9 + $0x188] sm:$0xff] }
 0x247   : > { %v2443_v15 = vpop.f32.mrf.mxu0 }
 0x248   : > { %4175 = vmatmul.msk.bf16.vlgmr.msrb.gmra.mxu1 %vm747_vm3, %v2449_v11  ;;  %4176 = vmatmul.msk.bf16.vlgmr.msrb.gmra.mxu2 %vm747_vm3, %v2449_v11 }
 0x249   : > { %4177 = vmatmul.msk.bf16.vlgmr.msrb.gmra.mxu3 %vm747_vm3, %v2449_v11  ;;  %4178 = vmatmul.msk.bf16.vlgmr.msra.gmra.mxu0 %vm747_vm3, %v2449_v11 }
 0x24a   : > { %3296 = vmatpush.bf16.msrb.mxu1 %v4573_v6  ;;  %3335 = vmatpush.bf16.msra.mxu0 %v4597_v14  ;;  %v4606_v6 = vld [vmem:[%s5806_s9 + $0x140] sm:$0xff] }
 0x24b   : > { %3309 = vmatpush.bf16.msrb.mxu2 %v4581_v57  ;;  %3322 = vmatpush.bf16.msrb.mxu3 %v4589_v16  ;;  %v4614_v14 = vld [vmem:[%s5806_s9 + $0x180] sm:$0xff] }
 0x24e   : > { %3297 = vmatpush.bf16.msrb.mxu1 %v4572_v38  ;;  %3336 = vmatpush.bf16.msra.mxu0 %v4596_v17 }
 0x24f   : > { %3310 = vmatpush.bf16.msrb.mxu2 %v4580_v29  ;;  %3323 = vmatpush.bf16.msrb.mxu3 %v4588_v18 }
 0x252   : > { %3298 = vmatpush.bf16.msrb.mxu1 %v4571_v49  ;;  %3337 = vmatpush.bf16.msra.mxu0 %v4595_v19 }
 0x253   : > { %3311 = vmatpush.bf16.msrb.mxu2 %v4579_v9  ;;  %3324 = vmatpush.bf16.msrb.mxu3 %v4587_v13 }
 0x256   : > { %3299 = vmatpush.bf16.msrb.mxu1 %v4570_v31  ;;  %3338 = vmatpush.bf16.msra.mxu0 %v4594_v27 }
 0x257   : > { %3312 = vmatpush.bf16.msrb.mxu2 %v4578_v58  ;;  %3325 = vmatpush.bf16.msrb.mxu3 %v4586_v22 }
 0x258   : > { %4179 = vmatmul.msk.bf16.vlgmr.msra.gmra.mxu1 %vm747_vm3, %v2449_v11  ;;  %4180 = vmatmul.msk.bf16.vlgmr.msra.gmra.mxu2 %vm747_vm3, %v2449_v11 }
 0x259   : > { %4181 = vmatmul.msk.bf16.vlgmr.msra.gmra.mxu3 %vm747_vm3, %v2449_v11  ;;  %4182 = vmatmul.msk.bf16.vlgmr.msrb.gmra.mxu0 %vm747_vm3, %v2449_v11  ;;  %v2482_v11 = vld [vmem:[%s5805_s8] sm:$0xff] }
 0x25a   : > { %3300 = vmatpush.bf16.msrb.mxu1 %v4569_v26  ;;  %3339 = vmatpush.bf16.msra.mxu0 %v4593_v23  ;;  %v2644_v15 = vperm.slane %v2482_v11, 0  ;;  %v2647_v57 = vperm.slane %v2482_v11, 3  ;;  %v2645_v49 = vperm.slane %v2482_v11, 1  ;;  %v2646_v9 = vperm.slane %v2482_v11, 2 }
 0x25b   : > { %3313 = vmatpush.bf16.msrb.mxu2 %v4577_v25  ;;  %3326 = vmatpush.bf16.msrb.mxu3 %v4585_v28 }
 0x25e   : > { %3301 = vmatpush.bf16.msrb.mxu1 %v4568_v24  ;;  %3340 = vmatpush.bf16.msra.mxu0 %v4592_v12 }
 0x25f   : > { %3314 = vmatpush.bf16.msrb.mxu2 %v4576_v41  ;;  %3327 = vmatpush.bf16.msrb.mxu3 %v4584_v56  ;;  %v2648_v56 = vperm.slane %v2482_v11, 4 }
 0x262   : > { %3302 = vmatpush.bf16.msrb.mxu1 %v4567_v33  ;;  %3341 = vmatpush.bf16.msra.mxu0 %v4591_v34  ;;  %v2651_v34 = vperm.slane %v2482_v11, 7 }
 0x263   : > { %3315 = vmatpush.bf16.msrb.mxu2 %v4575_v35  ;;  %3328 = vmatpush.bf16.msrb.mxu3 %v4583_v39 }
 0x266   : > { %3303 = vmatpush.bf16.msrb.mxu1 %v4566_v45  ;;  %3342 = vmatpush.bf16.msra.mxu0 %v4590_v48 }
 0x267   : > { %3316 = vmatpush.bf16.msrb.mxu2 %v4574_v52  ;;  %3329 = vmatpush.bf16.msrb.mxu3 %v4582_v53  ;;  %v2649_v52 = vperm.slane %v2482_v11, 5 }
 0x26a   : > { %3348 = vmatpush.bf16.msra.mxu1 %v4605_v50  ;;  %3387 = vmatpush.bf16.msrb.mxu0 %v4629_v44 }
 0x26b   : > { %3361 = vmatpush.bf16.msra.mxu2 %v4613_v54  ;;  %3374 = vmatpush.bf16.msra.mxu3 %v4621_v46  ;;  %v2650_v54 = vperm.slane %v2482_v11, 6 }
 0x26e   : > { %3349 = vmatpush.bf16.msra.mxu1 %v4604_v55  ;;  %3388 = vmatpush.bf16.msrb.mxu0 %v4628_v59 }
 0x26f   : > { %3362 = vmatpush.bf16.msra.mxu2 %v4612_v43  ;;  %3375 = vmatpush.bf16.msra.mxu3 %v4620_v37 }
 0x272   : > { %3350 = vmatpush.bf16.msra.mxu1 %v4603_v20  ;;  %3389 = vmatpush.bf16.msrb.mxu0 %v4627_v40 }
 0x273   : > { %3363 = vmatpush.bf16.msra.mxu2 %v4611_v21  ;;  %3376 = vmatpush.bf16.msra.mxu3 %v4619_v61 }
 0x276   : > { %3351 = vmatpush.bf16.msra.mxu1 %v4602_v60  ;;  %3390 = vmatpush.bf16.msrb.mxu0 %v4626_v63 }
 0x277   : > { %3364 = vmatpush.bf16.msra.mxu2 %v4610_v42  ;;  %3377 = vmatpush.bf16.msra.mxu3 %v4618_v62 }
 0x27a   : > { %3352 = vmatpush.bf16.msra.mxu1 %v4601_v51  ;;  %3391 = vmatpush.bf16.msrb.mxu0 %v4625_v0 }
 0x27b   : > { %3365 = vmatpush.bf16.msra.mxu2 %v4609_v4  ;;  %3378 = vmatpush.bf16.msra.mxu3 %v4617_v5  ;;  %v2911_v5 = vld [vmem:[%s5807_s10] sm:$0x1] }
 0x27e   : > { %3353 = vmatpush.bf16.msra.mxu1 %v4600_v1  ;;  %3392 = vmatpush.bf16.msrb.mxu0 %v4624_v3 }
 0x27f   : > { %3366 = vmatpush.bf16.msra.mxu2 %v4608_v30  ;;  %3379 = vmatpush.bf16.msra.mxu3 %v4616_v47 }
 0x282   : > { %3354 = vmatpush.bf16.msra.mxu1 %v4599_v32  ;;  %3393 = vmatpush.bf16.msrb.mxu0 %v4623_v8 }
 0x283   : > { %3367 = vmatpush.bf16.msra.mxu2 %v4607_v36  ;;  %3380 = vmatpush.bf16.msra.mxu3 %v4615_v10 }
 0x286   : > { %3355 = vmatpush.bf16.msra.mxu1 %v4598_v2  ;;  %3394 = vmatpush.bf16.msrb.mxu0 %v4622_v7 }
 0x287   : > { %3368 = vmatpush.bf16.msra.mxu2 %v4606_v6  ;;  %3381 = vmatpush.bf16.msra.mxu3 %v4614_v14 }
 0x2c5   : > { %v2672_v16 = vpop.f32.mrf.mxu1 }
 0x2c6   : > { %v2673_v38 = vadd.f32 %v2672_v16, %v2644_v15  ;;  %v2711_v17 = vpop.f32.mrf.mxu0 }
 0x2c7   : > { %v2712_v29 = vadd.f32 %v2711_v17, %v2647_v57 }
 0x2c8   : > { %v2767_v18 = vmax.f32 %v2673_v38, 0.0 }
 0x2c9   : > { %v2770_v19 = vmax.f32 %v2712_v29, 0.0 }
 0x2ca   : > { %v2775_v13 = vpack.c.bf16 %v2767_v18, %v2767_v18 }
 0x2cb   : > { %v2778_v31 = vpack.c.bf16 %v2770_v19, %v2770_v19  ;;  %v2685_v27 = vpop.f32.mrf.mxu2 }
 0x2cc   : > { %v2686_v58 = vadd.f32 %v2685_v27, %v2645_v49  ;;  %v2698_v22 = vpop.f32.mrf.mxu3  ;;  %3304 = vmatmul.bf16.vlgmr.msrb.gmra.mxu1 %v2775_v13 }
 0x2cd   : > { %v2699_v26 = vadd.f32 %v2698_v22, %v2646_v9  ;;  %3343 = vmatmul.bf16.vlgmr.msra.gmra.mxu0 %v2778_v31  ;;  %v2674_v23 = vpop.f32.mrf.mxu1 }
 0x2ce   : > { %v2768_v25 = vmax.f32 %v2686_v58, 0.0  ;;  %v2713_v28 = vpop.f32.mrf.mxu0 }
 0x2cf   : > { %v2769_v24 = vmax.f32 %v2699_v26, 0.0 }
 0x2d0   : > { %v2776_v12 = vpack.c.bf16 %v2768_v25, %v2768_v25 }
 0x2d1   : > { %v2777_v41 = vpack.c.bf16 %v2769_v24, %v2769_v24 }
 0x2d2   : > { %3317 = vmatmul.bf16.vlgmr.msrb.gmra.mxu2 %v2776_v12 }
 0x2d3   : > { %3330 = vmatmul.bf16.vlgmr.msrb.gmra.mxu3 %v2777_v41  ;;  %v2687_v33 = vpop.f32.mrf.mxu2 }
 0x2d4   : > { %v2700_v35 = vpop.f32.mrf.mxu3 }
 0x2d5   : > { %v2724_v39 = vpop.f32.mrf.mxu1 }
 0x2d6   : > { %v2725_v45 = vadd.f32 %v2724_v39, %v2648_v56  ;;  %v2763_v48 = vpop.f32.mrf.mxu0 }
 0x2d7   : > { %v2764_v50 = vadd.f32 %v2763_v48, %v2651_v34 }
 0x2d8   : > { %v2771_v44 = vmax.f32 %v2725_v45, 0.0 }
 0x2d9   : > { %v2774_v53 = vmax.f32 %v2764_v50, 0.0 }
 0x2da   : > { %v2779_v46 = vpack.c.bf16 %v2771_v44, %v2771_v44 }
 0x2db   : > { %v2782_v55 = vpack.c.bf16 %v2774_v53, %v2774_v53  ;;  %v2737_v59 = vpop.f32.mrf.mxu2 }
 0x2dc   : > { %v2738_v20 = vadd.f32 %v2737_v59, %v2649_v52  ;;  %v2750_v40 = vpop.f32.mrf.mxu3  ;;  %3356 = vmatmul.bf16.vlgmr.msra.gmra.mxu1 %v2779_v46 }
 0x2dd   : > { %v2751_v43 = vadd.f32 %v2750_v40, %v2650_v54  ;;  %3395 = vmatmul.bf16.vlgmr.msrb.gmra.mxu0 %v2782_v55  ;;  %v2726_v37 = vpop.f32.mrf.mxu1 }
 0x2de   : > { %v2772_v60 = vmax.f32 %v2738_v20, 0.0  ;;  %v2765_v63 = vpop.f32.mrf.mxu0 }
 0x2df   : > { %v2773_v21 = vmax.f32 %v2751_v43, 0.0 }
 0x2e0   : > { %v2780_v61 = vpack.c.bf16 %v2772_v60, %v2772_v60 }
 0x2e1   : > { %v2781_v51 = vpack.c.bf16 %v2773_v21, %v2773_v21 }
 0x2e2   : > { %3369 = vmatmul.bf16.vlgmr.msra.gmra.mxu2 %v2780_v61 }
 0x2e3   : > { %3382 = vmatmul.bf16.vlgmr.msra.gmra.mxu3 %v2781_v51  ;;  %v2739_v0 = vpop.f32.mrf.mxu2 }
 0x2e4   : > { %v2752_v42 = vpop.f32.mrf.mxu3 }
 0x349   : > { %v3305_v62 = vpop.f32.mrf.mxu1 }
 0x34a   : > { %v3344_v1 = vpop.f32.mrf.mxu0  ;;  %v3306_v8 = vadd.f32 %v3305_v62, %v2911_v5 }
 0x351   : > { %v3307_v3 = vpop.f32.mrf.mxu1 }
 0x352   : > { %v3346_v4 = vpop.f32.mrf.mxu0 }
 0x355   : > { %v3318_v32 = vpop.f32.mrf.mxu2 }
 0x356   : > { %v3331_v30 = vpop.f32.mrf.mxu3  ;;  %v3319_v47 = vadd.f32 %v3318_v32, %v3306_v8 }
 0x358   : > { %v3332_v36 = vadd.f32 %v3331_v30, %v3319_v47 }
 0x359   : > { %v3357_v2 = vpop.f32.mrf.mxu1 }
 0x35a   : > { %v3396_v7 = vpop.f32.mrf.mxu0  ;;  %v3345_v6 = vadd.f32 %v3344_v1, %v3332_v36 }
 0x35c   : > { %v3358_v57 = vadd.f32 %v3357_v2, %v3345_v6 }
 0x35d   : > { %v3320_v10 = vpop.f32.mrf.mxu2 }
 0x35e   : > { %v3333_v11 = vpop.f32.mrf.mxu3 }
 0x361   : > { %v3359_v14 = vpop.f32.mrf.mxu1 }
 0x362   : > { %v3398_v15 = vpop.f32.mrf.mxu0 }
 0x365   : > { %v3370_v16 = vpop.f32.mrf.mxu2 }
 0x366   : > { %v3371_v38 = vadd.f32 %v3370_v16, %v3358_v57  ;;  %v3383_v17 = vpop.f32.mrf.mxu3 }
 0x368   : > { %v3384_v29 = vadd.f32 %v3383_v17, %v3371_v38 }
 0x36a   : > { %v3397_v18 = vadd.f32 %v3396_v7, %v3384_v29 }
 0x36c   : > { %3400 = vst [vmem:[%s382_s15] sm:$0x1] %v3397_v18 }
 0x36d   : > { %v3372_v49 = vpop.f32.mrf.mxu2 }
 0x36e   : > { %v3385_v19 = vpop.f32.mrf.mxu3 }
 0x36f PF: > { %s21_s17 = sadd.s32 1, %s4647_s17  }
 0x370   : > { %p18_p4 = scmp.ge.s32.totalorder %s21_s17, 4  }
 0x372   :  { %20 = sbr.rel (!%p18_p4) target bundleno = 1 (0x1), region = 128 }

</bundles_post_ra>
